<compile_context>
chip_gen: v5e
topology: v5e:2x2
jax: 0.10.0
libtpu: 0.0.40
codegen_flags: <defaults>
</compile_context>

<pallas_src>
import math

import jax
import jax.numpy as jnp
from jax import lax
from jax.experimental import pallas as pl
from jax.experimental.pallas import tpu as pltpu

# ---------------- small synthetic configuration (scaled-down ViT-B/16) -------
B = 4            # batch (small test size)
C = 3            # image channels
IMG = 32         # image height/width
P = 16           # patch size
N_PATCH = (IMG // P) ** 2          # 4
SEQ = N_PATCH + 1                  # 5 (CLS + patches)
SEQ_PAD = ((SEQ + 7) // 8) * 8     # 8  -- sublane-aligned token count
D = 128          # hidden width (768 in real phikon) -- lane-dense
HEADS = 4        # attention heads (12 in real phikon)
HEAD_DIM = D // HEADS              # 32
MLP = 4 * D
DEPTH = 2        # transformer blocks (12 in real phikon)
EPS = 1e-12      # HF ViT layer_norm_eps
CPP = C * P * P

# Images per grid step.  For real ViT-B/16 pick BATCH_TILE so that
# BATCH_TILE * SEQ_PAD is a multiple of 256 (v6e/v7x MXU) / 128 (v5e) and the
# double-buffered per-block weights + activations fit VMEM (~4 imgs on v7x,
# ~8 on v5e/v6e).  Batch tiles > 1 also feed v7x's 2 TensorCores.
BATCH_TILE = 2
ROWS = BATCH_TILE * SEQ_PAD
PATCH_ROWS = BATCH_TILE * N_PATCH
MLP_CHUNK = min(MLP, 512)          # K-chunk of the MLP hidden dimension

# TODO(synk): on v7x, fp8 storage for wqkv/wo/w1/w2 would halve weight DMA and
# the double-buffered VMEM footprint (needs numerics validation vs HF).


# ------------------------------ kernel helpers --------------------------------
def _layernorm(x, g, b):
    mu = jnp.mean(x, axis=-1, keepdims=True)
    var = jnp.mean(jnp.square(x - mu), axis=-1, keepdims=True)
    return (x - mu) * lax.rsqrt(var + EPS) * g + b


def _gelu(x):
    # exact GELU (HF ViT hidden_act="gelu")
    # TODO(synk): jax.nn.gelu(approximate=True) would use the EUP tanh path on
    # v6e/v7x; kept exact here for HF-matching numerics.
    return 0.5 * x * (1.0 + lax.erf(x * 0.7071067811865476))


# ------------------------------ fused ViT kernel -------------------------------
def _vit_fused_kernel(
        xp_hbm, pw_ref, pb_ref, cls_ref, pos_ref,
        g1_ref, b1_ref, wqkv_ref, bqkv_ref, wo_ref, bo_ref,
        g2_ref, b2_ref, w1_ref, bb1_ref, w2_ref, bb2_ref,
        gf_ref, bf_ref,
        o_ref,
        tok_ref, xps_ref, dma_sem):
    nb = pl.program_id(0)          # batch-tile index (parallel)
    d = pl.program_id(1)           # transformer depth (sequential)
    bf16 = jnp.bfloat16
    f32 = jnp.float32

    # ---- d == 0: patch embedding + [CLS] + positional embeddings -----------
    # xp stays in HBM (memory_space=ANY); only this batch tile's rows are
    # DMA'd into the VMEM staging buffer, and only on the first depth step.
    @pl.when(d == 0)
    def _():
        row0 = pl.multiple_of(nb * PATCH_ROWS, PATCH_ROWS)
        cp = pltpu.make_async_copy(
            xp_hbm.at[pl.ds(row0, PATCH_ROWS), :], xps_ref, dma_sem)
        cp.start()
        cp.wait()
        emb = jnp.dot(xps_ref[...], pw_ref[...],
                      preferred_element_type=f32) + pb_ref[...]   # (BT*N, D)
        # aligned slab writes on the 3-D token scratch
        tok_ref[:, 0:1, :] = jnp.broadcast_to(
            (cls_ref[...] + pos_ref[0:1, :])[None], (BATCH_TILE, 1, D))
        tok_ref[:, 1:SEQ, :] = (emb.reshape(BATCH_TILE, N_PATCH, D)
                                + pos_ref[1:SEQ, :][None])
        if SEQ_PAD > SEQ:
            tok_ref[:, SEQ:SEQ_PAD, :] = jnp.zeros(
                (BATCH_TILE, SEQ_PAD - SEQ, D), f32)

    # ---- one pre-LN transformer block over the whole batch tile -------------
    x = tok_ref[...].reshape(ROWS, D)                        # (rows, D) f32

    # multi-head self-attention
    xn = _layernorm(x, g1_ref[...], b1_ref[...])
    qkv = jnp.dot(xn.astype(bf16), wqkv_ref[...],
                  preferred_element_type=f32) + bqkv_ref[...]    # (rows, 3D)
    # 128-lane-aligned slices, then (BT, S, D) views — no head transpose.
    q = qkv[:, 0 * D:1 * D].reshape(BATCH_TILE, SEQ_PAD, D)
    k = qkv[:, 1 * D:2 * D].reshape(BATCH_TILE, SEQ_PAD, D)
    v = qkv[:, 2 * D:3 * D].reshape(BATCH_TILE, SEQ_PAD, D)

    # mask padded key columns (positions >= SEQ) before the softmax
    kmask = lax.broadcasted_iota(jnp.int32, (1, 1, SEQ_PAD), 2) >= SEQ

    ctx_heads = []
    for h in range(HEADS):                       # static, unrolled at trace time
        sl = slice(h * HEAD_DIM, (h + 1) * HEAD_DIM)   # static lane slice
        qh = q[:, :, sl].astype(bf16)
        kh = k[:, :, sl].astype(bf16)
        vh = v[:, :, sl].astype(bf16)
        # 1/sqrt(HEAD_DIM) already folded into wqkv's Q slice on the host.
        s = jnp.einsum('bqc,bkc->bqk', qh, kh,
                       preferred_element_type=f32)           # (BT, S, S)
        s = jnp.where(kmask, -1e30, s)
        s = s - jnp.max(s, axis=-1, keepdims=True)
        p = jnp.exp(s)
        p = p * pl.reciprocal(jnp.sum(p, axis=-1, keepdims=True), approx=False)
        ctx_heads.append(jnp.einsum('bqk,bkc->bqc', p.astype(bf16), vh,
                                    preferred_element_type=f32))
    ctx = jnp.concatenate(ctx_heads, axis=-1).reshape(ROWS, D)
    attn = jnp.dot(ctx.astype(bf16), wo_ref[...],
                   preferred_element_type=f32) + bo_ref[...]
    x = x + attn

    # MLP, chunked over the hidden (4*D) dimension; GELU output cast to bf16
    # immediately so the big hidden intermediate never lives in f32.
    xn2 = _layernorm(x, g2_ref[...], b2_ref[...]).astype(bf16)
    mlp_out = jnp.zeros((ROWS, D), f32)
    for c0 in range(0, MLP, MLP_CHUNK):
        c1 = c0 + MLP_CHUNK
        hid = jnp.dot(xn2, w1_ref[:, c0:c1],
                      preferred_element_type=f32) + bb1_ref[:, c0:c1]
        hid = _gelu(hid).astype(bf16)
        mlp_out = mlp_out + jnp.dot(hid, w2_ref[c0:c1, :],
                                    preferred_element_type=f32)
    x = x + mlp_out + bb2_ref[...]

    x3 = x.reshape(BATCH_TILE, SEQ_PAD, D)
    tok_ref[...] = x3                                         # carry to next depth

    # ---- last depth step: final LayerNorm of the CLS row --------------------
    @pl.when(d == pl.num_programs(1) - 1)
    def _():
        cls_out = x3[:, 0:1, :].reshape(BATCH_TILE, D)        # aligned slab read
        o_ref[...] = _layernorm(cls_out, gf_ref[...], bf_ref[...])


# ------------------------------ BlockSpec helpers ------------------------------
def _fixed_spec(arr):
    """Small array fully resident in VMEM; same block at every grid step."""
    zeros = (0,) * arr.ndim
    return pl.BlockSpec(tuple(arr.shape), lambda nb, d, z=zeros: z)


def _stacked_spec(arr):
    """Per-depth weight slice [d], streamed (double-buffered) by the depth axis."""
    tail = (0,) * (arr.ndim - 1)
    return pl.BlockSpec((None,) + tuple(arr.shape[1:]),
                        lambda nb, d, t=tail: (d,) + t)


# ------------------------------ wrapper ---------------------------------------
@jax.jit
def phikon_forward(x, params):
    """x: [B, C, H, W] float32 (NCHW, like PyTorch) -> CLS features [B, D]."""
    Bn, Cc, Hh, Ww = x.shape
    assert Bn % BATCH_TILE == 0
    nb_tiles = Bn // BATCH_TILE
    gh, gw = Hh // P, Ww // P
    # conv-as-matmul patchify: flatten each PxP patch in (C, Ph, Pw) order,
    # matching a PyTorch Conv2d weight [D, C, P, P].  bf16, stays in HBM and is
    # DMA'd per batch tile only at d == 0.
    xp = (x.reshape(Bn, Cc, gh, P, gw, P)
            .transpose(0, 2, 4, 1, 3, 5)
            .reshape(Bn * gh * gw, Cc * P * P)
            .astype(jnp.bfloat16))

    fixed_pre = (params["patch_w"], params["patch_b"], params["cls"], params["pos"])
    stacked = (params["ln1_g"], params["ln1_b"], params["wqkv"], params["bqkv"],
               params["wo"], params["bo"], params["ln2_g"], params["ln2_b"],
               params["w1"], params["b1"], params["w2"], params["b2"])
    fixed_post = (params["lnf_g"], params["lnf_b"])

    in_specs = ([pl.BlockSpec(memory_space=pl.ANY)]          # xp stays in HBM
                + [_fixed_spec(a) for a in fixed_pre]
                + [_stacked_spec(a) for a in stacked]
                + [_fixed_spec(a) for a in fixed_post])

    out = pl.pallas_call(
        _vit_fused_kernel,
        # 3-D output so the block's trailing dims equal the array's trailing
        # dims (clean (8,128)-rule compliance for any BATCH_TILE).
        out_shape=jax.ShapeDtypeStruct((nb_tiles, BATCH_TILE, D), jnp.float32),
        grid=(nb_tiles, DEPTH),
        in_specs=in_specs,
        out_specs=pl.BlockSpec((None, BATCH_TILE, D), lambda nb, d: (nb, 0, 0)),
        scratch_shapes=[
            pltpu.VMEM((BATCH_TILE, SEQ_PAD, D), jnp.float32),     # token carry
            pltpu.VMEM((PATCH_ROWS, CPP), jnp.bfloat16),           # xp staging
            pltpu.SemaphoreType.DMA,                               # xp DMA sem
        ],
        compiler_params=pltpu.CompilerParams(
            # batch tiles are independent (2 TCs on v7x); depth is sequential
            dimension_semantics=("parallel", "arbitrary"),
            # 48 MiB leaves headroom on v7x (64 MiB physical); raise toward
            # ~96-110 MiB (with a larger BATCH_TILE) on v5e/v6e.
            vmem_limit_bytes=48 * 1024 * 1024),
    )(xp, *fixed_pre, *stacked, *fixed_post)
    return out.reshape(Bn, D)


# ------------------------------ synthetic parameters ---------------------------
def init_params(key):
    keys = iter(jax.random.split(key, 32))
    f32, bf16 = jnp.float32, jnp.bfloat16

    def nrm(shape, scale=0.02):
        return scale * jax.random.normal(next(keys), shape, f32)

    # Fold the 1/sqrt(HEAD_DIM) attention scale into the Q projection (weights
    # AND bias) on the host, so the kernel never rescales the score tensor.
    scale = 1.0 / math.sqrt(HEAD_DIM)
    wqkv = nrm((DEPTH, D, 3 * D))
    wqkv = wqkv.at[:, :, :D].multiply(scale)
    bqkv = jnp.zeros((DEPTH, 1, 3 * D), f32)
    bqkv = bqkv.at[:, :, :D].multiply(scale)

    return {
        # patch embedding (Conv2d PxP stride P as a matmul) -- bf16 weights
        "patch_w": nrm((CPP, D)).astype(bf16),
        "patch_b": jnp.zeros((1, D), f32),
        "cls": nrm((1, D)),
        "pos": nrm((SEQ, D)),
        # per-block parameters stacked along a leading DEPTH axis
        "ln1_g": jnp.ones((DEPTH, 1, D), f32),
        "ln1_b": jnp.zeros((DEPTH, 1, D), f32),
        "wqkv": wqkv.astype(bf16),
        "bqkv": bqkv,
        "wo": nrm((DEPTH, D, D)).astype(bf16),
        "bo": jnp.zeros((DEPTH, 1, D), f32),
        "ln2_g": jnp.ones((DEPTH, 1, D), f32),
        "ln2_b": jnp.zeros((DEPTH, 1, D), f32),
        "w1": nrm((DEPTH, D, MLP)).astype(bf16),
        "b1": jnp.zeros((DEPTH, 1, MLP), f32),
        "w2": nrm((DEPTH, MLP, D)).astype(bf16),
        "b2": jnp.zeros((DEPTH, 1, D), f32),
        # ViTModel.layernorm (final)
        "lnf_g": jnp.ones((1, D), f32),
        "lnf_b": jnp.zeros((1, D), f32),
    }


if __name__ == "__main__":
    key = jax.random.PRNGKey(0)
    kp, kx = jax.random.split(key)
    params = init_params(kp)
    x = jax.random.normal(kx, (B, C, IMG, IMG), jnp.float32)   # NCHW like PyTorch
    out = phikon_forward(x, params)
    out = jax.block_until_ready(out)
    assert out.shape == (B, D) and out.dtype == jnp.float32
    assert bool(jnp.all(jnp.isfinite(out)))
    print("KERNEL_OK")
</pallas_src>

<mosaic_0001>
module attributes {stable_mosaic.version = 11 : i64} {
  func.func @_vit_fused_kernel(%arg0: i32, %arg1: i32, %arg2: memref<16x768xbf16, #tpu.memory_space<any>>, %arg3: memref<768x128xbf16, #tpu.memory_space<vmem>>, %arg4: memref<1x128xf32, #tpu.memory_space<vmem>>, %arg5: memref<1x128xf32, #tpu.memory_space<vmem>>, %arg6: memref<5x128xf32, #tpu.memory_space<vmem>>, %arg7: memref<1x1x128xf32, #tpu.memory_space<vmem>>, %arg8: memref<1x1x128xf32, #tpu.memory_space<vmem>>, %arg9: memref<1x128x384xbf16, #tpu.memory_space<vmem>>, %arg10: memref<1x1x384xf32, #tpu.memory_space<vmem>>, %arg11: memref<1x128x128xbf16, #tpu.memory_space<vmem>>, %arg12: memref<1x1x128xf32, #tpu.memory_space<vmem>>, %arg13: memref<1x1x128xf32, #tpu.memory_space<vmem>>, %arg14: memref<1x1x128xf32, #tpu.memory_space<vmem>>, %arg15: memref<1x128x512xbf16, #tpu.memory_space<vmem>>, %arg16: memref<1x1x512xf32, #tpu.memory_space<vmem>>, %arg17: memref<1x512x128xbf16, #tpu.memory_space<vmem>>, %arg18: memref<1x1x128xf32, #tpu.memory_space<vmem>>, %arg19: memref<1x128xf32, #tpu.memory_space<vmem>>, %arg20: memref<1x128xf32, #tpu.memory_space<vmem>>, %arg21: memref<1x2x128xf32, #tpu.memory_space<vmem>>, %arg22: memref<2x8x128xf32, #tpu.memory_space<vmem>>, %arg23: memref<8x768xbf16, #tpu.memory_space<vmem>>, %arg24: memref<!tpu.dma_semaphore, #tpu.memory_space<semaphore_mem>>) attributes {dimension_semantics = [#tpu.dimension_semantics<parallel>, #tpu.dimension_semantics<arbitrary>], iteration_bounds = array<i64: 2, 2>, scalar_prefetch = 0 : i64, scratch_operands = 3 : i64, tpu.core_type = #tpu.core_type<tc>, window_params = [{}, {pipeline_mode = #tpu.pipeline_mode<synchronous>, transform_indices = @transform_1, window_bounds = array<i64: 768, 128>}, {pipeline_mode = #tpu.pipeline_mode<synchronous>, transform_indices = @transform_2, window_bounds = array<i64: 1, 128>}, {pipeline_mode = #tpu.pipeline_mode<synchronous>, transform_indices = @transform_3, window_bounds = array<i64: 1, 128>}, {pipeline_mode = #tpu.pipeline_mode<synchronous>, transform_indices = @transform_4, window_bounds = array<i64: 5, 128>}, {transform_indices = @transform_5, window_bounds = array<i64: 1, 1, 128>}, {transform_indices = @transform_6, window_bounds = array<i64: 1, 1, 128>}, {transform_indices = @transform_7, window_bounds = array<i64: 1, 128, 384>}, {transform_indices = @transform_8, window_bounds = array<i64: 1, 1, 384>}, {transform_indices = @transform_9, window_bounds = array<i64: 1, 128, 128>}, {transform_indices = @transform_10, window_bounds = array<i64: 1, 1, 128>}, {transform_indices = @transform_11, window_bounds = array<i64: 1, 1, 128>}, {transform_indices = @transform_12, window_bounds = array<i64: 1, 1, 128>}, {transform_indices = @transform_13, window_bounds = array<i64: 1, 128, 512>}, {transform_indices = @transform_14, window_bounds = array<i64: 1, 1, 512>}, {transform_indices = @transform_15, window_bounds = array<i64: 1, 512, 128>}, {transform_indices = @transform_16, window_bounds = array<i64: 1, 1, 128>}, {pipeline_mode = #tpu.pipeline_mode<synchronous>, transform_indices = @transform_17, window_bounds = array<i64: 1, 128>}, {pipeline_mode = #tpu.pipeline_mode<synchronous>, transform_indices = @transform_18, window_bounds = array<i64: 1, 128>}, {transform_indices = @transform_19, window_bounds = array<i64: 1, 2, 128>}]} {
    %c0_i32 = arith.constant 0 : i32
    %0 = arith.cmpi eq, %arg1, %c0_i32 : i32
    %1 = arith.extui %0 : i1 to i32
    %c0_i32_0 = arith.constant 0 : i32
    %2 = arith.cmpi ne, %1, %c0_i32_0 : i32
    scf.if %2 {
      %c8_i32 = arith.constant 8 : i32
      %209 = arith.muli %arg0, %c8_i32 : i32
      %210 = tpu.assume_multiple %209, 8 : i32
      %c0_i32_80 = arith.constant 0 : i32
      %211 = tpu.memref_slice %arg2[%210, %c0_i32_80] : memref<16x768xbf16, #tpu.memory_space<any>> -> memref<8x768xbf16, #tpu.memory_space<any>>
      tpu.enqueue_dma source(%211 : memref<8x768xbf16, #tpu.memory_space<any>>) target(%arg23 : memref<8x768xbf16, #tpu.memory_space<vmem>>) target_semaphore(%arg24 : memref<!tpu.dma_semaphore, #tpu.memory_space<semaphore_mem>>)
      %c0_i32_81 = arith.constant 0 : i32
      %212 = tpu.memref_slice %arg2[%210, %c0_i32_81] : memref<16x768xbf16, #tpu.memory_space<any>> -> memref<8x768xbf16, #tpu.memory_space<any>>
      tpu.wait_dma2 semaphore(%arg24 : memref<!tpu.dma_semaphore, #tpu.memory_space<semaphore_mem>>) src(%212 : memref<8x768xbf16, #tpu.memory_space<any>>) dst(%arg23 : memref<8x768xbf16, #tpu.memory_space<vmem>>)
      %c0_82 = arith.constant 0 : index
      %c0_83 = arith.constant 0 : index
      %213 = vector.load %arg23[%c0_82, %c0_83] : memref<8x768xbf16, #tpu.memory_space<vmem>>, vector<8x768xbf16>
      %c0_84 = arith.constant 0 : index
      %c0_85 = arith.constant 0 : index
      %214 = vector.load %arg3[%c0_84, %c0_85] : memref<768x128xbf16, #tpu.memory_space<vmem>>, vector<768x128xbf16>
      %cst_86 = arith.constant dense<0.000000e+00> : vector<8x128xf32>
      %215 = tpu.matmul %213, %214, %cst_86 {dimension_numbers = #tpu.dot_dimension_numbers<[1], [0], [0], [1], [0, 0, 1, 1], [], []>} : vector<8x768xbf16>, vector<768x128xbf16>, vector<8x128xf32> -> vector<8x128xf32>
      %c0_87 = arith.constant 0 : index
      %c0_88 = arith.constant 0 : index
      %216 = vector.load %arg4[%c0_87, %c0_88] : memref<1x128xf32, #tpu.memory_space<vmem>>, vector<1x128xf32>
      %217 = vector.broadcast %216 : vector<1x128xf32> to vector<8x128xf32>
      %218 = arith.addf %215, %217 : vector<8x128xf32>
      %c0_89 = arith.constant 0 : index
      %c0_90 = arith.constant 0 : index
      %219 = vector.load %arg5[%c0_89, %c0_90] : memref<1x128xf32, #tpu.memory_space<vmem>>, vector<1x128xf32>
      %c0_91 = arith.constant 0 : index
      %c0_92 = arith.constant 0 : index
      %220 = vector.load %arg6[%c0_91, %c0_92] : memref<5x128xf32, #tpu.memory_space<vmem>>, vector<1x128xf32>
      %221 = arith.addf %219, %220 : vector<1x128xf32>
      %222 = vector.shape_cast %221 : vector<1x128xf32> to vector<1x1x128xf32>
      %223 = vector.shape_cast %222 : vector<1x1x128xf32> to vector<1x1x128xf32>
      %224 = vector.broadcast %223 : vector<1x1x128xf32> to vector<2x1x128xf32>
      %c0_93 = arith.constant 0 : index
      %c0_94 = arith.constant 0 : index
      %c0_95 = arith.constant 0 : index
      %225 = vector.load %arg22[%c0_93, %c0_94, %c0_95] : memref<2x8x128xf32, #tpu.memory_space<vmem>>, vector<2x1x128xf32>
      tpu.vector_store %arg22[%c0_93, %c0_94, %c0_95], %224 {strides = array<i32>} : memref<2x8x128xf32, #tpu.memory_space<vmem>>, vector<2x1x128xf32>,
      %226 = vector.shape_cast %218 : vector<8x128xf32> to vector<2x4x128xf32>
      %c1 = arith.constant 1 : index
      %c0_96 = arith.constant 0 : index
      %227 = vector.load %arg6[%c1, %c0_96] : memref<5x128xf32, #tpu.memory_space<vmem>>, vector<4x128xf32>
      %228 = vector.shape_cast %227 : vector<4x128xf32> to vector<1x4x128xf32>
      %229 = vector.broadcast %228 : vector<1x4x128xf32> to vector<2x4x128xf32>
      %230 = arith.addf %226, %229 : vector<2x4x128xf32>
      %c0_97 = arith.constant 0 : index
      %c1_98 = arith.constant 1 : index
      %c0_99 = arith.constant 0 : index
      %231 = vector.load %arg22[%c0_97, %c1_98, %c0_99] : memref<2x8x128xf32, #tpu.memory_space<vmem>>, vector<2x4x128xf32>
      tpu.vector_store %arg22[%c0_97, %c1_98, %c0_99], %230 {strides = array<i32>} : memref<2x8x128xf32, #tpu.memory_space<vmem>>, vector<2x4x128xf32>,
      %cst_100 = arith.constant 0.000000e+00 : f32
      %232 = vector.broadcast %cst_100 : f32 to vector<2x3x128xf32>
      %c0_101 = arith.constant 0 : index
      %c5 = arith.constant 5 : index
      %c0_102 = arith.constant 0 : index
      %233 = vector.load %arg22[%c0_101, %c5, %c0_102] : memref<2x8x128xf32, #tpu.memory_space<vmem>>, vector<2x3x128xf32>
      tpu.vector_store %arg22[%c0_101, %c5, %c0_102], %232 {strides = array<i32>} : memref<2x8x128xf32, #tpu.memory_space<vmem>>, vector<2x3x128xf32>,
    } else {
    }
    %c0 = arith.constant 0 : index
    %c0_1 = arith.constant 0 : index
    %c0_2 = arith.constant 0 : index
    %3 = vector.load %arg22[%c0, %c0_1, %c0_2] : memref<2x8x128xf32, #tpu.memory_space<vmem>>, vector<2x8x128xf32>
    %4 = vector.shape_cast %3 : vector<2x8x128xf32> to vector<16x128xf32>
    %c0_3 = arith.constant 0 : index
    %c0_4 = arith.constant 0 : index
    %c0_5 = arith.constant 0 : index
    %5 = vector.load %arg7[%c0_3, %c0_4, %c0_5] : memref<1x1x128xf32, #tpu.memory_space<vmem>>, vector<1x1x128xf32>
    %6 = vector.shape_cast %5 : vector<1x1x128xf32> to vector<1x128xf32>
    %c0_6 = arith.constant 0 : index
    %c0_7 = arith.constant 0 : index
    %c0_8 = arith.constant 0 : index
    %7 = vector.load %arg8[%c0_6, %c0_7, %c0_8] : memref<1x1x128xf32, #tpu.memory_space<vmem>>, vector<1x1x128xf32>
    %8 = vector.shape_cast %7 : vector<1x1x128xf32> to vector<1x128xf32>
    %cst = arith.constant dense<0.000000e+00> : vector<16xf32>
    %9 = vector.multi_reduction <add>, %4, %cst [1] : vector<16x128xf32> to vector<16xf32>
    %10 = vector.shape_cast %9 : vector<16xf32> to vector<16x1xf32>
    %cst_9 = arith.constant 1.280000e+02 : f32
    %11 = vector.broadcast %cst_9 : f32 to vector<16x1xf32>
    %12 = arith.divf %10, %11 : vector<16x1xf32>
    %13 = vector.broadcast %12 : vector<16x1xf32> to vector<16x128xf32>
    %14 = arith.subf %4, %13 : vector<16x128xf32>
    %15 = arith.mulf %14, %14 : vector<16x128xf32>
    %cst_10 = arith.constant dense<0.000000e+00> : vector<16xf32>
    %16 = vector.multi_reduction <add>, %15, %cst_10 [1] : vector<16x128xf32> to vector<16xf32>
    %17 = vector.shape_cast %16 : vector<16xf32> to vector<16x1xf32>
    %cst_11 = arith.constant 1.280000e+02 : f32
    %18 = vector.broadcast %cst_11 : f32 to vector<16x1xf32>
    %19 = arith.divf %17, %18 : vector<16x1xf32>
    %20 = vector.broadcast %12 : vector<16x1xf32> to vector<16x128xf32>
    %21 = arith.subf %4, %20 : vector<16x128xf32>
    %cst_12 = arith.constant 9.99999996E-13 : f32
    %22 = vector.broadcast %cst_12 : f32 to vector<16x1xf32>
    %23 = arith.addf %19, %22 : vector<16x1xf32>
    %24 = math.rsqrt %23 : vector<16x1xf32>
    %25 = vector.broadcast %24 : vector<16x1xf32> to vector<16x128xf32>
    %26 = arith.mulf %21, %25 : vector<16x128xf32>
    %27 = vector.broadcast %6 : vector<1x128xf32> to vector<16x128xf32>
    %28 = arith.mulf %26, %27 : vector<16x128xf32>
    %29 = vector.broadcast %8 : vector<1x128xf32> to vector<16x128xf32>
    %30 = arith.addf %28, %29 : vector<16x128xf32>
    %31 = arith.truncf %30 : vector<16x128xf32> to vector<16x128xbf16>
    %c0_13 = arith.constant 0 : index
    %c0_14 = arith.constant 0 : index
    %c0_15 = arith.constant 0 : index
    %32 = vector.load %arg9[%c0_13, %c0_14, %c0_15] : memref<1x128x384xbf16, #tpu.memory_space<vmem>>, vector<1x128x384xbf16>
    %33 = vector.shape_cast %32 : vector<1x128x384xbf16> to vector<128x384xbf16>
    %cst_16 = arith.constant dense<0.000000e+00> : vector<16x384xf32>
    %34 = tpu.matmul %31, %33, %cst_16 {dimension_numbers = #tpu.dot_dimension_numbers<[1], [0], [0], [1], [0, 0, 1, 1], [], []>} : vector<16x128xbf16>, vector<128x384xbf16>, vector<16x384xf32> -> vector<16x384xf32>
    %c0_17 = arith.constant 0 : index
    %c0_18 = arith.constant 0 : index
    %c0_19 = arith.constant 0 : index
    %35 = vector.load %arg10[%c0_17, %c0_18, %c0_19] : memref<1x1x384xf32, #tpu.memory_space<vmem>>, vector<1x1x384xf32>
    %36 = vector.shape_cast %35 : vector<1x1x384xf32> to vector<1x384xf32>
    %37 = vector.broadcast %36 : vector<1x384xf32> to vector<16x384xf32>
    %38 = arith.addf %34, %37 : vector<16x384xf32>
    %39 = vector.extract_strided_slice %38 {offsets = [0, 0], sizes = [16, 128], strides = [1, 1]} : vector<16x384xf32> to vector<16x128xf32>
    %40 = vector.shape_cast %39 : vector<16x128xf32> to vector<2x8x128xf32>
    %41 = vector.extract_strided_slice %38 {offsets = [0, 128], sizes = [16, 128], strides = [1, 1]} : vector<16x384xf32> to vector<16x128xf32>
    %42 = vector.shape_cast %41 : vector<16x128xf32> to vector<2x8x128xf32>
    %43 = vector.extract_strided_slice %38 {offsets = [0, 256], sizes = [16, 128], strides = [1, 1]} : vector<16x384xf32> to vector<16x128xf32>
    %44 = vector.shape_cast %43 : vector<16x128xf32> to vector<2x8x128xf32>
    %45 = tpu.iota {dimensions = array<i32: 2>} : vector<1x1x8xi32>
    %c5_i32 = arith.constant 5 : i32
    %46 = vector.broadcast %c5_i32 : i32 to vector<1x1x8xi32>
    %47 = arith.cmpi sge, %45, %46 : vector<1x1x8xi32>
    %48 = vector.extract_strided_slice %40 {offsets = [0, 0, 0], sizes = [2, 8, 32], strides = [1, 1, 1]} : vector<2x8x128xf32> to vector<2x8x32xf32>
    %49 = arith.truncf %48 : vector<2x8x32xf32> to vector<2x8x32xbf16>
    %50 = vector.extract_strided_slice %42 {offsets = [0, 0, 0], sizes = [2, 8, 32], strides = [1, 1, 1]} : vector<2x8x128xf32> to vector<2x8x32xf32>
    %51 = arith.truncf %50 : vector<2x8x32xf32> to vector<2x8x32xbf16>
    %52 = vector.extract_strided_slice %44 {offsets = [0, 0, 0], sizes = [2, 8, 32], strides = [1, 1, 1]} : vector<2x8x128xf32> to vector<2x8x32xf32>
    %53 = arith.truncf %52 : vector<2x8x32xf32> to vector<2x8x32xbf16>
    "tpu.trace_start"() <{level = 10 : i32, message = "bqc,bkc->bqk"}> : () -> ()
    %cst_20 = arith.constant dense<0.000000e+00> : vector<2x8x8xf32>
    %54 = tpu.matmul %49, %51, %cst_20 {dimension_numbers = #tpu.dot_dimension_numbers<[2], [2], [1], [1], [0, 0, 0, 1, 1, 1], [0], [0]>} : vector<2x8x32xbf16>, vector<2x8x32xbf16>, vector<2x8x8xf32> -> vector<2x8x8xf32>
    %cst_21 = arith.constant -1.000000e+30 : f32
    "tpu.trace_stop"() : () -> ()
    %55 = vector.shape_cast %47 : vector<1x1x8xi1> to vector<1x1x8xi1>
    %56 = vector.broadcast %55 : vector<1x1x8xi1> to vector<2x8x8xi1>
    %57 = vector.broadcast %cst_21 : f32 to vector<2x8x8xf32>
    %58 = arith.select %56, %57, %54 : vector<2x8x8xi1>, vector<2x8x8xf32>
    %cst_22 = arith.constant dense<0xFF800000> : vector<2x8xf32>
    %59 = vector.multi_reduction <maximumf>, %58, %cst_22 [2] : vector<2x8x8xf32> to vector<2x8xf32>
    %60 = vector.shape_cast %59 : vector<2x8xf32> to vector<2x8x1xf32>
    %61 = vector.broadcast %60 : vector<2x8x1xf32> to vector<2x8x8xf32>
    %62 = arith.subf %58, %61 : vector<2x8x8xf32>
    %63 = math.exp %62 : vector<2x8x8xf32>
    %cst_23 = arith.constant dense<0.000000e+00> : vector<2x8xf32>
    %64 = vector.multi_reduction <add>, %63, %cst_23 [2] : vector<2x8x8xf32> to vector<2x8xf32>
    %65 = vector.shape_cast %64 : vector<2x8xf32> to vector<2x8x1xf32>
    %66 = tpu.reciprocal %65 : vector<2x8x1xf32> -> vector<2x8x1xf32>
    %67 = vector.broadcast %66 : vector<2x8x1xf32> to vector<2x8x8xf32>
    %68 = arith.mulf %63, %67 : vector<2x8x8xf32>
    %69 = arith.truncf %68 : vector<2x8x8xf32> to vector<2x8x8xbf16>
    "tpu.trace_start"() <{level = 10 : i32, message = "bqk,bkc->bqc"}> : () -> ()
    %cst_24 = arith.constant dense<0.000000e+00> : vector<2x8x32xf32>
    %70 = tpu.matmul %69, %53, %cst_24 {dimension_numbers = #tpu.dot_dimension_numbers<[2], [1], [1], [2], [0, 0, 0, 1, 1, 2], [0], [0]>} : vector<2x8x8xbf16>, vector<2x8x32xbf16>, vector<2x8x32xf32> -> vector<2x8x32xf32>
    "tpu.trace_stop"() : () -> ()
    %71 = vector.extract_strided_slice %40 {offsets = [0, 0, 32], sizes = [2, 8, 32], strides = [1, 1, 1]} : vector<2x8x128xf32> to vector<2x8x32xf32>
    %72 = arith.truncf %71 : vector<2x8x32xf32> to vector<2x8x32xbf16>
    %73 = vector.extract_strided_slice %42 {offsets = [0, 0, 32], sizes = [2, 8, 32], strides = [1, 1, 1]} : vector<2x8x128xf32> to vector<2x8x32xf32>
    %74 = arith.truncf %73 : vector<2x8x32xf32> to vector<2x8x32xbf16>
    %75 = vector.extract_strided_slice %44 {offsets = [0, 0, 32], sizes = [2, 8, 32], strides = [1, 1, 1]} : vector<2x8x128xf32> to vector<2x8x32xf32>
    %76 = arith.truncf %75 : vector<2x8x32xf32> to vector<2x8x32xbf16>
    "tpu.trace_start"() <{level = 10 : i32, message = "bqc,bkc->bqk"}> : () -> ()
    %cst_25 = arith.constant dense<0.000000e+00> : vector<2x8x8xf32>
    %77 = tpu.matmul %72, %74, %cst_25 {dimension_numbers = #tpu.dot_dimension_numbers<[2], [2], [1], [1], [0, 0, 0, 1, 1, 1], [0], [0]>} : vector<2x8x32xbf16>, vector<2x8x32xbf16>, vector<2x8x8xf32> -> vector<2x8x8xf32>
    %cst_26 = arith.constant -1.000000e+30 : f32
    "tpu.trace_stop"() : () -> ()
    %78 = vector.shape_cast %47 : vector<1x1x8xi1> to vector<1x1x8xi1>
    %79 = vector.broadcast %78 : vector<1x1x8xi1> to vector<2x8x8xi1>
    %80 = vector.broadcast %cst_26 : f32 to vector<2x8x8xf32>
    %81 = arith.select %79, %80, %77 : vector<2x8x8xi1>, vector<2x8x8xf32>
    %cst_27 = arith.constant dense<0xFF800000> : vector<2x8xf32>
    %82 = vector.multi_reduction <maximumf>, %81, %cst_27 [2] : vector<2x8x8xf32> to vector<2x8xf32>
    %83 = vector.shape_cast %82 : vector<2x8xf32> to vector<2x8x1xf32>
    %84 = vector.broadcast %83 : vector<2x8x1xf32> to vector<2x8x8xf32>
    %85 = arith.subf %81, %84 : vector<2x8x8xf32>
    %86 = math.exp %85 : vector<2x8x8xf32>
    %cst_28 = arith.constant dense<0.000000e+00> : vector<2x8xf32>
    %87 = vector.multi_reduction <add>, %86, %cst_28 [2] : vector<2x8x8xf32> to vector<2x8xf32>
    %88 = vector.shape_cast %87 : vector<2x8xf32> to vector<2x8x1xf32>
    %89 = tpu.reciprocal %88 : vector<2x8x1xf32> -> vector<2x8x1xf32>
    %90 = vector.broadcast %89 : vector<2x8x1xf32> to vector<2x8x8xf32>
    %91 = arith.mulf %86, %90 : vector<2x8x8xf32>
    %92 = arith.truncf %91 : vector<2x8x8xf32> to vector<2x8x8xbf16>
    "tpu.trace_start"() <{level = 10 : i32, message = "bqk,bkc->bqc"}> : () -> ()
    %cst_29 = arith.constant dense<0.000000e+00> : vector<2x8x32xf32>
    %93 = tpu.matmul %92, %76, %cst_29 {dimension_numbers = #tpu.dot_dimension_numbers<[2], [1], [1], [2], [0, 0, 0, 1, 1, 2], [0], [0]>} : vector<2x8x8xbf16>, vector<2x8x32xbf16>, vector<2x8x32xf32> -> vector<2x8x32xf32>
    "tpu.trace_stop"() : () -> ()
    %94 = vector.extract_strided_slice %40 {offsets = [0, 0, 64], sizes = [2, 8, 32], strides = [1, 1, 1]} : vector<2x8x128xf32> to vector<2x8x32xf32>
    %95 = arith.truncf %94 : vector<2x8x32xf32> to vector<2x8x32xbf16>
    %96 = vector.extract_strided_slice %42 {offsets = [0, 0, 64], sizes = [2, 8, 32], strides = [1, 1, 1]} : vector<2x8x128xf32> to vector<2x8x32xf32>
    %97 = arith.truncf %96 : vector<2x8x32xf32> to vector<2x8x32xbf16>
    %98 = vector.extract_strided_slice %44 {offsets = [0, 0, 64], sizes = [2, 8, 32], strides = [1, 1, 1]} : vector<2x8x128xf32> to vector<2x8x32xf32>
    %99 = arith.truncf %98 : vector<2x8x32xf32> to vector<2x8x32xbf16>
    "tpu.trace_start"() <{level = 10 : i32, message = "bqc,bkc->bqk"}> : () -> ()
    %cst_30 = arith.constant dense<0.000000e+00> : vector<2x8x8xf32>
    %100 = tpu.matmul %95, %97, %cst_30 {dimension_numbers = #tpu.dot_dimension_numbers<[2], [2], [1], [1], [0, 0, 0, 1, 1, 1], [0], [0]>} : vector<2x8x32xbf16>, vector<2x8x32xbf16>, vector<2x8x8xf32> -> vector<2x8x8xf32>
    %cst_31 = arith.constant -1.000000e+30 : f32
    "tpu.trace_stop"() : () -> ()
    %101 = vector.shape_cast %47 : vector<1x1x8xi1> to vector<1x1x8xi1>
    %102 = vector.broadcast %101 : vector<1x1x8xi1> to vector<2x8x8xi1>
    %103 = vector.broadcast %cst_31 : f32 to vector<2x8x8xf32>
    %104 = arith.select %102, %103, %100 : vector<2x8x8xi1>, vector<2x8x8xf32>
    %cst_32 = arith.constant dense<0xFF800000> : vector<2x8xf32>
    %105 = vector.multi_reduction <maximumf>, %104, %cst_32 [2] : vector<2x8x8xf32> to vector<2x8xf32>
    %106 = vector.shape_cast %105 : vector<2x8xf32> to vector<2x8x1xf32>
    %107 = vector.broadcast %106 : vector<2x8x1xf32> to vector<2x8x8xf32>
    %108 = arith.subf %104, %107 : vector<2x8x8xf32>
    %109 = math.exp %108 : vector<2x8x8xf32>
    %cst_33 = arith.constant dense<0.000000e+00> : vector<2x8xf32>
    %110 = vector.multi_reduction <add>, %109, %cst_33 [2] : vector<2x8x8xf32> to vector<2x8xf32>
    %111 = vector.shape_cast %110 : vector<2x8xf32> to vector<2x8x1xf32>
    %112 = tpu.reciprocal %111 : vector<2x8x1xf32> -> vector<2x8x1xf32>
    %113 = vector.broadcast %112 : vector<2x8x1xf32> to vector<2x8x8xf32>
    %114 = arith.mulf %109, %113 : vector<2x8x8xf32>
    %115 = arith.truncf %114 : vector<2x8x8xf32> to vector<2x8x8xbf16>
    "tpu.trace_start"() <{level = 10 : i32, message = "bqk,bkc->bqc"}> : () -> ()
    %cst_34 = arith.constant dense<0.000000e+00> : vector<2x8x32xf32>
    %116 = tpu.matmul %115, %99, %cst_34 {dimension_numbers = #tpu.dot_dimension_numbers<[2], [1], [1], [2], [0, 0, 0, 1, 1, 2], [0], [0]>} : vector<2x8x8xbf16>, vector<2x8x32xbf16>, vector<2x8x32xf32> -> vector<2x8x32xf32>
    "tpu.trace_stop"() : () -> ()
    %117 = vector.extract_strided_slice %40 {offsets = [0, 0, 96], sizes = [2, 8, 32], strides = [1, 1, 1]} : vector<2x8x128xf32> to vector<2x8x32xf32>
    %118 = arith.truncf %117 : vector<2x8x32xf32> to vector<2x8x32xbf16>
    %119 = vector.extract_strided_slice %42 {offsets = [0, 0, 96], sizes = [2, 8, 32], strides = [1, 1, 1]} : vector<2x8x128xf32> to vector<2x8x32xf32>
    %120 = arith.truncf %119 : vector<2x8x32xf32> to vector<2x8x32xbf16>
    %121 = vector.extract_strided_slice %44 {offsets = [0, 0, 96], sizes = [2, 8, 32], strides = [1, 1, 1]} : vector<2x8x128xf32> to vector<2x8x32xf32>
    %122 = arith.truncf %121 : vector<2x8x32xf32> to vector<2x8x32xbf16>
    "tpu.trace_start"() <{level = 10 : i32, message = "bqc,bkc->bqk"}> : () -> ()
    %cst_35 = arith.constant dense<0.000000e+00> : vector<2x8x8xf32>
    %123 = tpu.matmul %118, %120, %cst_35 {dimension_numbers = #tpu.dot_dimension_numbers<[2], [2], [1], [1], [0, 0, 0, 1, 1, 1], [0], [0]>} : vector<2x8x32xbf16>, vector<2x8x32xbf16>, vector<2x8x8xf32> -> vector<2x8x8xf32>
    %cst_36 = arith.constant -1.000000e+30 : f32
    "tpu.trace_stop"() : () -> ()
    %124 = vector.shape_cast %47 : vector<1x1x8xi1> to vector<1x1x8xi1>
    %125 = vector.broadcast %124 : vector<1x1x8xi1> to vector<2x8x8xi1>
    %126 = vector.broadcast %cst_36 : f32 to vector<2x8x8xf32>
    %127 = arith.select %125, %126, %123 : vector<2x8x8xi1>, vector<2x8x8xf32>
    %cst_37 = arith.constant dense<0xFF800000> : vector<2x8xf32>
    %128 = vector.multi_reduction <maximumf>, %127, %cst_37 [2] : vector<2x8x8xf32> to vector<2x8xf32>
    %129 = vector.shape_cast %128 : vector<2x8xf32> to vector<2x8x1xf32>
    %130 = vector.broadcast %129 : vector<2x8x1xf32> to vector<2x8x8xf32>
    %131 = arith.subf %127, %130 : vector<2x8x8xf32>
    %132 = math.exp %131 : vector<2x8x8xf32>
    %cst_38 = arith.constant dense<0.000000e+00> : vector<2x8xf32>
    %133 = vector.multi_reduction <add>, %132, %cst_38 [2] : vector<2x8x8xf32> to vector<2x8xf32>
    %134 = vector.shape_cast %133 : vector<2x8xf32> to vector<2x8x1xf32>
    %135 = tpu.reciprocal %134 : vector<2x8x1xf32> -> vector<2x8x1xf32>
    %136 = vector.broadcast %135 : vector<2x8x1xf32> to vector<2x8x8xf32>
    %137 = arith.mulf %132, %136 : vector<2x8x8xf32>
    %138 = arith.truncf %137 : vector<2x8x8xf32> to vector<2x8x8xbf16>
    "tpu.trace_start"() <{level = 10 : i32, message = "bqk,bkc->bqc"}> : () -> ()
    %cst_39 = arith.constant dense<0.000000e+00> : vector<2x8x32xf32>
    %139 = tpu.matmul %138, %122, %cst_39 {dimension_numbers = #tpu.dot_dimension_numbers<[2], [1], [1], [2], [0, 0, 0, 1, 1, 2], [0], [0]>} : vector<2x8x8xbf16>, vector<2x8x32xbf16>, vector<2x8x32xf32> -> vector<2x8x32xf32>
    "tpu.trace_stop"() : () -> ()
    %140 = tpu.concatenate %70, %93, %116, %139 in 2 : vector<2x8x32xf32>, vector<2x8x32xf32>, vector<2x8x32xf32>, vector<2x8x32xf32> -> vector<2x8x128xf32>
    %141 = vector.shape_cast %140 : vector<2x8x128xf32> to vector<16x128xf32>
    %142 = arith.truncf %141 : vector<16x128xf32> to vector<16x128xbf16>
    %c0_40 = arith.constant 0 : index
    %c0_41 = arith.constant 0 : index
    %c0_42 = arith.constant 0 : index
    %143 = vector.load %arg11[%c0_40, %c0_41, %c0_42] : memref<1x128x128xbf16, #tpu.memory_space<vmem>>, vector<1x128x128xbf16>
    %144 = vector.shape_cast %143 : vector<1x128x128xbf16> to vector<128x128xbf16>
    %cst_43 = arith.constant dense<0.000000e+00> : vector<16x128xf32>
    %145 = tpu.matmul %142, %144, %cst_43 {dimension_numbers = #tpu.dot_dimension_numbers<[1], [0], [0], [1], [0, 0, 1, 1], [], []>} : vector<16x128xbf16>, vector<128x128xbf16>, vector<16x128xf32> -> vector<16x128xf32>
    %c0_44 = arith.constant 0 : index
    %c0_45 = arith.constant 0 : index
    %c0_46 = arith.constant 0 : index
    %146 = vector.load %arg12[%c0_44, %c0_45, %c0_46] : memref<1x1x128xf32, #tpu.memory_space<vmem>>, vector<1x1x128xf32>
    %147 = vector.shape_cast %146 : vector<1x1x128xf32> to vector<1x128xf32>
    %148 = vector.broadcast %147 : vector<1x128xf32> to vector<16x128xf32>
    %149 = arith.addf %145, %148 : vector<16x128xf32>
    %150 = arith.addf %4, %149 : vector<16x128xf32>
    %c0_47 = arith.constant 0 : index
    %c0_48 = arith.constant 0 : index
    %c0_49 = arith.constant 0 : index
    %151 = vector.load %arg13[%c0_47, %c0_48, %c0_49] : memref<1x1x128xf32, #tpu.memory_space<vmem>>, vector<1x1x128xf32>
    %152 = vector.shape_cast %151 : vector<1x1x128xf32> to vector<1x128xf32>
    %c0_50 = arith.constant 0 : index
    %c0_51 = arith.constant 0 : index
    %c0_52 = arith.constant 0 : index
    %153 = vector.load %arg14[%c0_50, %c0_51, %c0_52] : memref<1x1x128xf32, #tpu.memory_space<vmem>>, vector<1x1x128xf32>
    %154 = vector.shape_cast %153 : vector<1x1x128xf32> to vector<1x128xf32>
    %cst_53 = arith.constant dense<0.000000e+00> : vector<16xf32>
    %155 = vector.multi_reduction <add>, %150, %cst_53 [1] : vector<16x128xf32> to vector<16xf32>
    %156 = vector.shape_cast %155 : vector<16xf32> to vector<16x1xf32>
    %cst_54 = arith.constant 1.280000e+02 : f32
    %157 = vector.broadcast %cst_54 : f32 to vector<16x1xf32>
    %158 = arith.divf %156, %157 : vector<16x1xf32>
    %159 = vector.broadcast %158 : vector<16x1xf32> to vector<16x128xf32>
    %160 = arith.subf %150, %159 : vector<16x128xf32>
    %161 = arith.mulf %160, %160 : vector<16x128xf32>
    %cst_55 = arith.constant dense<0.000000e+00> : vector<16xf32>
    %162 = vector.multi_reduction <add>, %161, %cst_55 [1] : vector<16x128xf32> to vector<16xf32>
    %163 = vector.shape_cast %162 : vector<16xf32> to vector<16x1xf32>
    %cst_56 = arith.constant 1.280000e+02 : f32
    %164 = vector.broadcast %cst_56 : f32 to vector<16x1xf32>
    %165 = arith.divf %163, %164 : vector<16x1xf32>
    %166 = vector.broadcast %158 : vector<16x1xf32> to vector<16x128xf32>
    %167 = arith.subf %150, %166 : vector<16x128xf32>
    %cst_57 = arith.constant 9.99999996E-13 : f32
    %168 = vector.broadcast %cst_57 : f32 to vector<16x1xf32>
    %169 = arith.addf %165, %168 : vector<16x1xf32>
    %170 = math.rsqrt %169 : vector<16x1xf32>
    %171 = vector.broadcast %170 : vector<16x1xf32> to vector<16x128xf32>
    %172 = arith.mulf %167, %171 : vector<16x128xf32>
    %173 = vector.broadcast %152 : vector<1x128xf32> to vector<16x128xf32>
    %174 = arith.mulf %172, %173 : vector<16x128xf32>
    %175 = vector.broadcast %154 : vector<1x128xf32> to vector<16x128xf32>
    %176 = arith.addf %174, %175 : vector<16x128xf32>
    %177 = arith.truncf %176 : vector<16x128xf32> to vector<16x128xbf16>
    %cst_58 = arith.constant 0.000000e+00 : f32
    %178 = vector.broadcast %cst_58 : f32 to vector<16x128xf32>
    %c0_59 = arith.constant 0 : index
    %c0_60 = arith.constant 0 : index
    %c0_61 = arith.constant 0 : index
    %179 = vector.load %arg15[%c0_59, %c0_60, %c0_61] : memref<1x128x512xbf16, #tpu.memory_space<vmem>>, vector<1x128x512xbf16>
    %180 = vector.shape_cast %179 : vector<1x128x512xbf16> to vector<128x512xbf16>
    %cst_62 = arith.constant dense<0.000000e+00> : vector<16x512xf32>
    %181 = tpu.matmul %177, %180, %cst_62 {dimension_numbers = #tpu.dot_dimension_numbers<[1], [0], [0], [1], [0, 0, 1, 1], [], []>} : vector<16x128xbf16>, vector<128x512xbf16>, vector<16x512xf32> -> vector<16x512xf32>
    %c0_63 = arith.constant 0 : index
    %c0_64 = arith.constant 0 : index
    %c0_65 = arith.constant 0 : index
    %182 = vector.load %arg16[%c0_63, %c0_64, %c0_65] : memref<1x1x512xf32, #tpu.memory_space<vmem>>, vector<1x1x512xf32>
    %183 = vector.shape_cast %182 : vector<1x1x512xf32> to vector<1x512xf32>
    %184 = vector.broadcast %183 : vector<1x512xf32> to vector<16x512xf32>
    %185 = arith.addf %181, %184 : vector<16x512xf32>
    %cst_66 = arith.constant 5.000000e-01 : f32
    %186 = vector.broadcast %cst_66 : f32 to vector<16x512xf32>
    %187 = arith.mulf %186, %185 : vector<16x512xf32>
    %cst_67 = arith.constant 0.707106769 : f32
    %188 = vector.broadcast %cst_67 : f32 to vector<16x512xf32>
    %189 = arith.mulf %185, %188 : vector<16x512xf32>
    %190 = math.erf %189 : vector<16x512xf32>
    %cst_68 = arith.constant 1.000000e+00 : f32
    %191 = vector.broadcast %cst_68 : f32 to vector<16x512xf32>
    %192 = arith.addf %191, %190 : vector<16x512xf32>
    %193 = arith.mulf %187, %192 : vector<16x512xf32>
    %194 = arith.truncf %193 : vector<16x512xf32> to vector<16x512xbf16>
    %c0_69 = arith.constant 0 : index
    %c0_70 = arith.constant 0 : index
    %c0_71 = arith.constant 0 : index
    %195 = vector.load %arg17[%c0_69, %c0_70, %c0_71] : memref<1x512x128xbf16, #tpu.memory_space<vmem>>, vector<1x512x128xbf16>
    %196 = vector.shape_cast %195 : vector<1x512x128xbf16> to vector<512x128xbf16>
    %cst_72 = arith.constant dense<0.000000e+00> : vector<16x128xf32>
    %197 = tpu.matmul %194, %196, %cst_72 {dimension_numbers = #tpu.dot_dimension_numbers<[1], [0], [0], [1], [0, 0, 1, 1], [], []>} : vector<16x512xbf16>, vector<512x128xbf16>, vector<16x128xf32> -> vector<16x128xf32>
    %198 = arith.addf %178, %197 : vector<16x128xf32>
    %199 = arith.addf %150, %198 : vector<16x128xf32>
    %c0_73 = arith.constant 0 : index
    %c0_74 = arith.constant 0 : index
    %c0_75 = arith.constant 0 : index
    %200 = vector.load %arg18[%c0_73, %c0_74, %c0_75] : memref<1x1x128xf32, #tpu.memory_space<vmem>>, vector<1x1x128xf32>
    %201 = vector.shape_cast %200 : vector<1x1x128xf32> to vector<1x128xf32>
    %202 = vector.broadcast %201 : vector<1x128xf32> to vector<16x128xf32>
    %203 = arith.addf %199, %202 : vector<16x128xf32>
    %204 = vector.shape_cast %203 : vector<16x128xf32> to vector<2x8x128xf32>
    %c0_76 = arith.constant 0 : index
    %c0_77 = arith.constant 0 : index
    %c0_78 = arith.constant 0 : index
    %205 = vector.load %arg22[%c0_76, %c0_77, %c0_78] : memref<2x8x128xf32, #tpu.memory_space<vmem>>, vector<2x8x128xf32>
    tpu.vector_store %arg22[%c0_76, %c0_77, %c0_78], %204 {strides = array<i32>} : memref<2x8x128xf32, #tpu.memory_space<vmem>>, vector<2x8x128xf32>,
    %c1_i32 = arith.constant 1 : i32
    %206 = arith.cmpi eq, %arg1, %c1_i32 : i32
    %207 = arith.extui %206 : i1 to i32
    %c0_i32_79 = arith.constant 0 : i32
    %208 = arith.cmpi ne, %207, %c0_i32_79 : i32
    scf.if %208 {
      %209 = vector.extract_strided_slice %204 {offsets = [0, 0, 0], sizes = [2, 1, 128], strides = [1, 1, 1]} : vector<2x8x128xf32> to vector<2x1x128xf32>
      %210 = vector.shape_cast %209 : vector<2x1x128xf32> to vector<2x128xf32>
      %c0_80 = arith.constant 0 : index
      %c0_81 = arith.constant 0 : index
      %211 = vector.load %arg19[%c0_80, %c0_81] : memref<1x128xf32, #tpu.memory_space<vmem>>, vector<1x128xf32>
      %c0_82 = arith.constant 0 : index
      %c0_83 = arith.constant 0 : index
      %212 = vector.load %arg20[%c0_82, %c0_83] : memref<1x128xf32, #tpu.memory_space<vmem>>, vector<1x128xf32>
      %cst_84 = arith.constant dense<0.000000e+00> : vector<2xf32>
      %213 = vector.multi_reduction <add>, %210, %cst_84 [1] : vector<2x128xf32> to vector<2xf32>
      %214 = vector.shape_cast %213 : vector<2xf32> to vector<2x1xf32>
      %cst_85 = arith.constant 1.280000e+02 : f32
      %215 = vector.broadcast %cst_85 : f32 to vector<2x1xf32>
      %216 = arith.divf %214, %215 : vector<2x1xf32>
      %217 = vector.broadcast %216 : vector<2x1xf32> to vector<2x128xf32>
      %218 = arith.subf %210, %217 : vector<2x128xf32>
      %219 = arith.mulf %218, %218 : vector<2x128xf32>
      %cst_86 = arith.constant dense<0.000000e+00> : vector<2xf32>
      %220 = vector.multi_reduction <add>, %219, %cst_86 [1] : vector<2x128xf32> to vector<2xf32>
      %221 = vector.shape_cast %220 : vector<2xf32> to vector<2x1xf32>
      %cst_87 = arith.constant 1.280000e+02 : f32
      %222 = vector.broadcast %cst_87 : f32 to vector<2x1xf32>
      %223 = arith.divf %221, %222 : vector<2x1xf32>
      %224 = vector.broadcast %216 : vector<2x1xf32> to vector<2x128xf32>
      %225 = arith.subf %210, %224 : vector<2x128xf32>
      %cst_88 = arith.constant 9.99999996E-13 : f32
      %226 = vector.broadcast %cst_88 : f32 to vector<2x1xf32>
      %227 = arith.addf %223, %226 : vector<2x1xf32>
      %228 = math.rsqrt %227 : vector<2x1xf32>
      %229 = vector.broadcast %228 : vector<2x1xf32> to vector<2x128xf32>
      %230 = arith.mulf %225, %229 : vector<2x128xf32>
      %231 = vector.broadcast %211 : vector<1x128xf32> to vector<2x128xf32>
      %232 = arith.mulf %230, %231 : vector<2x128xf32>
      %233 = vector.broadcast %212 : vector<1x128xf32> to vector<2x128xf32>
      %234 = arith.addf %232, %233 : vector<2x128xf32>
      %c0_89 = arith.constant 0 : index
      %c0_90 = arith.constant 0 : index
      %c0_91 = arith.constant 0 : index
      %235 = vector.load %arg21[%c0_89, %c0_90, %c0_91] : memref<1x2x128xf32, #tpu.memory_space<vmem>>, vector<1x2x128xf32>
      %236 = vector.shape_cast %235 : vector<1x2x128xf32> to vector<2x128xf32>
      %237 = vector.shape_cast %234 : vector<2x128xf32> to vector<1x2x128xf32>
      tpu.vector_store %arg21[%c0_89, %c0_90, %c0_91], %237 {strides = array<i32>} : memref<1x2x128xf32, #tpu.memory_space<vmem>>, vector<1x2x128xf32>,
    } else {
    }
    return
  }
  func.func @transform_1(%arg0: i32, %arg1: i32) -> (i32, i32) {
    %c0_i32 = arith.constant 0 : i32
    %c0_i32_0 = arith.constant 0 : i32
    %c0_i32_1 = arith.constant 0 : i32
    return %c0_i32, %c0_i32_0 : i32, i32
  }
  func.func @transform_2(%arg0: i32, %arg1: i32) -> (i32, i32) {
    %c0_i32 = arith.constant 0 : i32
    %c0_i32_0 = arith.constant 0 : i32
    %c0_i32_1 = arith.constant 0 : i32
    return %c0_i32, %c0_i32_0 : i32, i32
  }
  func.func @transform_3(%arg0: i32, %arg1: i32) -> (i32, i32) {
    %c0_i32 = arith.constant 0 : i32
    %c0_i32_0 = arith.constant 0 : i32
    %c0_i32_1 = arith.constant 0 : i32
    return %c0_i32, %c0_i32_0 : i32, i32
  }
  func.func @transform_4(%arg0: i32, %arg1: i32) -> (i32, i32) {
    %c0_i32 = arith.constant 0 : i32
    %c0_i32_0 = arith.constant 0 : i32
    %c0_i32_1 = arith.constant 0 : i32
    return %c0_i32, %c0_i32_0 : i32, i32
  }
  func.func @transform_5(%arg0: i32, %arg1: i32) -> (i32, i32, i32) {
    %c0_i32 = arith.constant 0 : i32
    %c0_i32_0 = arith.constant 0 : i32
    %c0_i32_1 = arith.constant 0 : i32
    return %arg1, %c0_i32, %c0_i32_0 : i32, i32, i32
  }
  func.func @transform_6(%arg0: i32, %arg1: i32) -> (i32, i32, i32) {
    %c0_i32 = arith.constant 0 : i32
    %c0_i32_0 = arith.constant 0 : i32
    %c0_i32_1 = arith.constant 0 : i32
    return %arg1, %c0_i32, %c0_i32_0 : i32, i32, i32
  }
  func.func @transform_7(%arg0: i32, %arg1: i32) -> (i32, i32, i32) {
    %c0_i32 = arith.constant 0 : i32
    %c0_i32_0 = arith.constant 0 : i32
    %c0_i32_1 = arith.constant 0 : i32
    return %arg1, %c0_i32, %c0_i32_0 : i32, i32, i32
  }
  func.func @transform_8(%arg0: i32, %arg1: i32) -> (i32, i32, i32) {
    %c0_i32 = arith.constant 0 : i32
    %c0_i32_0 = arith.constant 0 : i32
    %c0_i32_1 = arith.constant 0 : i32
    return %arg1, %c0_i32, %c0_i32_0 : i32, i32, i32
  }
  func.func @transform_9(%arg0: i32, %arg1: i32) -> (i32, i32, i32) {
    %c0_i32 = arith.constant 0 : i32
    %c0_i32_0 = arith.constant 0 : i32
    %c0_i32_1 = arith.constant 0 : i32
    return %arg1, %c0_i32, %c0_i32_0 : i32, i32, i32
  }
  func.func @transform_10(%arg0: i32, %arg1: i32) -> (i32, i32, i32) {
    %c0_i32 = arith.constant 0 : i32
    %c0_i32_0 = arith.constant 0 : i32
    %c0_i32_1 = arith.constant 0 : i32
    return %arg1, %c0_i32, %c0_i32_0 : i32, i32, i32
  }
  func.func @transform_11(%arg0: i32, %arg1: i32) -> (i32, i32, i32) {
    %c0_i32 = arith.constant 0 : i32
    %c0_i32_0 = arith.constant 0 : i32
    %c0_i32_1 = arith.constant 0 : i32
    return %arg1, %c0_i32, %c0_i32_0 : i32, i32, i32
  }
  func.func @transform_12(%arg0: i32, %arg1: i32) -> (i32, i32, i32) {
    %c0_i32 = arith.constant 0 : i32
    %c0_i32_0 = arith.constant 0 : i32
    %c0_i32_1 = arith.constant 0 : i32
    return %arg1, %c0_i32, %c0_i32_0 : i32, i32, i32
  }
  func.func @transform_13(%arg0: i32, %arg1: i32) -> (i32, i32, i32) {
    %c0_i32 = arith.constant 0 : i32
    %c0_i32_0 = arith.constant 0 : i32
    %c0_i32_1 = arith.constant 0 : i32
    return %arg1, %c0_i32, %c0_i32_0 : i32, i32, i32
  }
  func.func @transform_14(%arg0: i32, %arg1: i32) -> (i32, i32, i32) {
    %c0_i32 = arith.constant 0 : i32
    %c0_i32_0 = arith.constant 0 : i32
    %c0_i32_1 = arith.constant 0 : i32
    return %arg1, %c0_i32, %c0_i32_0 : i32, i32, i32
  }
  func.func @transform_15(%arg0: i32, %arg1: i32) -> (i32, i32, i32) {
    %c0_i32 = arith.constant 0 : i32
    %c0_i32_0 = arith.constant 0 : i32
    %c0_i32_1 = arith.constant 0 : i32
    return %arg1, %c0_i32, %c0_i32_0 : i32, i32, i32
  }
  func.func @transform_16(%arg0: i32, %arg1: i32) -> (i32, i32, i32) {
    %c0_i32 = arith.constant 0 : i32
    %c0_i32_0 = arith.constant 0 : i32
    %c0_i32_1 = arith.constant 0 : i32
    return %arg1, %c0_i32, %c0_i32_0 : i32, i32, i32
  }
  func.func @transform_17(%arg0: i32, %arg1: i32) -> (i32, i32) {
    %c0_i32 = arith.constant 0 : i32
    %c0_i32_0 = arith.constant 0 : i32
    %c0_i32_1 = arith.constant 0 : i32
    return %c0_i32, %c0_i32_0 : i32, i32
  }
  func.func @transform_18(%arg0: i32, %arg1: i32) -> (i32, i32) {
    %c0_i32 = arith.constant 0 : i32
    %c0_i32_0 = arith.constant 0 : i32
    %c0_i32_1 = arith.constant 0 : i32
    return %c0_i32, %c0_i32_0 : i32, i32
  }
  func.func @transform_19(%arg0: i32, %arg1: i32) -> (i32, i32, i32) {
    %c0_i32 = arith.constant 0 : i32
    %c0_i32_0 = arith.constant 0 : i32
    %c0_i32_1 = arith.constant 0 : i32
    return %arg0, %c0_i32, %c0_i32_0 : i32, i32, i32
  }
}

</mosaic_0001>

<bundles_post_ra>
// kernel: phikon_forward.1
= control target key start
LH: loop header
LB: loop body
LE: loop exit
PB: predicated region body
PF: predicated region fallthrough
CT: control target
= control target key end

     0   :  { %s5789_s0 = inlined_call_operand.vmem [shape: bf16[16,768], index: 0, kind: input, shape index: {}]   ;;  %s5790_s1 = inlined_call_operand.vmem [shape: bf16[768,128], index: 1, kind: input, shape index: {}]   ;;  %s5791_s2 = inlined_call_operand.vmem [shape: f32[1,128], index: 2, kind: input, shape index: {}]   ;;  %s5792_s3 = inlined_call_operand.vmem [shape: f32[1,128], index: 3, kind: input, shape index: {}]   ;;  %s5793_s4 = inlined_call_operand.vmem [shape: f32[5,128], index: 4, kind: input, shape index: {}]   ;;  %s5794_s5 = inlined_call_operand.vmem [shape: f32[2,1,128], index: 5, kind: input, shape index: {}]   ;;  %s5795_s6 = inlined_call_operand.vmem [shape: f32[2,1,128], index: 6, kind: input, shape index: {}]   ;;  %s5796_s7 = inlined_call_operand.vmem [shape: bf16[2,128,384], index: 7, kind: input, shape index: {}]   ;;  %s5797_s8 = inlined_call_operand.vmem [shape: f32[2,1,384], index: 8, kind: input, shape index: {}]   ;;  %s5798_s9 = inlined_call_operand.vmem [shape: bf16[2,128,128], index: 9, kind: input, shape index: {}]   ;;  %s5799_s10 = inlined_call_operand.vmem [shape: f32[2,1,128], index: 10, kind: input, shape index: {}]   ;;  %s5800_s11 = inlined_call_operand.vmem [shape: f32[2,1,128], index: 11, kind: input, shape index: {}]   ;;  %s5801_s12 = inlined_call_operand.vmem [shape: f32[2,1,128], index: 12, kind: input, shape index: {}]   ;;  %s5802_s13 = inlined_call_operand.vmem [shape: bf16[2,128,512], index: 13, kind: input, shape index: {}]   ;;  %s5803_s14 = inlined_call_operand.vmem [shape: f32[2,1,512], index: 14, kind: input, shape index: {}]   ;;  %s5804_s15 = inlined_call_operand.vmem [shape: bf16[2,512,128], index: 15, kind: input, shape index: {}]   ;;  %s5805_s16 = inlined_call_operand.vmem [shape: f32[2,1,128], index: 16, kind: input, shape index: {}]   ;;  %s5806_s17 = inlined_call_operand.vmem [shape: f32[1,128], index: 17, kind: input, shape index: {}]   ;;  %s5807_s18 = inlined_call_operand.vmem [shape: f32[1,128], index: 18, kind: input, shape index: {}]   ;;  %s5808_s19 = inlined_call_operand.hbm [shape: f32[2,2,128], index: 19, kind: output, shape index: {}]  }
   0x1   :  { %5824 = sst [smem:[#allocation21_spill]] %s5789_s0 }
   0x2   :  { %5825 = sst [smem:[#allocation22_spill]] %s5790_s1 }
   0x3   :  { %5826 = sst [smem:[#allocation23_spill]] %s5791_s2 }
   0x4   :  { %5827 = sst [smem:[#allocation24_spill]] %s5792_s3 }
   0x5   :  { %5828 = sst [smem:[#allocation25_spill]] %s5793_s4 }
   0x6   :  { %5829 = sst [smem:[#allocation26_spill]] %s5794_s5 }
   0x7   :  { %5830 = sst [smem:[#allocation27_spill]] %s5795_s6 }
   0x8   :  { %5831 = sst [smem:[#allocation28_spill]] %s5796_s7 }
   0x9   :  { %5832 = sst [smem:[#allocation29_spill]] %s5797_s8 }
   0xa   :  { %5833 = sst [smem:[#allocation30_spill]] %s5798_s9 }
   0xb   :  { %5834 = sst [smem:[#allocation31_spill]] %s5806_s17 }
   0xc   :  { %5835 = sst [smem:[#allocation32_spill]] %s5807_s18 }
   0xd   :  { %5836 = sst [smem:[#allocation33_spill]] %s5808_s19 }
   0xe   :  { %24 = vsyncpa [#allocation6], 0 }
   0xf   :  { %26 = vsyncpa [#allocation6 + $0x1], 0  ;;  %s4682_s0 = smov 0   ;;  %s4684_s30 = smov 0  }
  0x10   :  { %s4686_s20 = smov 0   ;;  %s4688_s21 = smov 0  }
  0x11   :  { %s4690_s1 = smov 0   ;;  %s4692_s22 = smov 0  }
  0x12   :  { %s4694_s2 = smov 0   ;;  %s4696_s23 = smov 0  }
  0x13 LB: > { %5837 = sst [smem:[#allocation10_spill]] %s4547_s0  ;;  %s3544_s24 = sadd.s32 4294967295, %s4575_s23   ;;  %s4575_s23 = sphi %s4696_s23, %s32_s23   ;;  %s4571_s2 = sphi %s4694_s2, %s5898_s2   ;;  %s4567_s22 = sphi %s4692_s22, %s5897_s22   ;;  %s4563_s1 = sphi %s4690_s1, %s5896_s1   ;;  %s4559_s21 = sphi %s4688_s21, %s5895_s21   ;;  %s4555_s20 = sphi %s4686_s20, %s5894_s20   ;;  %s4551_s30 = sphi %s4684_s30, %s5893_s30   ;;  %s4547_s0 = sphi %s4682_s0, %s5892_s0  }
  0x14   : > { %5838 = sst [smem:[#allocation11_spill]] %s4551_s30  ;;  %s3545_s25 = sadd.s32 4294967294, %s4575_s23  }
  0x15   : > { %5839 = sst [smem:[#allocation12_spill]] %s4555_s20  ;;  %s41_s3 = sadd.s32 1, %s4567_s22 }
  0x16   : > { %5840 = sst [smem:[#allocation13_spill]] %s4567_s22  ;;  %p42_p0 = scmp.ge.s32.totalorder %s41_s3, 2 }
  0x17   : > { %5841 = sst [smem:[#allocation14_spill]] %s4571_s2  ;;  %s44_s26 = sadd.s32 1, %s4571_s2 }
  0x18   : > { %5842 = sst [smem:[#allocation15_spill]] %s4575_s23  ;;  %p499_p1 = scmp.ne.s32.totalorder %s4555_s20, %s4551_s30 }
  0x19   : > { %p500_p2 = scmp.eq.s32.totalorder %s3544_s24, 3  ;;  %s5900_s3 = smov (%p42_p0, %s41_s3), 0 }
  0x1a   : > { %5843 = sst [smem:[#allocation16_spill]] %s5900_s3  ;;  %s5902_s26 = smov (!%p42_p0, %s44_s26), %s4571_s2 }
  0x1b   : > { %p4731_p3 = por %p500_p2, %p499_p1  ;;  %p505_p4 = scmp.ne.s32.totalorder %s4551_s30, %s4547_s0 }
  0x1c   : > { %p46_p5 = scmp.ge.s32.totalorder %s5902_s26, 2  ;;  %p506_p6 = scmp.eq.s32.totalorder %s3545_s25, 3 }
  0x1d   : > { %s5844_s27 = scalar_select %p4731_p3, 1, 0 }
  0x1e   : > { %p3548_p7 = scmp.ge.s32.totalorder %s4575_s23, 1  ;;  %p624_p8 = scmp.lt.s32.totalorder %s4575_s23, 5 }
  0x1f   : > { %5845 = sst [smem:[#allocation17_spill]] %s5844_s27  ;;  %s5904_s26 = smov (%p46_p5, %s5902_s26), 0 }
  0x20   : > { %5846 = sst [smem:[#allocation18_spill]] %s5904_s26  ;;  %p4741_p9 = por %p506_p6, %p505_p4 }
  0x21   : > { %p625_p10 = pnand %p3548_p7, %p624_p8  ;;  %s486_s29 = ssub.s32 %s4571_s2, %s5904_s26 }
  0x22   : > { %s5847_s28 = scalar_select %p4741_p9, 1, 0 }
  0x23   : > { %s489_s24 = sadd.s32 1, %s4555_s20  ;;  %p487_p11 = scmp.eq.s32.totalorder %s486_s29, 0 }
  0x24   : > { %5848 = sst [smem:[#allocation19_spill]] %s5847_s28  ;;  %628 = sbr.rel (%p625_p10) target bundleno = 2650 (0xa5a), region = 92 }
  0x25   : > { %s4749_s3 = scalar_select %p487_p11, %s4555_s20, %s489_s24  }
  0x26   : > { %s5816_s25 = sand.u32 (!%p625_p10), 1, %s4551_s30   ;;  %p719_p12 = scmp.lt.s32.totalorder (!%p625_p10), %s4559_s21, 1 }
  0x27   : > { %5849 = sst [smem:[#allocation20_spill]] %s4749_s3  ;;  %s4755_s22 = sshll.u32 (!%p625_p10), %s5816_s25, 1 }
  0x28   : > { %s5852_s9 = sld [smem:[#allocation30_spill]] (!%p625_p10)  ;;  %p3558_p13 = scmp.ne.s32.totalorder (!%p625_p10), %s4559_s21, 0 }
  0x29   : > { %s4758_s0 = scalar_select %p719_p12, %s4559_s21, 1 }
  0x2a   : > { %s5853_s7 = sld [smem:[#allocation28_spill]] }
  0x2b   : > { %s4315_s2 = smul.u32 192, %s4758_s0  ;;  %s4167_s3 = sshll.u32 %s4758_s0, 6 }
  0x2c   : > { %s4316_s20 = smul.u32 3, %s4758_s0  ;;  %s5854_s8 = sld [smem:[#allocation29_spill]] }
  0x2d   : > { %s4168_s30 = sshll.u32 %s4758_s0, 8  ;;  %s3555_s17 = sshll.u32 %s4758_s0, 2 }
  0x2e   : > { %s4774_s19 = scalar_lea.vmem %s5852_s9, %s4167_s3  ;;  %s4813_s4 = scalar_lea.vmem %s5804_s15, %s4168_s30 }
  0x2f   : > { %769 = sbr.rel (%p3558_p13) target bundleno = 265 (0x109), region = 96  ;;  %s5855_s29 = sld [smem:[#allocation21_spill]] (!%p3558_p13) }
  0x30   : > { %s4779_s18 = scalar_lea.vmem %s5853_s7, %s4315_s2  ;;  %s4802_s7 = scalar_lea.vmem %s5802_s13, %s4168_s30 }
  0x31   : > { %s3559_s2 = sshll.u32 (!%p3558_p13), %s4563_s1, 3 }
  0x32   : > { %s4788_s6 = scalar_lea.vmem %s5854_s8, %s4316_s20  ;;  %s4808_s20 = scalar_lea.vmem %s5803_s14, %s3555_s17 }
  0x33   : > { %s771_s27 = sshra.s32 (!%p3558_p13), %s3559_s2, 3 }
  0x34   : > { %s4170_s23 = smul.u32 24, %s771_s27 }
  0x36   : > { %s775_s8 = scalar_lea.vmem %s5855_s29, %s4170_s23 }
  0x37   : > { %v4825_v0 = vld [vmem:[%s775_s8] sm:$0xff]  ;;  %v4827_v1 = vld [vmem:[%s775_s8 + $0x8] sm:$0xff]  ;;  %v4829_v2 = vld [vmem:[%s775_s8 + $0x10] sm:$0xff] }
  0x38   : > { %797 = vsyncadd [#allocation4], 384 }
  0x39   : > { %4539 = dma.done.wait [#allocation4], 384 }
  0x3a   : > { %4540 = vsyncadd [#allocation4], 4294966912  ;;  %v4577_v3 = vmov 0.0   ;;  %s5856_s24 = sld [smem:[#allocation24_spill]]  ;;  %v908_v34 = vunpack.c.l.b16 %v4825_v0  ;;  %v909_v37 = vunpack.c.h.b16 %v4825_v0  ;;  %v910_v40 = vunpack.c.l.b16 %v4827_v1 }
  0x3b   : > { %1305 = vst [vmem:[#allocation2 + $0x5] sm:$0x7] %v4577_v3  ;;  %s5857_s2 = sld [smem:[#allocation25_spill]]  ;;  %v911_v43 = vunpack.c.h.b16 %v4827_v1  ;;  %v912_v61 = vunpack.c.l.b16 %v4829_v2  ;;  %v913_v63 = vunpack.c.h.b16 %v4829_v2 }
  0x3c   : > { %1306 = vst [vmem:[#allocation2 + $0xd] sm:$0x7] %v4577_v3  ;;  %s5859_s17 = sld [smem:[#allocation22_spill]]  ;;  %v914_v44 = vpack.c.b16 %v908_v34, %v908_v34  ;;  %v915_v46 = vpack.c.b16 %v909_v37, %v909_v37  ;;  %v916_v48 = vpack.c.b16 %v910_v40, %v910_v40 }
  0x3d   : > { %v917_v50 = vpack.c.b16 %v911_v43, %v911_v43  ;;  %v918_v1 = vpack.c.b16 %v912_v61, %v912_v61  ;;  %v919_v3 = vpack.c.b16 %v913_v63, %v913_v63  ;;  %s5860_s9 = sld [smem:[#allocation23_spill]] }
  0x40   : > { %v1292_v4 = vld [vmem:[%s5856_s24] sm:$0x1] }
  0x41   : > { %s5858_s27 = smov %s5857_s2  ;;  %v1293_v5 = vld [vmem:[%s5857_s2] sm:$0x1] }
  0x42   : > { %v4178_v6 = vld [vmem:[%s5859_s17 + $0x38] sm:$0xff]  ;;  %v1294_v7 = vadd.f32 %v1293_v5, %v1292_v4  ;;  %v4177_v9 = vld [vmem:[%s5859_s17 + $0x30] sm:$0xff]  ;;  %v4176_v15 = vld [vmem:[%s5859_s17 + $0x28] sm:$0xff] }
  0x43   : > { %v4186_v8 = vld [vmem:[%s5859_s17 + $0x78] sm:$0xff]  ;;  %1214 = vmatpush.bf16.msra.mxu0 %v4178_v6  ;;  %v4185_v11 = vld [vmem:[%s5859_s17 + $0x70] sm:$0xff]  ;;  %v4184_v16 = vld [vmem:[%s5859_s17 + $0x68] sm:$0xff] }
  0x44   : > { %v4194_v10 = vld [vmem:[%s5859_s17 + $0xb8] sm:$0xff]  ;;  %1295 = vst [vmem:[#allocation2] sm:$0x1] %v1294_v7  ;;  %1227 = vmatpush.bf16.msra.mxu1 %v4186_v8  ;;  %v4193_v13 = vld [vmem:[%s5859_s17 + $0xb0] sm:$0xff]  ;;  %v4192_v17 = vld [vmem:[%s5859_s17 + $0xa8] sm:$0xff] }
  0x45   : > { %v4202_v12 = vld [vmem:[%s5859_s17 + $0xf8] sm:$0xff]  ;;  %1296 = vst [vmem:[#allocation2 + $0x8] sm:$0x1] %v1294_v7  ;;  %1240 = vmatpush.bf16.msra.mxu2 %v4194_v10  ;;  %v4201_v14 = vld [vmem:[%s5859_s17 + $0xf0] sm:$0xff]  ;;  %v4200_v18 = vld [vmem:[%s5859_s17 + $0xe8] sm:$0xff] }
  0x46   : > { %1253 = vmatpush.bf16.msra.mxu3 %v4202_v12  ;;  %v4175_v19 = vld [vmem:[%s5859_s17 + $0x20] sm:$0xff]  ;;  %v4174_v23 = vld [vmem:[%s5859_s17 + $0x18] sm:$0xff]  ;;  %v4173_v27 = vld [vmem:[%s5859_s17 + $0x10] sm:$0xff] }
  0x47   : > { %1215 = vmatpush.bf16.msra.mxu0 %v4177_v9  ;;  %v4183_v20 = vld [vmem:[%s5859_s17 + $0x60] sm:$0xff]  ;;  %v4182_v24 = vld [vmem:[%s5859_s17 + $0x58] sm:$0xff]  ;;  %v4181_v28 = vld [vmem:[%s5859_s17 + $0x50] sm:$0xff] }
  0x48   : > { %1228 = vmatpush.bf16.msra.mxu1 %v4185_v11  ;;  %v4191_v21 = vld [vmem:[%s5859_s17 + $0xa0] sm:$0xff]  ;;  %v4190_v25 = vld [vmem:[%s5859_s17 + $0x98] sm:$0xff]  ;;  %v4189_v29 = vld [vmem:[%s5859_s17 + $0x90] sm:$0xff] }
  0x49   : > { %1241 = vmatpush.bf16.msra.mxu2 %v4193_v13  ;;  %v4199_v22 = vld [vmem:[%s5859_s17 + $0xe0] sm:$0xff]  ;;  %v4198_v26 = vld [vmem:[%s5859_s17 + $0xd8] sm:$0xff]  ;;  %v4197_v30 = vld [vmem:[%s5859_s17 + $0xd0] sm:$0xff] }
  0x4a   : > { %1254 = vmatpush.bf16.msra.mxu3 %v4201_v14  ;;  %v4172_v31 = vld [vmem:[%s5859_s17 + $0x8] sm:$0xff]  ;;  %v4171_v36 = vld [vmem:[%s5859_s17] sm:$0xff]  ;;  %v4210_v39 = vld [vmem:[%s5859_s17 + $0x138] sm:$0xff] }
  0x4b   : > { %1216 = vmatpush.bf16.msra.mxu0 %v4176_v15  ;;  %v4180_v32 = vld [vmem:[%s5859_s17 + $0x48] sm:$0xff]  ;;  %v4179_v38 = vld [vmem:[%s5859_s17 + $0x40] sm:$0xff]  ;;  %v4218_v41 = vld [vmem:[%s5859_s17 + $0x178] sm:$0xff] }
  0x4c   : > { %1229 = vmatpush.bf16.msra.mxu1 %v4184_v16  ;;  %v4188_v33 = vld [vmem:[%s5859_s17 + $0x88] sm:$0xff]  ;;  %v4187_v42 = vld [vmem:[%s5859_s17 + $0x80] sm:$0xff]  ;;  %v4209_v47 = vld [vmem:[%s5859_s17 + $0x130] sm:$0xff] }
  0x4d   : > { %1242 = vmatpush.bf16.msra.mxu2 %v4192_v17  ;;  %v4196_v35 = vld [vmem:[%s5859_s17 + $0xc8] sm:$0xff]  ;;  %v4195_v45 = vld [vmem:[%s5859_s17 + $0xc0] sm:$0xff]  ;;  %v4217_v49 = vld [vmem:[%s5859_s17 + $0x170] sm:$0xff] }
  0x4e   : > { %1255 = vmatpush.bf16.msra.mxu3 %v4200_v18  ;;  %v4208_v51 = vld [vmem:[%s5859_s17 + $0x128] sm:$0xff]  ;;  %v4207_v53 = vld [vmem:[%s5859_s17 + $0x120] sm:$0xff]  ;;  %v4206_v55 = vld [vmem:[%s5859_s17 + $0x118] sm:$0xff] }
  0x4f   : > { %1217 = vmatpush.bf16.msra.mxu0 %v4175_v19  ;;  %v4216_v52 = vld [vmem:[%s5859_s17 + $0x168] sm:$0xff]  ;;  %v4215_v54 = vld [vmem:[%s5859_s17 + $0x160] sm:$0xff]  ;;  %v4214_v56 = vld [vmem:[%s5859_s17 + $0x158] sm:$0xff] }
  0x50   : > { %1230 = vmatpush.bf16.msra.mxu1 %v4183_v20  ;;  %v4205_v57 = vld [vmem:[%s5859_s17 + $0x110] sm:$0xff]  ;;  %v4204_v59 = vld [vmem:[%s5859_s17 + $0x108] sm:$0xff]  ;;  %v4203_v62 = vld [vmem:[%s5859_s17 + $0x100] sm:$0xff] }
  0x51   : > { %1243 = vmatpush.bf16.msra.mxu2 %v4191_v21  ;;  %v4213_v58 = vld [vmem:[%s5859_s17 + $0x150] sm:$0xff]  ;;  %v4212_v60 = vld [vmem:[%s5859_s17 + $0x148] sm:$0xff]  ;;  %v4211_v0 = vld [vmem:[%s5859_s17 + $0x140] sm:$0xff] }
  0x52   : > { %1256 = vmatpush.bf16.msra.mxu3 %v4199_v22  ;;  %v4393_v2 = vld [vmem:[%s5860_s9] ss:$0 sm:$0xff]  ;;  %v1300_v19 = vld [vmem:[%s5858_s27 + $0x1] sm:$0xf] }
  0x53   : > { %1218 = vmatpush.bf16.msra.mxu0 %v4174_v23 }
  0x54   : > { %1231 = vmatpush.bf16.msra.mxu1 %v4182_v24 }
  0x55   : > { %1244 = vmatpush.bf16.msra.mxu2 %v4190_v25 }
  0x56   : > { %1257 = vmatpush.bf16.msra.mxu3 %v4198_v26 }
  0x57   : > { %1219 = vmatpush.bf16.msra.mxu0 %v4173_v27 }
  0x58   : > { %1232 = vmatpush.bf16.msra.mxu1 %v4181_v28 }
  0x59   : > { %1245 = vmatpush.bf16.msra.mxu2 %v4189_v29 }
  0x5a   : > { %1258 = vmatpush.bf16.msra.mxu3 %v4197_v30 }
  0x5b   : > { %1220 = vmatpush.bf16.msra.mxu0 %v4172_v31 }
  0x5c   : > { %1233 = vmatpush.bf16.msra.mxu1 %v4180_v32 }
  0x5d   : > { %1246 = vmatpush.bf16.msra.mxu2 %v4188_v33 }
  0x5e   : > { %1259 = vmatpush.bf16.msra.mxu3 %v4196_v35 }
  0x5f   : > { %1221 = vmatpush.bf16.msra.mxu0 %v4171_v36 }
  0x60   : > { %1234 = vmatpush.bf16.msra.mxu1 %v4179_v38 }
  0x61   : > { %1247 = vmatpush.bf16.msra.mxu2 %v4187_v42 }
  0x62   : > { %1222 = vmatmul.bf16.vlgmr.msra.gmra.mxu0 %v914_v44  ;;  %1260 = vmatpush.bf16.msra.mxu3 %v4195_v45 }
  0x63   : > { %1266 = vmatpush.bf16.msrb.mxu0 %v4210_v39  ;;  %1235 = vmatmul.bf16.vlgmr.msra.gmra.mxu1 %v915_v46 }
  0x64   : > { %1279 = vmatpush.bf16.msrb.mxu1 %v4218_v41  ;;  %1248 = vmatmul.bf16.vlgmr.msra.gmra.mxu2 %v916_v48 }
  0x65   : > { %1261 = vmatmul.bf16.vlgmr.msra.gmra.mxu3 %v917_v50 }
  0x67   : > { %1267 = vmatpush.bf16.msrb.mxu0 %v4209_v47 }
  0x68   : > { %1280 = vmatpush.bf16.msrb.mxu1 %v4217_v49 }
  0x6b   : > { %1268 = vmatpush.bf16.msrb.mxu0 %v4208_v51 }
  0x6c   : > { %1281 = vmatpush.bf16.msrb.mxu1 %v4216_v52 }
  0x6f   : > { %1269 = vmatpush.bf16.msrb.mxu0 %v4207_v53 }
  0x70   : > { %1282 = vmatpush.bf16.msrb.mxu1 %v4215_v54 }
  0x73   : > { %1270 = vmatpush.bf16.msrb.mxu0 %v4206_v55 }
  0x74   : > { %1283 = vmatpush.bf16.msrb.mxu1 %v4214_v56 }
  0x77   : > { %1271 = vmatpush.bf16.msrb.mxu0 %v4205_v57 }
  0x78   : > { %1284 = vmatpush.bf16.msrb.mxu1 %v4213_v58 }
  0x7b   : > { %1272 = vmatpush.bf16.msrb.mxu0 %v4204_v59 }
  0x7c   : > { %1285 = vmatpush.bf16.msrb.mxu1 %v4212_v60 }
  0x7f   : > { %1273 = vmatpush.bf16.msrb.mxu0 %v4203_v62 }
  0x80   : > { %1286 = vmatpush.bf16.msrb.mxu1 %v4211_v0 }
  0x82   : > { %1274 = vmatmul.bf16.vlgmr.msrb.gmra.mxu0 %v918_v1 }
  0x83   : > { %1287 = vmatmul.bf16.vlgmr.msrb.gmra.mxu1 %v919_v3 }
  0xdf   : > { %v1223_v4 = vpop.f32.mrf.mxu0 }
  0xe0   : > { %v1236_v5 = vpop.f32.mrf.mxu1  ;;  %v1224_v10 = vadd.f32 %v4393_v2, %v1223_v4 }
  0xe2   : > { %v1237_v13 = vadd.f32 %v1236_v5, %v1224_v10 }
  0xe7   : > { %v1225_v6 = vpop.f32.mrf.mxu0  ;;  %v1249_v7 = vpop.f32.mrf.mxu2 }
  0xe8   : > { %v1238_v8 = vpop.f32.mrf.mxu1  ;;  %v1262_v9 = vpop.f32.mrf.mxu3  ;;  %v1250_v14 = vadd.f32 %v1249_v7, %v1237_v13 }
  0xea   : > { %v1263_v15 = vadd.f32 %v1262_v9, %v1250_v14 }
  0xef   : > { %v1251_v11 = vpop.f32.mrf.mxu2 }
  0xf0   : > { %v1264_v12 = vpop.f32.mrf.mxu3 }
  0xff   : > { %v1275_v16 = vpop.f32.mrf.mxu0 }
 0x100   : > { %v1276_v17 = vadd.f32 %v1275_v16, %v1263_v15  ;;  %v1288_v18 = vpop.f32.mrf.mxu1 }
 0x102   : > { %v1289_v20 = vadd.f32 %v1288_v18, %v1276_v17 }
 0x104   : > { %v1298_v21 = vrot.slane %v1289_v20, 4  ;;  %v1301_v22 = vadd.f32 %v1300_v19, %v1289_v20 }
 0x106   : > { %v1302_v23 = vadd.f32 %v1300_v19, %v1298_v21  ;;  %1303 = vst [vmem:[#allocation2 + $0x1] sm:$0xf] %v1301_v22 }
 0x107   : > { %v1277_v24 = vpop.f32.mrf.mxu0 }
 0x108   : > { %1304 = vst [vmem:[#allocation2 + $0x9] sm:$0xf] %v1302_v23  ;;  %v1290_v25 = vpop.f32.mrf.mxu1 }
 0x109 PF: > { %v4578_v28 = vmov 128.0   ;;  %v3839_v43 = vld [vmem:[%s4779_s18 + $0xa8] sm:$0xf]  ;;  %v4241_v44 = vld [vmem:[%s4779_s18 + $0xb0] sm:$0xf0]  ;;  %s5861_s30 = sld [smem:[#allocation26_spill]]  ;;  %s5865_s28 = scalar_lea.vmem %s5799_s10, %s4758_s0 }
 0x10a   : > { %4415 = vrcp.f32 %v4578_v28  ;;  %v4240_v45 = vld [vmem:[%s4779_s18 + $0xac] sm:$0xf]  ;;  %v3840_v46 = vor.u32 %v4241_v44, %v3839_v43  ;;  %v3841_v47 = vld [vmem:[%s4779_s18 + $0xb4] sm:$0xf0]  ;;  %v3847_v48 = vld [vmem:[%s4779_s18 + $0xb0] sm:$0xf]  ;;  %s5880_s24 = scalar_lea.vmem %s5805_s16, %s4758_s0 }
 0x10b   : > { %v4242_v49 = vld [vmem:[%s4779_s18 + $0xb8] sm:$0xf0]  ;;  %v3844_v50 = vor.u32 %v4240_v45, %v3841_v47  ;;  %v3827_v52 = vld [vmem:[%s4779_s18 + $0x90] sm:$0xf]  ;;  %v4237_v54 = vld [vmem:[%s4779_s18 + $0x94] sm:$0xf] }
 0x10c   : > { %v3848_v51 = vor.u32 %v4242_v49, %v3847_v48  ;;  %1537 = vmatpush.bf16.msra.mxu0 %v3840_v46  ;;  %v4238_v53 = vld [vmem:[%s4779_s18 + $0x98] sm:$0xf0]  ;;  %v3829_v56 = vld [vmem:[%s4779_s18 + $0x9c] sm:$0xf0]  ;;  %v3835_v57 = vld [vmem:[%s4779_s18 + $0x98] sm:$0xf] }
 0x10d   : > { %v1307_v26 = vld [vmem:[#allocation2] sm:$0xff]  ;;  %1551 = vmatpush.bf16.msra.mxu1 %v3844_v50  ;;  %v3828_v55 = vor.u32 %v4238_v53, %v3827_v52  ;;  %v3832_v59 = vor.u32 %v4237_v54, %v3829_v56  ;;  %v3815_v61 = vld [vmem:[%s4779_s18 + $0x78] sm:$0xf]  ;;  %v4234_v63 = vld [vmem:[%s4779_s18 + $0x7c] sm:$0xf]  ;;  %s5863_s3 = sld [smem:[#allocation27_spill]] }
 0x10e   : > { %1311 = vadd.xlane.f32.xlu0 %v1307_v26  ;;  %1565 = vmatpush.bf16.msra.mxu2 %v3848_v51  ;;  %v4239_v58 = vld [vmem:[%s4779_s18 + $0xa0] sm:$0xf0]  ;;  %v3817_v1 = vld [vmem:[%s4779_s18 + $0x84] sm:$0xf0]  ;;  %v3823_v3 = vld [vmem:[%s4779_s18 + $0x80] sm:$0xf] }
 0x10f   : > { %v1308_v27 = vld [vmem:[#allocation2 + $0x8] sm:$0xff]  ;;  %v3836_v60 = vor.u32 %v4239_v58, %v3835_v57  ;;  %v4235_v62 = vld [vmem:[%s4779_s18 + $0x80] sm:$0xf0]  ;;  %v3820_v5 = vor.u32 %v4234_v63, %v3817_v1  ;;  %v3803_v7 = vld [vmem:[%s4779_s18 + $0x60] sm:$0xf]  ;;  %s5862_s25 = scalar_lea.vmem %s5861_s30, %s4758_s0  ;;  %vm1588_vm7 = vcmask 261120  }
 0x110   : > { %v4416_v29 = vpop.eup %4415  ;;  %1538 = vmatpush.bf16.msra.mxu0 %v3828_v55  ;;  %v3816_v0 = vor.u32 %v4235_v62, %v3815_v61  ;;  %v4236_v4 = vld [vmem:[%s4779_s18 + $0x88] sm:$0xf0]  ;;  %v4231_v9 = vld [vmem:[%s4779_s18 + $0x64] sm:$0xf]  ;;  %v3805_v10 = vld [vmem:[%s4779_s18 + $0x6c] sm:$0xf0] }
 0x111   : > { %v1316_v30 = vmul.f32 128.0, %v4416_v29  ;;  %vm1320_vm0 = vweird.f32 %v4416_v29  ;;  %1552 = vmatpush.bf16.msra.mxu1 %v3832_v59  ;;  %v3824_v6 = vor.u32 %v4236_v4, %v3823_v3  ;;  %v4232_v8 = vld [vmem:[%s4779_s18 + $0x68] sm:$0xf0]  ;;  %v3811_v11 = vld [vmem:[%s4779_s18 + $0x68] sm:$0xf]  ;;  %v3808_v13 = vor.u32 %v4231_v9, %v3805_v10  ;;  %s4580_s23 = smov 64  }
 0x112   : > { %1566 = vmatpush.bf16.msra.mxu2 %v3836_v60  ;;  %v3804_v2 = vor.u32 %v4232_v8, %v3803_v7  ;;  %v4233_v12 = vld [vmem:[%s4779_s18 + $0x70] sm:$0xf0]  ;;  %v3791_v15 = vld [vmem:[%s4779_s18 + $0x48] sm:$0xf]  ;;  %v4228_v17 = vld [vmem:[%s4779_s18 + $0x4c] sm:$0xf] }
 0x113   : > { %v1317_v31 = vsub.f32 1.0, %v1316_v30  ;;  %v3812_v14 = vor.u32 %v4233_v12, %v3811_v11  ;;  %v4229_v16 = vld [vmem:[%s4779_s18 + $0x50] sm:$0xf0]  ;;  %v3793_v19 = vld [vmem:[%s4779_s18 + $0x54] sm:$0xf0]  ;;  %s5864_s2 = scalar_lea.vmem %s5863_s3, %s4758_s0  ;;  %vm1685_vm8 = vcmask 1043456  }
 0x114   : > { %1539 = vmatpush.bf16.msra.mxu0 %v3816_v0  ;;  %v3792_v18 = vor.u32 %v4229_v16, %v3791_v15  ;;  %v3799_v20 = vld [vmem:[%s4779_s18 + $0x50] sm:$0xf]  ;;  %v4230_v21 = vld [vmem:[%s4779_s18 + $0x58] sm:$0xf0]  ;;  %v3796_v22 = vor.u32 %v4228_v17, %v3793_v19  ;;  %v3781_v28 = vld [vmem:[%s4779_s18 + $0x3c] sm:$0xf0] }
 0x115   : > { %v1318_v32 = vmul.f32 %v4416_v29, %v1317_v31  ;;  %1553 = vmatpush.bf16.msra.mxu1 %v3820_v5  ;;  %v3800_v23 = vor.u32 %v4230_v21, %v3799_v20  ;;  %v3779_v24 = vld [vmem:[%s4779_s18 + $0x30] sm:$0xf]  ;;  %v4226_v25 = vld [vmem:[%s4779_s18 + $0x38] sm:$0xf0]  ;;  %v4227_v30 = vld [vmem:[%s4779_s18 + $0x40] sm:$0xf0] }
 0x116   : > { %1313 = vadd.xlane.f32.xlu0 %v1308_v27  ;;  %1567 = vmatpush.bf16.msra.mxu2 %v3824_v6  ;;  %v3755_v45 = vld [vmem:[%s4779_s18] sm:$0xf]  ;;  %v4220_v46 = vld [vmem:[%s4779_s18 + $0x8] sm:$0xf0]  ;;  %v4219_v47 = vld [vmem:[%s4779_s18 + $0x4] sm:$0xf] }
 0x117   : > { %v1319_v33 = vadd.f32 %v4416_v29, %v1318_v32  ;;  %v3756_v49 = vor.u32 %v4220_v46, %v3755_v45  ;;  %v3757_v50 = vld [vmem:[%s4779_s18 + $0xc] sm:$0xf0]  ;;  %v3763_v51 = vld [vmem:[%s4779_s18 + $0x8] sm:$0xf]  ;;  %v4221_v52 = vld [vmem:[%s4779_s18 + $0x10] sm:$0xf0] }
 0x118   : > { %1540 = vmatpush.bf16.msra.mxu0 %v3804_v2  ;;  %v3760_v54 = vor.u32 %v4219_v47, %v3757_v50  ;;  %v3764_v55 = vor.u32 %v4221_v52, %v3763_v51  ;;  %v4409_v2 = vld [vmem:[%s5862_s25] ss:$0 sm:$0xff]  ;;  %s4581_s26 = smov 32   ;;  %vm1631_vm10 = vcmask 64512   ;;  %s5867_s25 = scalar_lea.vmem %s5801_s12, %s4758_s0 }
 0x119   : > { %v4993_v34 = vsel %vm1320_vm0, %v4416_v29, %v1319_v33  ;;  %1554 = vmatpush.bf16.msra.mxu1 %v3808_v13  ;;  %v3787_v29 = vld [vmem:[%s4779_s18 + $0x38] sm:$0xf]  ;;  %p4161_p0 = scmp.ne.s32.totalorder %s4559_s21, 1 }
 0x11a   : > { %1568 = vmatpush.bf16.msra.mxu2 %v3812_v14  ;;  %v3788_v32 = vor.u32 %v4227_v30, %v3787_v29  ;;  %v3767_v33 = vld [vmem:[%s4779_s18 + $0x18] sm:$0xf]  ;;  %v4410_v14 = vld [vmem:[%s5864_s2] ss:$0 sm:$0xff]  ;;  %s5881_s5 = sld [smem:[#allocation31_spill]] (!%p4161_p0) }
 0x11c   : > { %1541 = vmatpush.bf16.msra.mxu0 %v3792_v18  ;;  %v1401_v18 = vld [vmem:[%s4788_s6] sm:$0x7]  ;;  %s4579_s6 = smov 96  }
 0x11d   : > { %1555 = vmatpush.bf16.msra.mxu1 %v3796_v22  ;;  %v1404_v19 = vperm.slane %v1401_v18, 1  ;;  %v1403_v20 = vperm.slane %v1401_v18, 0 }
 0x11e   : > { %1569 = vmatpush.bf16.msra.mxu2 %v3800_v23 }
 0x122   : > { %1570 = vmatpush.bf16.msra.mxu2 %v3788_v32 }
 0x181   : > { %v1312_v35 = vpop.xlane.xlu0 %1311 }
 0x182   : > { %v1322_v36 = vmul.f32 %v4993_v34, %v1312_v35  ;;  %v4223_v35 = vld [vmem:[%s4779_s18 + $0x20] sm:$0xf0] }
 0x184   : > { %v4996_v37 = vsub.f32 %v1307_v26, %v1322_v36  ;;  %v4225_v26 = vld [vmem:[%s4779_s18 + $0x34] sm:$0xf]  ;;  %v4222_v36 = vld [vmem:[%s4779_s18 + $0x1c] sm:$0xf] }
 0x185   : > { %v3784_v31 = vor.u32 %v4225_v26, %v3781_v28 }
 0x186   : > { %v1326_v38 = vmul.f32 %v4996_v37, %v4996_v37 }
 0x187   : > { %1556 = vmatpush.bf16.msra.mxu1 %v3784_v31 }
 0x188   : > { %1328 = vadd.xlane.f32.xlu1 %v1326_v38  ;;  %v3768_v38 = vor.u32 %v4223_v35, %v3767_v33 }
 0x189   : > { %v1314_v39 = vpop.xlane.xlu0 %1313 }
 0x18a   : > { %v1323_v40 = vmul.f32 %v4993_v34, %v1314_v39  ;;  %v3769_v39 = vld [vmem:[%s4779_s18 + $0x24] sm:$0xf0] }
 0x18b   : > { %v3772_v43 = vor.u32 %v4222_v36, %v3769_v39 }
 0x18c   : > { %v5001_v41 = vsub.f32 %v1308_v27, %v1323_v40  ;;  %v3780_v27 = vor.u32 %v4226_v25, %v3779_v24  ;;  %v3775_v40 = vld [vmem:[%s4779_s18 + $0x20] sm:$0xf]  ;;  %v1405_v25 = vperm.slane %v1401_v18, 2 }
 0x18d   : > { %1557 = vmatpush.bf16.msra.mxu1 %v3772_v43 }
 0x18e   : > { %v1327_v42 = vmul.f32 %v5001_v41, %v5001_v41  ;;  %1542 = vmatpush.bf16.msra.mxu0 %v3780_v27 }
 0x190   : > { %1330 = vadd.xlane.f32.xlu1 %v1327_v42  ;;  %v4224_v42 = vld [vmem:[%s4779_s18 + $0x28] sm:$0xf0]  ;;  %s5866_s18 = scalar_lea.vmem %s5800_s11, %s4758_s0 }
 0x191   : > { %v3776_v44 = vor.u32 %v4224_v42, %v3775_v40  ;;  %1558 = vmatpush.bf16.msra.mxu1 %v3760_v54 }
 0x192   : > { %1543 = vmatpush.bf16.msra.mxu0 %v3768_v38 }
 0x193   : > { %1571 = vmatpush.bf16.msra.mxu2 %v3776_v44 }
 0x196   : > { %1544 = vmatpush.bf16.msra.mxu0 %v3756_v49 }
 0x197   : > { %1572 = vmatpush.bf16.msra.mxu2 %v3764_v55 }
 0x1fb   : > { %v1329_v48 = vpop.xlane.xlu1 %1328 }
 0x1fc   : > { %v1332_v53 = vmul.f32 %v1329_v48, %v4993_v34 }
 0x1fe   : > { %v1334_v56 = vadd.f32 1e-12, %v1332_v53 }
 0x200   : > { %4417 = vrsqrt.f32 %v1334_v56  ;;  %vm1342_vm2 = vweird.f32 %v1334_v56 }
 0x203   : > { %v1331_v57 = vpop.xlane.xlu1 %1330 }
 0x204   : > { %v1333_v58 = vmul.f32 %v1331_v57, %v4993_v34 }
 0x206   : > { %v4418_v59 = vpop.eup %4417  ;;  %v1335_v60 = vadd.f32 1e-12, %v1333_v58 }
 0x207   : > { %v1337_v61 = vmul.f32 %v4418_v59, %v1334_v56  ;;  %vm1343_vm1 = vweird.f32 %v4418_v59 }
 0x208   : > { %4419 = vrsqrt.f32 %v1335_v60  ;;  %vm1344_vm3 = vmor %vm1342_vm2, %vm1343_vm1  ;;  %vm1352_vm5 = vweird.f32 %v1335_v60 }
 0x209   : > { %v1338_v62 = vmul.f32 %v4418_v59, %v1337_v61 }
 0x20b   : > { %v1339_v63 = vmul.f32 0.5, %v1338_v62 }
 0x20d   : > { %v1340_v0 = vsub.f32 1.5, %v1339_v63 }
 0x20e   : > { %v4420_v1 = vpop.eup %4419 }
 0x20f   : > { %v1341_v3 = vmul.f32 %v4418_v59, %v1340_v0  ;;  %v1347_v4 = vmul.f32 %v4420_v1, %v1335_v60  ;;  %vm1353_vm4 = vweird.f32 %v4420_v1 }
 0x210   : > { %vm1354_vm6 = vmor %vm1352_vm5, %vm1353_vm4 }
 0x211   : > { %v1348_v5 = vmul.f32 %v4420_v1, %v1347_v4  ;;  %v1345_v6 = vsel %vm1344_vm3, %v4418_v59, %v1341_v3 }
 0x212   : > { %v1356_v9 = vmul.f32 %v1345_v6, %v4996_v37 }
 0x213   : > { %v1349_v7 = vmul.f32 0.5, %v1348_v5 }
 0x214   : > { %v1361_v13 = vmul.f32 %v4409_v2, %v1356_v9 }
 0x215   : > { %v1350_v8 = vsub.f32 1.5, %v1349_v7 }
 0x216   : > { %v1366_v37 = vadd.f32 %v4410_v14, %v1361_v13 }
 0x217   : > { %v1351_v10 = vmul.f32 %v4420_v1, %v1350_v8 }
 0x219   : > { %v1355_v11 = vsel %vm1354_vm6, %v4420_v1, %v1351_v10  ;;  %v1579_v1 = vlaneseq }
 0x21a   : > { %v1357_v12 = vmul.f32 %v1355_v11, %v5001_v41 }
 0x21b   : > { %v5098_v3 = vand.u32 127, %v1579_v1 }
 0x21c   : > { %v1362_v15 = vmul.f32 %v4409_v2, %v1357_v12 }
 0x21d   : > { %vm1581_vm9 = vcmp.ge.s32.totalorder %v5098_v3, 5 }
 0x21e   : > { %v1367_v16 = vadd.f32 %v4410_v14, %v1362_v15 }
 0x220   : > { %v1368_v17 = vpack.c.bf16 %v1367_v16, %v1366_v37 }
 0x222   : > { %1545 = vmatmul.bf16.vlgmr.msra.gmra.mxu0 %v1368_v17  ;;  %1559 = vmatmul.bf16.vlgmr.msra.gmra.mxu1 %v1368_v17 }
 0x223   : > { %1573 = vmatmul.bf16.vlgmr.msra.gmra.mxu2 %v1368_v17 }
 0x29f   : > { %v1546_v21 = vpop.f32.mrf.mxu0  ;;  %v1560_v22 = vpop.f32.mrf.mxu1 }
 0x2a0   : > { %v1561_v23 = vadd.f32 %v1560_v22, %v1404_v19  ;;  %v1547_v24 = vadd.f32 %v1546_v21, %v1403_v20 }
 0x2a2   : > { %v1584_v41 = vpack.c.bf16 %v1561_v23, %v1561_v23  ;;  %v1582_v30 = vpack.c.bf16 %v1547_v24, %v1547_v24 }
 0x2a4   : > { %v1727_v26 = vunpack.c.l.b16 %v1584_v41  ;;  %v1593_v27 = vsel %vm1588_vm7, %v1584_v41, 0  ;;  %v1722_v42 = vunpack.c.l.b16 %v1582_v30 }
 0x2a5   : > { %1602 = vmatpush.bf16.xpose.msra.mxu3 %v1593_v27 }
 0x2a6   : > { %v1728_v28 = vpack.c.b16 %v1727_v26, %v1727_v26  ;;  %v1574_v29 = vpop.f32.mrf.mxu2  ;;  %v1723_v50 = vpack.c.b16 %v1722_v42, %v1722_v42 }
 0x2a7   : > { %v1575_v31 = vadd.f32 %v1574_v29, %v1405_v25  ;;  %v1548_v32 = vpop.f32.mrf.mxu0  ;;  %v1562_v33 = vpop.f32.mrf.mxu1 }
 0x2a8   : > { %v1549_v35 = vadd.f32 %v1548_v32, %v1403_v20  ;;  %v1563_v36 = vadd.f32 %v1562_v33, %v1404_v19  ;;  %1729 = vrot.lane.b32.xlu2 %v1728_v28, %s4579_s6 }
 0x2a9   : > { %v5070_v38 = vpack.c.bf16 %v1575_v31, %v1575_v31 }
 0x2aa   : > { %v1583_v39 = vpack.c.bf16 %v1549_v35, %v1549_v35  ;;  %v1585_v40 = vpack.c.bf16 %v1563_v36, %v1563_v36 }
 0x2ab   : > { %v1687_v46 = vsel %vm1685_vm8, %v5070_v38, 0 }
 0x2ac   : > { %v1751_v43 = vunpack.c.l.b16 %v1583_v39  ;;  %v1756_v44 = vunpack.c.l.b16 %v1585_v40  ;;  %3849 = vmatmul.msk.bf16.vlgmr.msra.gmra.mxu3 %vm1588_vm7, %v1582_v30  ;;  %v1612_v45 = vsel %vm1588_vm7, %v1585_v40, 0 }
 0x2ad   : > { %1621 = vmatpush.bf16.xpose.msrb.mxu3 %v1612_v45 }
 0x2ae   : > { %v1752_v47 = vpack.c.b16 %v1751_v43, %v1751_v43  ;;  %v1757_v48 = vpack.c.b16 %v1756_v44, %v1756_v44  ;;  %v1576_v49 = vpop.f32.mrf.mxu2 }
 0x2af   : > { %v1577_v51 = vadd.f32 %v1576_v49, %v1405_v25 }
 0x2b0   : > { %1758 = vrot.lane.b32.xlu0 %v1757_v48, %s4579_s6  ;;  %1753 = vrot.lane.b32.xlu1 %v1752_v47, %s4579_s6 }
 0x2b1   : > { %v5078_v52 = vpack.c.bf16 %v1577_v51, %v1577_v51  ;;  %1724 = vrot.lane.b32.xlu2 %v1723_v50, %s4579_s6 }
 0x2b3   : > { %v1706_v53 = vsel %vm1685_vm8, %v5078_v52, 0 }
 0x2b4   : > { %1715 = vmatpush.bf16.msrb.mxu0 %v1706_v53 }
 0x2b5   : > { %1696 = vmatpush.bf16.msra.mxu3 %v1687_v46 }
 0x2b8   : > { %1902 = vrot.lane.b32.xlu0 %v1752_v47, %s4580_s23  ;;  %2044 = vrot.lane.b32.xlu1 %v1757_v48, %s4581_s26 }
 0x2b9   : > { %1881 = vrot.lane.b32.xlu2 %v1728_v28, %s4580_s23 }
 0x2bc   : > { %3850 = vmatmul.msk.bf16.vlgmr.msrb.gmra.mxu3 %vm1588_vm7, %v1583_v39 }
 0x2c0   : > { %2019 = vrot.lane.b32.xlu0 %v1723_v50, %s4581_s26 }
 0x2c1   : > { %1904 = vrot.lane.b32.xlu2 %v1757_v48, %s4580_s23 }
 0x2c9   : > { %1879 = vrot.lane.b32.xlu2 %v1723_v50, %s4580_s23 }
 0x2d1   : > { %2021 = vrot.lane.b32.xlu2 %v1728_v28, %s4581_s26 }
 0x2d9   : > { %2042 = vrot.lane.b32.xlu2 %v1752_v47, %s4581_s26 }
 0x302   : > { %v1730_v54 = vpop.permute.xlu2 %1729 }
 0x303   : > { %v1735_v55 = vsel %vm1588_vm7, %v1730_v54, 0 }
 0x304   : > { %1744 = vmatpush.bf16.xpose.msrb.mxu2 %v1735_v55 }
 0x30b   : > { %v1725_v56 = vpop.permute.xlu2 %1724 }
 0x30c   : > { %3853 = vmatmul.msk.bf16.vlgmr.msrb.gmra.mxu2 %vm1588_vm7, %v1725_v56 }
 0x313   : > { %v1882_v57 = vpop.permute.xlu2 %1881 }
 0x314   : > { %v1887_v58 = vsel %vm1588_vm7, %v1882_v57, 0 }
 0x315   : > { %1896 = vmatpush.bf16.xpose.msrb.mxu1 %v1887_v58 }
 0x31b   : > { %v1905_v59 = vpop.permute.xlu2 %1904 }
 0x31c   : > { %v1910_v0 = vsel %vm1588_vm7, %v1905_v59, 0 }
 0x322   : > { %v1759_v60 = vpop.permute.xlu0 %1758  ;;  %v1754_v61 = vpop.permute.xlu1 %1753 }
 0x323   : > { %v1764_v62 = vsel %vm1588_vm7, %v1759_v60, 0  ;;  %v1880_v63 = vpop.permute.xlu2 %1879 }
 0x324   : > { %3857 = vmatmul.msk.bf16.vlgmr.msrb.gmra.mxu1 %vm1588_vm7, %v1880_v63  ;;  %1773 = vmatpush.bf16.xpose.msra.mxu2 %v1764_v62  ;;  %v1832_v63 = vunpack.c.l.b16 %v5070_v38 }
 0x326   : > { %v5154_v3 = vpack.c.b16 %v1832_v63, %v1832_v63 }
 0x32a   : > { %v1903_v4 = vpop.permute.xlu0 %1902  ;;  %v2045_v5 = vpop.permute.xlu1 %2044 }
 0x32b   : > { %v2050_v6 = vsel %vm1588_vm7, %v2045_v5, 0  ;;  %v2022_v7 = vpop.permute.xlu2 %2021  ;;  %3854 = vmatmul.msk.bf16.vlgmr.msra.gmra.mxu2 %vm1588_vm7, %v1754_v61 }
 0x32c   : > { %1919 = vmatpush.bf16.xpose.msrb.mxu2 %v1910_v0  ;;  %v2027_v8 = vsel %vm1588_vm7, %v2022_v7, 0 }
 0x32d   : > { %2036 = vmatpush.bf16.xpose.msra.mxu1 %v2027_v8 }
 0x32f   : > { %v1604_v9 = vpop.f32.mrf.mxu3 }
 0x330   : > { %v1629_v2 = vsel %vm1581_vm9, -1e+30, %v1604_v9 }
 0x331   : > { %v1632_v10 = vsel %vm1631_vm10, %v1629_v2, -inf }
 0x332   : > { %v2020_v11 = vpop.permute.xlu0 %2019  ;;  %1633 = vmax.xlane.f32.xlu1 %v1632_v10 }
 0x333   : > { %v2043_v16 = vpop.permute.xlu2 %2042 }
 0x334   : > { %2059 = vmatpush.bf16.xpose.msra.mxu2 %v2050_v6  ;;  %3861 = vmatmul.msk.bf16.vlgmr.msra.gmra.mxu1 %vm1588_vm7, %v2020_v11 }
 0x337   : > { %v1606_v12 = vpop.f32.mrf.mxu3 }
 0x33b   : > { %3858 = vmatmul.msk.bf16.vlgmr.msrb.gmra.mxu2 %vm1588_vm7, %v1903_v4 }
 0x33f   : > { %v1623_v13 = vpop.f32.mrf.mxu3 }
 0x340   : > { %v1630_v14 = vsel %vm1581_vm9, -1e+30, %v1623_v13 }
 0x341   : > { %v1635_v15 = vsel %vm1631_vm10, %v1630_v14, -inf }
 0x342   : > { %1636 = vmax.xlane.f32.xlu0 %v1635_v15 }
 0x347   : > { %v1625_v37 = vpop.f32.mrf.mxu3 }
 0x34b   : > { %3862 = vmatmul.msk.bf16.vlgmr.msra.gmra.mxu2 %vm1588_vm7, %v2043_v16 }
 0x38f   : > { %v1746_v17 = vpop.f32.mrf.mxu2 }
 0x390   : > { %v1779_v18 = vsel %vm1581_vm9, -1e+30, %v1746_v17 }
 0x391   : > { %v1781_v19 = vsel %vm1631_vm10, %v1779_v18, -inf }
 0x392   : > { %1782 = vmax.xlane.f32.xlu2 %v1781_v19 }
 0x397   : > { %v1748_v20 = vpop.f32.mrf.mxu2 }
 0x398   : > { %v1856_v20 = vunpack.c.l.b16 %v5078_v52 }
 0x3a1   : > { %v1898_v21 = vpop.f32.mrf.mxu1 }
 0x3a2   : > { %v1925_v22 = vsel %vm1581_vm9, -1e+30, %v1898_v21 }
 0x3a3   : > { %v1927_v23 = vsel %vm1631_vm10, %v1925_v22, -inf }
 0x3a4   : > { %1928 = vmax.xlane.f32.xlu0 %v1927_v23 }
 0x3a5   : > { %v1634_v41 = vpop.xlane.xlu1 %1633 }
 0x3a6   : > { %v1638_v24 = vsub.f32 %v1629_v2, %v1634_v41  ;;  %v1857_v41 = vpack.c.b16 %v1856_v20, %v1856_v20 }
 0x3a8   : > { %v1640_v25 = vmul.f32 1.442695, %v1638_v24 }
 0x3a9   : > { %v1900_v26 = vpop.f32.mrf.mxu1 }
 0x3aa   : > { %4421 = vpow2.f32 %v1640_v25 }
 0x3ae   : > { %v1775_v27 = vpop.f32.mrf.mxu2 }
 0x3af   : > { %v1780_v28 = vsel %vm1581_vm9, -1e+30, %v1775_v27 }
 0x3b0   : > { %v5121_v29 = vpop.eup %4421  ;;  %v1784_v30 = vsel %vm1631_vm10, %v1780_v28, -inf }
 0x3b1   : > { %v2038_v31 = vpop.f32.mrf.mxu1  ;;  %1785 = vmax.xlane.f32.xlu1 %v1784_v30  ;;  %v1644_v32 = vsel %vm1631_vm10, %v5121_v29, 0.0 }
 0x3b2   : > { %1645 = vadd.xlane.f32.xlu0 %v1644_v32  ;;  %v2065_v33 = vsel %vm1581_vm9, -1e+30, %v2038_v31 }
 0x3b3   : > { %v2067_v42 = vsel %vm1631_vm10, %v2065_v33, -inf }
 0x3b5   : > { %v1637_v35 = vpop.xlane.xlu0 %1636 }
 0x3b6   : > { %v1639_v36 = vsub.f32 %v1630_v14, %v1637_v35  ;;  %v1777_v39 = vpop.f32.mrf.mxu2 }
 0x3b8   : > { %v1642_v40 = vmul.f32 1.442695, %v1639_v36 }
 0x3b9   : > { %v2040_v43 = vpop.f32.mrf.mxu1  ;;  %2068 = vmax.xlane.f32.xlu1 %v2067_v42 }
 0x3ba   : > { %4423 = vpow2.f32 %v1642_v40 }
 0x3be   : > { %v1921_v44 = vpop.f32.mrf.mxu2 }
 0x3bf   : > { %v5131_v45 = vsel %vm1581_vm9, -1e+30, %v1921_v44 }
 0x3c0   : > { %v5133_v46 = vpop.eup %4423  ;;  %v1930_v47 = vsel %vm1631_vm10, %v5131_v45, -inf }
 0x3c1   : > { %1931 = vmax.xlane.f32.xlu2 %v1930_v47  ;;  %v1647_v48 = vsel %vm1631_vm10, %v5133_v46, 0.0 }
 0x3c2   : > { %1648 = vadd.xlane.f32.xlu1 %v1647_v48 }
 0x3c6   : > { %v1923_v49 = vpop.f32.mrf.mxu2 }
 0x3ce   : > { %v2061_v50 = vpop.f32.mrf.mxu2 }
 0x3cf   : > { %v5141_v51 = vsel %vm1581_vm9, -1e+30, %v2061_v50 }
 0x3d0   : > { %v2070_v53 = vsel %vm1631_vm10, %v5141_v51, -inf }
 0x3d1   : > { %2071 = vmax.xlane.f32.xlu2 %v2070_v53 }
 0x3d6   : > { %v2063_v54 = vpop.f32.mrf.mxu2 }
 0x405   : > { %v1783_v55 = vpop.xlane.xlu2 %1782 }
 0x406   : > { %v1787_v56 = vsub.f32 %v1779_v18, %v1783_v55 }
 0x408   : > { %v1789_v57 = vmul.f32 1.442695, %v1787_v56 }
 0x40a   : > { %4425 = vpow2.f32 %v1789_v57 }
 0x410   : > { %v5145_v58 = vpop.eup %4425 }
 0x411   : > { %v1793_v59 = vsel %vm1631_vm10, %v5145_v58, 0.0 }
 0x412   : > { %1794 = vadd.xlane.f32.xlu0 %v1793_v59 }
 0x417   : > { %v1929_v60 = vpop.xlane.xlu0 %1928 }
 0x418   : > { %v1933_v61 = vsub.f32 %v1925_v22, %v1929_v60 }
 0x41a   : > { %v1935_v62 = vmul.f32 1.442695, %v1933_v61 }
 0x41c   : > { %4427 = vpow2.f32 %v1935_v62 }
 0x422   : > { %v5150_v0 = vpop.eup %4427 }
 0x423   : > { %v1939_v1 = vsel %vm1631_vm10, %v5150_v0, 0.0 }
 0x424   : > { %1940 = vadd.xlane.f32.xlu1 %v1939_v1  ;;  %v1786_v4 = vpop.xlane.xlu1 %1785 }
 0x425   : > { %v1646_v5 = vpop.xlane.xlu0 %1645  ;;  %v1788_v2 = vsub.f32 %v1780_v28, %v1786_v4 }
 0x426   : > { %1834 = vrot.lane.b32.xlu0 %v5154_v3, %s4579_s6  ;;  %4429 = vrcp.f32 %v1646_v5  ;;  %v1661_v11 = vand.u32 2147483648, %v1646_v5  ;;  %v1659_v13 = vand.u32 2147483647, %v1646_v5  ;;  %vm1655_vm12 = vweird.f32 %v1646_v5 }
 0x427   : > { %v1791_v14 = vmul.f32 1.442695, %v1788_v2 }
 0x428   : > { %v1662_v37 = vor.u32 1.1754944e-38, %v1661_v11  ;;  %vm1660_vm14 = vcmp.eq.f32.partialorder %v1659_v13, 8.507059e+37 }
 0x42c   : > { %v4430_v6 = vpop.eup %4429  ;;  %v2069_v7 = vpop.xlane.xlu1 %2068 }
 0x42d   : > { %v1651_v8 = vmul.f32 %v4430_v6, %v1646_v5  ;;  %v2073_v9 = vsub.f32 %v2065_v33, %v2069_v7  ;;  %vm1656_vm11 = vweird.f32 %v4430_v6 }
 0x42e   : > { %vm1657_vm13 = vmor %vm1655_vm12, %vm1656_vm11 }
 0x42f   : > { %v1652_v38 = vsub.f32 1.0, %v1651_v8  ;;  %v2075_v10 = vmul.f32 1.442695, %v2073_v9 }
 0x431   : > { %v1653_v12 = vmul.f32 %v4430_v6, %v1652_v38  ;;  %4431 = vpow2.f32 %v2075_v10 }
 0x433   : > { %v1654_v15 = vadd.f32 %v4430_v6, %v1653_v12 }
 0x434   : > { %v1932_v25 = vpop.xlane.xlu2 %1931 }
 0x435   : > { %v1658_v16 = vsel %vm1657_vm13, %v4430_v6, %v1654_v15  ;;  %v1649_v17 = vpop.xlane.xlu1 %1648  ;;  %v1934_v49 = vsub.f32 %v5131_v45, %v1932_v25 }
 0x436   : > { %v1663_v18 = vsel %vm1660_vm14, %v1662_v37, %v1658_v16  ;;  %4433 = vrcp.f32 %v1649_v17  ;;  %v1675_v52 = vand.u32 2147483648, %v1649_v17  ;;  %v1673_v31 = vand.u32 2147483647, %v1649_v17 }
 0x437   : > { %v5158_v19 = vpop.eup %4431  ;;  %4435 = vpow2.f32 %v1791_v14  ;;  %v1678_v21 = vmul.f32 %v5121_v29, %v1663_v18  ;;  %vm1669_vm0 = vweird.f32 %v1649_v17  ;;  %v1937_v50 = vmul.f32 1.442695, %v1934_v49 }
 0x438   : > { %v2079_v22 = vsel %vm1631_vm10, %v5158_v19, 0.0  ;;  %v1676_v33 = vor.u32 1.1754944e-38, %v1675_v52  ;;  %vm1674_vm2 = vcmp.eq.f32.partialorder %v1673_v31, 8.507059e+37 }
 0x439   : > { %2080 = vadd.xlane.f32.xlu2 %v2079_v22  ;;  %v1680_v23 = vpack.c.bf16 %v1678_v21, %v1678_v21 }
 0x43b   : > { %3851 = vmatmul.msk.bf16.vlgmr.msra.gmra.mxu3 %vm1631_vm10, %v1680_v23 }
 0x43c   : > { %v4434_v24 = vpop.eup %4433 }
 0x43d   : > { %v5165_v26 = vpop.eup %4435  ;;  %v1665_v27 = vmul.f32 %v4434_v24, %v1649_v17  ;;  %1858 = vrot.lane.b32.xlu1 %v1857_v41, %s4579_s6  ;;  %vm1670_vm15 = vweird.f32 %v4434_v24 }
 0x43e   : > { %v1796_v29 = vsel %vm1631_vm10, %v5165_v26, 0.0  ;;  %vm1671_vm1 = vmor %vm1669_vm0, %vm1670_vm15 }
 0x43f   : > { %v1666_v28 = vsub.f32 1.0, %v1665_v27 }
 0x441   : > { %v1667_v30 = vmul.f32 %v4434_v24, %v1666_v28  ;;  %1797 = vadd.xlane.f32.xlu2 %v1796_v29 }
 0x443   : > { %v1668_v32 = vadd.f32 %v4434_v24, %v1667_v30 }
 0x444   : > { %v2072_v35 = vpop.xlane.xlu2 %2071 }
 0x445   : > { %v2074_v36 = vsub.f32 %v5141_v51, %v2072_v35  ;;  %1998 = vrot.lane.b32.xlu1 %v1857_v41, %s4580_s23  ;;  %v1672_v39 = vsel %vm1671_vm1, %v4434_v24, %v1668_v32 }
 0x446   : > { %v1677_v40 = vsel %vm1674_vm2, %v1676_v33, %v1672_v39 }
 0x447   : > { %v2077_v42 = vmul.f32 1.442695, %v2074_v36  ;;  %v1679_v43 = vmul.f32 %v5133_v46, %v1677_v40 }
 0x449   : > { %4437 = vpow2.f32 %v2077_v42  ;;  %v1681_v44 = vpack.c.bf16 %v1679_v43, %v1679_v43 }
 0x44a   : > { %4439 = vpow2.f32 %v1937_v50 }
 0x44b   : > { %3852 = vmatmul.msk.bf16.vlgmr.msrb.gmra.mxu0 %vm1631_vm10, %v1681_v44 }
 0x44d   : > { %2117 = vrot.lane.b32.xlu1 %v5154_v3, %s4581_s26 }
 0x44f   : > { %v5176_v47 = vpop.eup %4437 }
 0x450   : > { %v2082_v48 = vsel %vm1631_vm10, %v5176_v47, 0.0  ;;  %v5183_v46 = vpop.eup %4439 }
 0x451   : > { %2083 = vadd.xlane.f32.xlu0 %v2082_v48  ;;  %v1942_v51 = vsel %vm1631_vm10, %v5183_v46, 0.0 }
 0x459   : > { %1977 = vrot.lane.b32.xlu2 %v5154_v3, %s4580_s23 }
 0x482   : > { %1943 = vadd.xlane.f32.xlu2 %v1942_v51 }
 0x485   : > { %v1795_v53 = vpop.xlane.xlu0 %1794 }
 0x486   : > { %4441 = vrcp.f32 %v1795_v53  ;;  %v1810_v57 = vand.u32 2147483648, %v1795_v53  ;;  %v1808_v60 = vand.u32 2147483647, %v1795_v53  ;;  %vm1804_vm4 = vweird.f32 %v1795_v53 }
 0x488   : > { %v1811_v45 = vor.u32 1.1754944e-38, %v1810_v57  ;;  %vm1809_vm6 = vcmp.eq.f32.partialorder %v1808_v60, 8.507059e+37 }
 0x48c   : > { %v4442_v54 = vpop.eup %4441 }
 0x48d   : > { %v1800_v55 = vmul.f32 %v4442_v54, %v1795_v53  ;;  %vm1805_vm3 = vweird.f32 %v4442_v54 }
 0x48e   : > { %vm1806_vm5 = vmor %vm1804_vm4, %vm1805_vm3 }
 0x48f   : > { %v1801_v56 = vsub.f32 1.0, %v1800_v55 }
 0x491   : > { %v1802_v59 = vmul.f32 %v4442_v54, %v1801_v56 }
 0x493   : > { %v1803_v61 = vadd.f32 %v4442_v54, %v1802_v59 }
 0x495   : > { %v1807_v62 = vsel %vm1806_vm5, %v4442_v54, %v1803_v61 }
 0x496   : > { %v1812_v63 = vsel %vm1809_vm6, %v1811_v45, %v1807_v62 }
 0x497   : > { %v1827_v1 = vmul.f32 %v5145_v58, %v1812_v63  ;;  %v1941_v4 = vpop.xlane.xlu1 %1940 }
 0x498   : > { %v1835_v3 = vpop.permute.xlu0 %1834  ;;  %4443 = vrcp.f32 %v1941_v4  ;;  %v1956_v12 = vand.u32 2147483648, %v1941_v4  ;;  %vm1950_vm11 = vweird.f32 %v1941_v4  ;;  %v1954_v14 = vand.u32 2147483647, %v1941_v4 }
 0x499   : > { %v1840_v5 = vsel %vm1685_vm8, %v1835_v3, 0  ;;  %v1829_v6 = vpack.c.bf16 %v1827_v1, %v1827_v1 }
 0x49a   : > { %1849 = vmatpush.bf16.msrb.mxu3 %v1840_v5  ;;  %2138 = vrot.lane.b32.xlu2 %v1857_v41, %s4581_s26  ;;  %v1957_v16 = vor.u32 1.1754944e-38, %v1956_v12  ;;  %vm1955_vm13 = vcmp.eq.f32.partialorder %v1954_v14, 8.507059e+37 }
 0x49d   : > { %3855 = vmatmul.msk.bf16.vlgmr.msrb.gmra.mxu3 %vm1631_vm10, %v1829_v6 }
 0x49e   : > { %v4444_v7 = vpop.eup %4443 }
 0x49f   : > { %v1946_v8 = vmul.f32 %v4444_v7, %v1941_v4  ;;  %vm1951_vm9 = vweird.f32 %v4444_v7 }
 0x4a0   : > { %vm1952_vm12 = vmor %vm1950_vm11, %vm1951_vm9 }
 0x4a1   : > { %v1947_v9 = vsub.f32 1.0, %v1946_v8 }
 0x4a3   : > { %v1948_v38 = vmul.f32 %v4444_v7, %v1947_v9 }
 0x4a5   : > { %v1949_v11 = vadd.f32 %v4444_v7, %v1948_v38 }
 0x4a7   : > { %v1953_v37 = vsel %vm1952_vm12, %v4444_v7, %v1949_v11 }
 0x4a8   : > { %v1958_v20 = vsel %vm1955_vm13, %v1957_v16, %v1953_v37 }
 0x4a9   : > { %v1973_v41 = vmul.f32 %v5150_v0, %v1958_v20 }
 0x4ab   : > { %v1975_v32 = vpack.c.bf16 %v1973_v41, %v1973_v41 }
 0x4ac   : > { %v2081_v2 = vpop.xlane.xlu2 %2080 }
 0x4ad   : > { %4445 = vrcp.f32 %v2081_v2  ;;  %v2096_v40 = vand.u32 2147483648, %v2081_v2  ;;  %vm2090_vm2 = vweird.f32 %v2081_v2  ;;  %v2094_v43 = vand.u32 2147483647, %v2081_v2 }
 0x4af   : > { %v1859_v10 = vpop.permute.xlu1 %1858  ;;  %v2097_v53 = vor.u32 1.1754944e-38, %v2096_v40  ;;  %vm2095_vm5 = vcmp.eq.f32.partialorder %v2094_v43, 8.507059e+37  ;;  %v4246_v40 = vld [vmem:[%s4774_s19 + $0x18] sm:$0xff]  ;;  %v4244_v43 = vld [vmem:[%s4774_s19 + $0x8] sm:$0xff] }
 0x4b0   : > { %v1864_v58 = vsel %vm1685_vm8, %v1859_v10, 0 }
 0x4b1   : > { %1873 = vmatpush.bf16.msra.mxu0 %v1864_v58 }
 0x4b3   : > { %v4446_v13 = vpop.eup %4445 }
 0x4b4   : > { %v1798_v15 = vpop.xlane.xlu2 %1797  ;;  %v2086_v17 = vmul.f32 %v4446_v13, %v2081_v2  ;;  %vm2091_vm15 = vweird.f32 %v4446_v13 }
 0x4b5   : > { %4447 = vrcp.f32 %v1798_v15  ;;  %v1824_v30 = vand.u32 2147483648, %v1798_v15  ;;  %v1822_v35 = vand.u32 2147483647, %v1798_v15  ;;  %vm1818_vm0 = vweird.f32 %v1798_v15  ;;  %vm2092_vm4 = vmor %vm2090_vm2, %vm2091_vm15 }
 0x4b6   : > { %v2087_v22 = vsub.f32 1.0, %v2086_v17 }
 0x4b7   : > { %v1999_v18 = vpop.permute.xlu1 %1998  ;;  %v1825_v42 = vor.u32 1.1754944e-38, %v1824_v30  ;;  %vm1823_vm3 = vcmp.eq.f32.partialorder %v1822_v35, 8.507059e+37  ;;  %v4250_v35 = vld [vmem:[%s4774_s19 + $0x38] sm:$0xff] }
 0x4b8   : > { %v2004_v21 = vsel %vm1685_vm8, %v1999_v18, 0  ;;  %v2088_v28 = vmul.f32 %v4446_v13, %v2087_v22  ;;  %2260 = vmatpush.bf16.msrb.mxu1 %v4250_v35  ;;  %v4005_v35 = vld [vmem:[%s4802_s7 + $0xd8] sm:$0xf0] }
 0x4b9   : > { %2013 = vmatpush.bf16.msrb.mxu0 %v2004_v21 }
 0x4ba   : > { %v2089_v39 = vadd.f32 %v4446_v13, %v2088_v28 }
 0x4bb   : > { %v4448_v23 = vpop.eup %4447 }
 0x4bc   : > { %v1814_v24 = vmul.f32 %v4448_v23, %v1798_v15  ;;  %v1978_v25 = vpop.permute.xlu2 %1977  ;;  %vm1819_vm14 = vweird.f32 %v4448_v23  ;;  %v2093_v49 = vsel %vm2092_vm4, %v4446_v13, %v2089_v39  ;;  %v4248_v39 = vld [vmem:[%s4774_s19 + $0x28] sm:$0xff] }
 0x4bd   : > { %v1983_v27 = vsel %vm1685_vm8, %v1978_v25, 0  ;;  %vm1820_vm1 = vmor %vm1818_vm0, %vm1819_vm14  ;;  %v2098_v56 = vsel %vm2095_vm5, %v2097_v53, %v2093_v49  ;;  %vm2188_vm0 = vcmask 785408  }
 0x4be   : > { %v1815_v52 = vsub.f32 1.0, %v1814_v24  ;;  %v5195_v29 = vpop.f32.mrf.mxu3  ;;  %1992 = vmatpush.bf16.msra.mxu3 %v1983_v27  ;;  %v2113_v57 = vmul.f32 %v5158_v19, %v2098_v56 }
 0x4bf   : > { %v2118_v31 = vpop.permute.xlu1 %2117 }
 0x4c0   : > { %v1816_v33 = vmul.f32 %v4448_v23, %v1815_v52  ;;  %v2123_v36 = vsel %vm1685_vm8, %v2118_v31, 0  ;;  %v2115_v60 = vpack.c.bf16 %v2113_v57, %v2113_v57 }
 0x4c1   : > { %3859 = vmatmul.msk.bf16.vlgmr.msra.gmra.mxu3 %vm1631_vm10, %v1975_v32 }
 0x4c2   : > { %2132 = vmatpush.bf16.msrb.mxu3 %v2123_v36  ;;  %v1817_v0 = vadd.f32 %v4448_v23, %v1816_v33  ;;  %v4249_v36 = vld [vmem:[%s4774_s19 + $0x30] sm:$0xff] }
 0x4c3   : > { %2261 = vmatpush.bf16.msrb.mxu1 %v4249_v36 }
 0x4c4   : > { %v1821_v44 = vsel %vm1820_vm1, %v4448_v23, %v1817_v0  ;;  %v2084_v61 = vpop.xlane.xlu0 %2083  ;;  %v4247_v0 = vld [vmem:[%s4774_s19 + $0x20] sm:$0xff] }
 0x4c5   : > { %v1826_v48 = vsel %vm1823_vm3, %v1825_v42, %v1821_v44  ;;  %4449 = vrcp.f32 %v2084_v61  ;;  %v2110_v14 = vand.u32 2147483648, %v2084_v61  ;;  %vm2104_vm13 = vweird.f32 %v2084_v61  ;;  %v4245_v42 = vld [vmem:[%s4774_s19 + $0x10] sm:$0xff]  ;;  %v4243_v44 = vld [vmem:[%s4774_s19] sm:$0xff] }
 0x4c6   : > { %v1828_v50 = vmul.f32 %v5165_v26, %v1826_v48  ;;  %v1700_v51 = vpop.f32.mrf.mxu3  ;;  %v2108_v15 = vand.u32 2147483647, %v2084_v61 }
 0x4c7   : > { %v2111_v16 = vor.u32 1.1754944e-38, %v2110_v14  ;;  %2262 = vmatpush.bf16.msrb.mxu1 %v4248_v39  ;;  %v4011_v14 = vld [vmem:[%s4802_s7 + $0xe0] sm:$0xf] }
 0x4c8   : > { %v5200_v54 = vpop.f32.mrf.mxu0  ;;  %v1830_v55 = vpack.c.bf16 %v1828_v50, %v1828_v50  ;;  %vm2109_vm15 = vcmp.eq.f32.partialorder %v2108_v15, 8.507059e+37  ;;  %v4281_v15 = vld [vmem:[%s4802_s7 + $0xec] sm:$0xf0]  ;;  %v3979_v39 = vld [vmem:[%s4802_s7 + $0xa0] sm:$0xf] }
 0x4ca   : > { %3856 = vmatmul.msk.bf16.vlgmr.msra.gmra.mxu0 %vm1631_vm10, %v1830_v55 }
 0x4cb   : > { %v4450_v26 = vpop.eup %4449  ;;  %2263 = vmatpush.bf16.msrb.mxu1 %v4247_v0  ;;  %v4273_v0 = vld [vmem:[%s4802_s7 + $0xac] sm:$0xf0] }
 0x4cc   : > { %v2100_v4 = vmul.f32 %v4450_v26, %v2084_v61 }
 0x4ce   : > { %v2101_v8 = vsub.f32 1.0, %v2100_v4 }
 0x4cf   : > { %2264 = vmatpush.bf16.msrb.mxu1 %v4246_v40  ;;  %v4271_v40 = vld [vmem:[%s4802_s7 + $0xa4] sm:$0xf] }
 0x4d0   : > { %v1719_v59 = vpop.f32.mrf.mxu0  ;;  %v2102_v58 = vmul.f32 %v4450_v26, %v2101_v8 }
 0x4d1   : > { %3863 = vmatmul.msk.bf16.vlgmr.msrb.gmra.mxu3 %vm1631_vm10, %v2115_v60 }
 0x4d2   : > { %v2103_v13 = vadd.f32 %v4450_v26, %v2102_v58 }
 0x4d3   : > { %2265 = vmatpush.bf16.msrb.mxu1 %v4245_v42  ;;  %v3980_v42 = vor.u32 %v4273_v0, %v3979_v39  ;;  %v3925_v39 = vld [vmem:[%s4802_s7 + $0x38] sm:$0xf0]  ;;  %v3899_v0 = vld [vmem:[%s4802_s7] sm:$0xf] }
 0x4d7   : > { %2266 = vmatpush.bf16.msrb.mxu1 %v4244_v43  ;;  %v3981_v43 = vld [vmem:[%s4802_s7 + $0xb0] sm:$0xf0] }
 0x4db   : > { %2267 = vmatpush.bf16.msrb.mxu1 %v4243_v44  ;;  %v3987_v44 = vld [vmem:[%s4802_s7 + $0xa8] sm:$0xf] }
 0x4f5   : > { %v1944_v45 = vpop.xlane.xlu2 %1943 }
 0x4f6   : > { %4451 = vrcp.f32 %v1944_v45  ;;  %v1970_v6 = vand.u32 2147483648, %v1944_v45  ;;  %v1968_v19 = vand.u32 2147483647, %v1944_v45  ;;  %vm1964_vm9 = vweird.f32 %v1944_v45 }
 0x4f8   : > { %v1971_v2 = vor.u32 1.1754944e-38, %v1970_v6  ;;  %vm1969_vm12 = vcmp.eq.f32.partialorder %v1968_v19, 8.507059e+37  ;;  %v4473_v6 = vld [vmem:[#allocation2] sm:$0xff]  ;;  %v4474_v19 = vld [vmem:[#allocation2 + $0x8] sm:$0xff] }
 0x4fc   : > { %v4452_v62 = vpop.eup %4451 }
 0x4fd   : > { %v1960_v63 = vmul.f32 %v4452_v62, %v1944_v45  ;;  %v2139_v1 = vpop.permute.xlu2 %2138  ;;  %vm1965_vm6 = vweird.f32 %v4452_v62 }
 0x4fe   : > { %v2144_v3 = vsel %vm1685_vm8, %v2139_v1, 0  ;;  %vm1966_vm11 = vmor %vm1964_vm9, %vm1965_vm6  ;;  %vm2105_vm8 = vweird.f32 %v4450_v26 }
 0x4ff   : > { %v1961_v5 = vsub.f32 1.0, %v1960_v63  ;;  %2153 = vmatpush.bf16.msra.mxu0 %v2144_v3  ;;  %vm2106_vm14 = vmor %vm2104_vm13, %vm2105_vm8  ;;  %v4411_v3 = vld [vmem:[%s5865_s28] ss:$0 sm:$0xff] }
 0x500   : > { %v2107_v37 = vsel %vm2106_vm14, %v4450_v26, %v2103_v13 }
 0x501   : > { %v1962_v7 = vmul.f32 %v4452_v62, %v1961_v5  ;;  %v2112_v17 = vsel %vm2109_vm15, %v2111_v16, %v2107_v37  ;;  %v4279_v37 = vld [vmem:[%s4802_s7 + $0xe4] sm:$0xf]  ;;  %v4012_v16 = vor.u32 %v4281_v15, %v4011_v14  ;;  %v3931_v15 = vld [vmem:[%s4802_s7 + $0x40] sm:$0xf] }
 0x502   : > { %v2114_v18 = vmul.f32 %v5176_v47, %v2112_v17  ;;  %v4013_v17 = vld [vmem:[%s4802_s7 + $0xf0] sm:$0xf0] }
 0x503   : > { %v1963_v9 = vadd.f32 %v4452_v62, %v1962_v7  ;;  %2531 = vmatpush.bf16.msrb.mxu2 %v4012_v16  ;;  %v4259_v16 = vld [vmem:[%s4802_s7 + $0x44] sm:$0xf] }
 0x504   : > { %v2116_v20 = vpack.c.bf16 %v2114_v18, %v2114_v18  ;;  %v4019_v18 = vld [vmem:[%s4802_s7 + $0xe8] sm:$0xf] }
 0x505   : > { %v1967_v38 = vsel %vm1966_vm11, %v4452_v62, %v1963_v9 }
 0x506   : > { %v1972_v10 = vsel %vm1969_vm12, %v1971_v2, %v1967_v38 }
 0x507   : > { %v1974_v11 = vmul.f32 %v5183_v46, %v1972_v10 }
 0x509   : > { %v1976_v12 = vpack.c.bf16 %v1974_v11, %v1974_v11 }
 0x50b   : > { %3860 = vmatmul.msk.bf16.vlgmr.msrb.gmra.mxu0 %vm1631_vm10, %v1976_v12 }
 0x51b   : > { %3864 = vmatmul.msk.bf16.vlgmr.msra.gmra.mxu0 %vm1631_vm10, %v2116_v20  ;;  %vm2185_vm10 = vcmask 523264   ;;  %v4282_v20 = vld [vmem:[%s4802_s7 + $0xf4] sm:$0xf0] }
 0x520   : > { %v1851_v21 = vpop.f32.mrf.mxu3 }
 0x528   : > { %v1853_v46 = vpop.f32.mrf.mxu3 }
 0x529   : > { %v4020_v46 = vor.u32 %v4282_v20, %v4019_v18  ;;  %v3933_v18 = vld [vmem:[%s4802_s7 + $0x50] sm:$0xf0]  ;;  %v3939_v20 = vld [vmem:[%s4802_s7 + $0x48] sm:$0xf] }
 0x52b   : > { %2559 = vmatpush.bf16.msrb.mxu0 %v4020_v46  ;;  %v3936_v46 = vor.u32 %v4259_v16, %v3933_v18 }
 0x544   : > { %v1994_v22 = vpop.f32.mrf.mxu3 }
 0x547   : > { %v1875_v23 = vpop.f32.mrf.mxu0 }
 0x548   : > { %v4394_v41 = vpack.i.bf16 %v1875_v23, %v1851_v21  ;;  %v4016_v21 = vor.u32 %v4279_v37, %v4013_v17  ;;  %v4021_v23 = vld [vmem:[%s4802_s7 + $0xf8] sm:$0xf0]  ;;  %v4261_v37 = vld [vmem:[%s4802_s7 + $0x4c] sm:$0xf0] }
 0x549   : > { %v3932_v17 = vor.u32 %v4261_v37, %v3931_v15  ;;  %v4413_v37 = vld [vmem:[%s5867_s25] ss:$0 sm:$0xff] }
 0x54a   : > { %4395 = vrot.lane.b32.xlu1 %v4394_v41, %s4581_s26  ;;  %2545 = vmatpush.bf16.msra.mxu3 %v4016_v21  ;;  %v4262_v21 = vld [vmem:[%s4802_s7 + $0x54] sm:$0xf0] }
 0x54c   : > { %v1996_v24 = vpop.f32.mrf.mxu3 }
 0x54d   : > { %v3995_v24 = vld [vmem:[%s4802_s7 + $0xc0] sm:$0xf] }
 0x54f   : > { %v1877_v25 = vpop.f32.mrf.mxu0 }
 0x550   : > { %v4277_v25 = vld [vmem:[%s4802_s7 + $0xcc] sm:$0xf0] }
 0x554   : > { %v2134_v27 = vpop.f32.mrf.mxu3 }
 0x55c   : > { %v2136_v28 = vpop.f32.mrf.mxu3 }
 0x55d   : > { %v3996_v28 = vor.u32 %v4277_v25, %v3995_v24  ;;  %v3915_v25 = vld [vmem:[%s4802_s7 + $0x20] sm:$0xf] }
 0x55f   : > { %2532 = vmatpush.bf16.msrb.mxu2 %v3996_v28  ;;  %v4255_v28 = vld [vmem:[%s4802_s7 + $0x24] sm:$0xf] }
 0x563   : > { %2533 = vmatpush.bf16.msrb.mxu2 %v3980_v42 }
 0x588   : > { %v2015_v52 = vpop.f32.mrf.mxu0 }
 0x589   : > { %v4399_v47 = vpack.i.bf16 %v2015_v52, %v1994_v22  ;;  %v4280_v22 = vld [vmem:[%s4802_s7 + $0xec] sm:$0xf]  ;;  %v3997_v52 = vld [vmem:[%s4802_s7 + $0xd0] sm:$0xf0] }
 0x58a   : > { %v4024_v41 = vor.u32 %v4280_v22, %v4021_v23  ;;  %v3940_v22 = vor.u32 %v4262_v21, %v3939_v20  ;;  %v4260_v23 = vld [vmem:[%s4802_s7 + $0x4c] sm:$0xf]  ;;  %v5327_v20 = vld [vmem:[%s4808_s20] sm:$0xf] }
 0x58b   : > { %4400 = vrot.lane.b32.xlu2 %v4399_v47, %s4580_s23  ;;  %v4003_v47 = vld [vmem:[%s4802_s7 + $0xc8] sm:$0xf]  ;;  %v2365_v21 = vperm.slane %v5327_v20, 2  ;;  %s5883_s23 = scalar_lea.vmem (!%p4161_p0), [#allocation5], %s4755_s22 }
 0x58c   : > { %2573 = vmatpush.bf16.msra.mxu1 %v4024_v41  ;;  %v3941_v41 = vld [vmem:[%s4802_s7 + $0x58] sm:$0xf0] }
 0x58d   : > { %v3944_v24 = vor.u32 %v4260_v23, %v3941_v41 }
 0x590   : > { %v2017_v30 = vpop.f32.mrf.mxu0 }
 0x591   : > { %v4278_v30 = vld [vmem:[%s4802_s7 + $0xd4] sm:$0xf0] }
 0x598   : > { %v2155_v31 = vpop.f32.mrf.mxu0 }
 0x599   : > { %v4404_v32 = vpack.i.bf16 %v2155_v31, %v2134_v27  ;;  %v4275_v27 = vld [vmem:[%s4802_s7 + $0xc4] sm:$0xf] }
 0x59a   : > { %v4000_v31 = vor.u32 %v4275_v27, %v3997_v52  ;;  %v4257_v27 = vld [vmem:[%s4802_s7 + $0x2c] sm:$0xf0] }
 0x59b   : > { %4405 = vrot.lane.b32.xlu1 %v4404_v32, %s4579_s6  ;;  %v4004_v32 = vor.u32 %v4278_v30, %v4003_v47  ;;  %v3916_v52 = vor.u32 %v4257_v27, %v3915_v25  ;;  %v3917_v47 = vld [vmem:[%s4802_s7 + $0x30] sm:$0xf0]  ;;  %v3923_v30 = vld [vmem:[%s4802_s7 + $0x28] sm:$0xf]  ;;  %s5882_s6 = sld [smem:[#allocation32_spill]] (!%p4161_p0) }
 0x59c   : > { %2546 = vmatpush.bf16.msra.mxu3 %v4000_v31  ;;  %v4258_v31 = vld [vmem:[%s4802_s7 + $0x34] sm:$0xf0] }
 0x59d   : > { %2560 = vmatpush.bf16.msrb.mxu0 %v4004_v32 }
 0x5a0   : > { %v2157_v33 = vpop.f32.mrf.mxu0 }
 0x5a1   : > { %v4276_v33 = vld [vmem:[%s4802_s7 + $0xcc] sm:$0xf] }
 0x5a2   : > { %v4008_v36 = vor.u32 %v4276_v33, %v4005_v35  ;;  %v3920_v33 = vor.u32 %v4255_v28, %v3917_v47  ;;  %v3924_v35 = vor.u32 %v4258_v31, %v3923_v30  ;;  %v2364_v28 = vperm.slane %v5327_v20, 1 }
 0x5a4   : > { %2574 = vmatpush.bf16.msra.mxu1 %v4008_v36  ;;  %v4256_v36 = vld [vmem:[%s4802_s7 + $0x2c] sm:$0xf] }
 0x5a5   : > { %v3928_v42 = vor.u32 %v4256_v36, %v3925_v39 }
 0x5bc   : > { %v4396_v48 = vpop.permute.xlu1 %4395 }
 0x5bd   : > { %v4398_v50 = vunpack.i.h.bf16 %v4396_v48  ;;  %v4397_v51 = vunpack.i.l.bf16 %v4396_v48  ;;  %v4274_v48 = vld [vmem:[%s4802_s7 + $0xb4] sm:$0xf0] }
 0x5bf   : > { %v2184_v57 = vsel %vm1588_vm7, %v5200_v54, %v4398_v50  ;;  %v2183_v59 = vsel %vm1588_vm7, %v5195_v29, %v4397_v51  ;;  %v3988_v50 = vor.u32 %v4274_v48, %v3987_v44  ;;  %v4272_v51 = vld [vmem:[%s4802_s7 + $0xac] sm:$0xf]  ;;  %v4251_v44 = vld [vmem:[%s4802_s7 + $0x4] sm:$0xf]  ;;  %v3901_v48 = vld [vmem:[%s4802_s7 + $0x10] sm:$0xf0] }
 0x5c1   : > { %2561 = vmatpush.bf16.msrb.mxu0 %v3988_v50  ;;  %v3904_v50 = vor.u32 %v4251_v44, %v3901_v48 }
 0x5e5   : > { %v4401_v49 = vpop.permute.xlu2 %4400 }
 0x5e6   : > { %v4403_v53 = vunpack.i.h.bf16 %v4401_v49  ;;  %v4402_v55 = vunpack.i.l.bf16 %v4401_v49  ;;  %v3984_v49 = vor.u32 %v4271_v40, %v3981_v43  ;;  %v4253_v43 = vld [vmem:[%s4802_s7 + $0xc] sm:$0xf0] }
 0x5e8   : > { %v2187_v45 = vsel %vm2185_vm10, %v2184_v57, %v4403_v53  ;;  %v2186_v26 = vsel %vm2185_vm10, %v2183_v59, %v4402_v55  ;;  %v3989_v53 = vld [vmem:[%s4802_s7 + $0xb8] sm:$0xf0]  ;;  %2547 = vmatpush.bf16.msra.mxu3 %v3984_v49  ;;  %v4269_v57 = vld [vmem:[%s4802_s7 + $0x8c] sm:$0xf0]  ;;  %v4267_v59 = vld [vmem:[%s4802_s7 + $0x84] sm:$0xf]  ;;  %v3900_v49 = vor.u32 %v4253_v43, %v3899_v0 }
 0x5e9   : > { %v3992_v55 = vor.u32 %v4272_v51, %v3989_v53  ;;  %v3907_v51 = vld [vmem:[%s4802_s7 + $0x8] sm:$0xf]  ;;  %v4254_v53 = vld [vmem:[%s4802_s7 + $0x14] sm:$0xf0] }
 0x5eb   : > { %2575 = vmatpush.bf16.msra.mxu1 %v3992_v55  ;;  %v4252_v55 = vld [vmem:[%s4802_s7 + $0xc] sm:$0xf] }
 0x60d   : > { %v4406_v56 = vpop.permute.xlu1 %4405 }
 0x60e   : > { %v4408_v60 = vunpack.i.h.bf16 %v4406_v56  ;;  %v4407_v61 = vunpack.i.l.bf16 %v4406_v56  ;;  %v3963_v56 = vld [vmem:[%s4802_s7 + $0x80] sm:$0xf] }
 0x610   : > { %v2190_v62 = vsel %vm2188_vm0, %v2187_v45, %v4408_v60  ;;  %v2189_v63 = vsel %vm2188_vm0, %v2186_v26, %v4407_v61  ;;  %v3964_v60 = vor.u32 %v4269_v57, %v3963_v56  ;;  %v3965_v61 = vld [vmem:[%s4802_s7 + $0x90] sm:$0xf0]  ;;  %v3971_v45 = vld [vmem:[%s4802_s7 + $0x88] sm:$0xf]  ;;  %v4270_v26 = vld [vmem:[%s4802_s7 + $0x94] sm:$0xf0]  ;;  %v3908_v57 = vor.u32 %v4254_v53, %v3907_v51 }
 0x611   : > { %v2191_v1 = vpack.c.bf16 %v2190_v62, %v2189_v63  ;;  %v3968_v62 = vor.u32 %v4267_v59, %v3965_v61  ;;  %v3972_v63 = vor.u32 %v4270_v26, %v3971_v45  ;;  %v3909_v59 = vld [vmem:[%s4802_s7 + $0x18] sm:$0xf0] }
 0x612   : > { %2534 = vmatpush.bf16.msrb.mxu2 %v3964_v60  ;;  %v3912_v60 = vor.u32 %v4252_v55, %v3909_v59 }
 0x613   : > { %2268 = vmatmul.bf16.vlgmr.msrb.gmra.mxu1 %v2191_v1  ;;  %v4268_v1 = vld [vmem:[%s4802_s7 + $0x8c] sm:$0xf]  ;;  %2548 = vmatpush.bf16.msra.mxu3 %v3968_v62 }
 0x614   : > { %2562 = vmatpush.bf16.msrb.mxu0 %v3972_v63 }
 0x690   : > { %v2269_v4 = vpop.f32.mrf.mxu1 }
 0x691   : > { %v2270_v5 = vadd.f32 %v4411_v3, %v2269_v4 }
 0x693   : > { %v5230_v54 = vadd.f32 %v4473_v6, %v2270_v5  ;;  %v3947_v5 = vld [vmem:[%s4802_s7 + $0x60] sm:$0xf]  ;;  %v4265_v6 = vld [vmem:[%s4802_s7 + $0x6c] sm:$0xf0] }
 0x695   : > { %2278 = vadd.xlane.f32.xlu2 %v5230_v54 }
 0x698   : > { %v2271_v29 = vpop.f32.mrf.mxu1 }
 0x699   : > { %v2272_v7 = vadd.f32 %v4411_v3, %v2271_v29  ;;  %v3973_v3 = vld [vmem:[%s4802_s7 + $0x98] sm:$0xf0]  ;;  %v4263_v29 = vld [vmem:[%s4802_s7 + $0x64] sm:$0xf] }
 0x69a   : > { %v3976_v4 = vor.u32 %v4268_v1, %v3973_v3 }
 0x69b   : > { %v5233_v8 = vadd.f32 %v4474_v19, %v2272_v7  ;;  %v3948_v7 = vor.u32 %v4265_v6, %v3947_v5  ;;  %v3949_v19 = vld [vmem:[%s4802_s7 + $0x70] sm:$0xf0] }
 0x69c   : > { %2576 = vmatpush.bf16.msra.mxu1 %v3976_v4 }
 0x69d   : > { %2280 = vadd.xlane.f32.xlu0 %v5233_v8  ;;  %2535 = vmatpush.bf16.msrb.mxu2 %v3948_v7 }
 0x6a1   : > { %2536 = vmatpush.bf16.msrb.mxu2 %v3932_v17 }
 0x6a5   : > { %2537 = vmatpush.bf16.msrb.mxu2 %v3916_v52 }
 0x6a9   : > { %2538 = vmatpush.bf16.msrb.mxu2 %v3900_v49 }
 0x708   : > { %v2279_v9 = vpop.xlane.xlu2 %2278 }
 0x709   : > { %v2282_v2 = vmul.f32 %v2279_v9, %v4993_v34  ;;  %v3955_v9 = vld [vmem:[%s4802_s7 + $0x68] sm:$0xf] }
 0x70b   : > { %v5238_v38 = vsub.f32 %v5230_v54, %v2282_v2  ;;  %v4266_v2 = vld [vmem:[%s4802_s7 + $0x74] sm:$0xf0] }
 0x70d   : > { %v2286_v10 = vmul.f32 %v5238_v38, %v5238_v38 }
 0x70f   : > { %2288 = vadd.xlane.f32.xlu1 %v2286_v10  ;;  %v3952_v10 = vor.u32 %v4263_v29, %v3949_v19 }
 0x710   : > { %v2281_v58 = vpop.xlane.xlu0 %2280 }
 0x711   : > { %v2283_v11 = vmul.f32 %v2281_v58, %v4993_v34  ;;  %v3956_v58 = vor.u32 %v4266_v2, %v3955_v9  ;;  %2549 = vmatpush.bf16.msra.mxu3 %v3952_v10 }
 0x713   : > { %v5244_v12 = vsub.f32 %v5233_v8, %v2283_v11  ;;  %v4264_v11 = vld [vmem:[%s4802_s7 + $0x6c] sm:$0xf]  ;;  %2563 = vmatpush.bf16.msrb.mxu0 %v3956_v58  ;;  %v4412_v58 = vld [vmem:[%s5866_s18] ss:$0 sm:$0xff] }
 0x715   : > { %v2287_v13 = vmul.f32 %v5244_v12, %v5244_v12  ;;  %2550 = vmatpush.bf16.msra.mxu3 %v3936_v46 }
 0x717   : > { %2290 = vadd.xlane.f32.xlu0 %v2287_v13  ;;  %v3957_v13 = vld [vmem:[%s4802_s7 + $0x78] sm:$0xf0]  ;;  %2564 = vmatpush.bf16.msrb.mxu0 %v3940_v22 }
 0x718   : > { %v3960_v14 = vor.u32 %v4264_v11, %v3957_v13 }
 0x719   : > { %2551 = vmatpush.bf16.msra.mxu3 %v3920_v33 }
 0x71a   : > { %2577 = vmatpush.bf16.msra.mxu1 %v3960_v14 }
 0x71b   : > { %2565 = vmatpush.bf16.msrb.mxu0 %v3924_v35 }
 0x71d   : > { %2552 = vmatpush.bf16.msra.mxu3 %v3904_v50 }
 0x71e   : > { %2578 = vmatpush.bf16.msra.mxu1 %v3944_v24  ;;  %v2363_v24 = vperm.slane %v5327_v20, 0 }
 0x71f   : > { %2566 = vmatpush.bf16.msrb.mxu0 %v3908_v57 }
 0x722   : > { %2579 = vmatpush.bf16.msra.mxu1 %v3928_v42 }
 0x726   : > { %2580 = vmatpush.bf16.msra.mxu1 %v3912_v60 }
 0x782   : > { %v2289_v32 = vpop.xlane.xlu1 %2288 }
 0x783   : > { %v2292_v40 = vmul.f32 %v2289_v32, %v4993_v34 }
 0x785   : > { %v2294_v56 = vadd.f32 1e-12, %v2292_v40 }
 0x787   : > { %4453 = vrsqrt.f32 %v2294_v56  ;;  %vm2302_vm1 = vweird.f32 %v2294_v56 }
 0x78a   : > { %v2291_v61 = vpop.xlane.xlu0 %2290 }
 0x78b   : > { %v2293_v45 = vmul.f32 %v2291_v61, %v4993_v34 }
 0x78d   : > { %v4454_v26 = vpop.eup %4453  ;;  %v2295_v62 = vadd.f32 1e-12, %v2293_v45 }
 0x78e   : > { %v2297_v63 = vmul.f32 %v4454_v26, %v2294_v56  ;;  %vm2303_vm7 = vweird.f32 %v4454_v26 }
 0x78f   : > { %4455 = vrsqrt.f32 %v2295_v62  ;;  %vm2304_vm2 = vmor %vm2302_vm1, %vm2303_vm7  ;;  %vm2312_vm4 = vweird.f32 %v2295_v62 }
 0x790   : > { %v2298_v1 = vmul.f32 %v4454_v26, %v2297_v63 }
 0x792   : > { %v2299_v3 = vmul.f32 0.5, %v2298_v1 }
 0x794   : > { %v2300_v4 = vsub.f32 1.5, %v2299_v3 }
 0x795   : > { %v4456_v5 = vpop.eup %4455 }
 0x796   : > { %v2301_v6 = vmul.f32 %v4454_v26, %v2300_v4  ;;  %v2307_v29 = vmul.f32 %v4456_v5, %v2295_v62  ;;  %vm2313_vm3 = vweird.f32 %v4456_v5 }
 0x797   : > { %vm2314_vm5 = vmor %vm2312_vm4, %vm2313_vm3 }
 0x798   : > { %v2308_v7 = vmul.f32 %v4456_v5, %v2307_v29  ;;  %v2305_v19 = vsel %vm2304_vm2, %v4454_v26, %v2301_v6 }
 0x799   : > { %v2316_v10 = vmul.f32 %v2305_v19, %v5238_v38 }
 0x79a   : > { %v2309_v9 = vmul.f32 0.5, %v2308_v7 }
 0x79b   : > { %v2321_v15 = vmul.f32 %v4412_v58, %v2316_v10 }
 0x79c   : > { %v2310_v2 = vsub.f32 1.5, %v2309_v9 }
 0x79d   : > { %v2326_v38 = vadd.f32 %v4413_v37, %v2321_v15 }
 0x79e   : > { %v2311_v11 = vmul.f32 %v4456_v5, %v2310_v2 }
 0x7a0   : > { %v2315_v13 = vsel %vm2314_vm5, %v4456_v5, %v2311_v11 }
 0x7a1   : > { %v2317_v14 = vmul.f32 %v2315_v13, %v5244_v12  ;;  %v2366_v12 = vperm.slane %v5327_v20, 3 }
 0x7a3   : > { %v2322_v16 = vmul.f32 %v4412_v58, %v2317_v14 }
 0x7a5   : > { %v2327_v17 = vadd.f32 %v4413_v37, %v2322_v16 }
 0x7a7   : > { %v2328_v18 = vpack.c.bf16 %v2327_v17, %v2326_v38 }
 0x7a9   : > { %2539 = vmatmul.bf16.vlgmr.msrb.gmra.mxu2 %v2328_v18  ;;  %2553 = vmatmul.bf16.vlgmr.msra.gmra.mxu3 %v2328_v18 }
 0x7aa   : > { %2567 = vmatmul.bf16.vlgmr.msrb.gmra.mxu0 %v2328_v18  ;;  %2581 = vmatmul.bf16.vlgmr.msra.gmra.mxu1 %v2328_v18 }
 0x827   : > { %v2568_v46 = vpop.f32.mrf.mxu0  ;;  %v2582_v22 = vpop.f32.mrf.mxu1 }
 0x828   : > { %v5331_v23 = vadd.f32 %v2568_v46, %v2365_v21  ;;  %v5335_v41 = vadd.f32 %v2582_v22, %v2366_v12 }
 0x82a   : > { %v5339_v25 = vmul.f32 0.70710677, %v5331_v23  ;;  %v5342_v27 = vmul.f32 0.70710677, %v5335_v41 }
 0x82c   : > { %v2683_v52 = vmul.f32 %v5339_v25, %v5339_v25  ;;  %v2723_v47 = vmul.f32 %v5342_v27, %v5342_v27  ;;  %v2540_v30 = vpop.f32.mrf.mxu2  ;;  %v2554_v31 = vpop.f32.mrf.mxu3 }
 0x82d   : > { %v5351_v32 = vadd.f32 %v2540_v30, %v2363_v24  ;;  %v5359_v36 = vadd.f32 %v2554_v31, %v2364_v28 }
 0x82e   : > { %v5353_v33 = vmin.f32 %v2683_v52, 16.0  ;;  %v5355_v35 = vmin.f32 %v2723_v47, 16.0 }
 0x82f   : > { %v5362_v39 = vmul.f32 0.70710677, %v5351_v32  ;;  %v5371_v49 = vmul.f32 0.70710677, %v5359_v36  ;;  %v2570_v5 = vpop.f32.mrf.mxu0 }
 0x830   : > { %v2696_v0 = vmul.f32 3.8918573e-05, %v5353_v33  ;;  %v2685_v40 = vmul.f32 2.1237322e-06, %v5353_v33  ;;  %v2725_v42 = vmul.f32 2.1237322e-06, %v5355_v35  ;;  %v5389_v10 = vadd.f32 %v2570_v5, %v2365_v21 }
 0x831   : > { %v2736_v43 = vmul.f32 3.8918573e-05, %v5355_v35  ;;  %v2603_v44 = vmul.f32 %v5362_v39, %v5362_v39  ;;  %v2643_v61 = vmul.f32 %v5371_v49, %v5371_v49 }
 0x832   : > { %v2697_v48 = vadd.f32 0.001143296, %v2696_v0  ;;  %v2686_v55 = vadd.f32 0.00028619796, %v2685_v40  ;;  %v2726_v56 = vadd.f32 0.00028619796, %v2725_v42  ;;  %v2584_v40 = vpop.f32.mrf.mxu1 }
 0x833   : > { %v2737_v50 = vadd.f32 0.001143296, %v2736_v43  ;;  %v5373_v51 = vmin.f32 %v2603_v44, 16.0  ;;  %v5385_v29 = vmin.f32 %v2643_v61, 16.0  ;;  %v5396_v17 = vmul.f32 0.70710677, %v5389_v10 }
 0x834   : > { %v2698_v53 = vmul.f32 %v2697_v48, %v5353_v33  ;;  %v2687_v63 = vmul.f32 %v2686_v55, %v5353_v33  ;;  %v2727_v1 = vmul.f32 %v2726_v56, %v5355_v35  ;;  %v5412_v55 = vadd.f32 %v2584_v40, %v2366_v12 }
 0x835   : > { %v2738_v57 = vmul.f32 %v2737_v50, %v5355_v35  ;;  %v2616_v59 = vmul.f32 3.8918573e-05, %v5373_v51  ;;  %v2605_v2 = vmul.f32 2.1237322e-06, %v5373_v51  ;;  %v2645_v15 = vmul.f32 2.1237322e-06, %v5385_v29 }
 0x836   : > { %v2699_v60 = vadd.f32 0.014752088, %v2698_v53  ;;  %v2688_v58 = vadd.f32 0.0036580483, %v2687_v63  ;;  %v2728_v11 = vadd.f32 0.0036580483, %v2727_v1  ;;  %v2843_v0 = vmul.f32 %v5396_v17, %v5396_v17  ;;  %v2542_v63 = vpop.f32.mrf.mxu2 }
 0x837   : > { %v2739_v45 = vadd.f32 0.014752088, %v2738_v57  ;;  %v2617_v26 = vadd.f32 0.001143296, %v2616_v59  ;;  %v2606_v38 = vadd.f32 0.00028619796, %v2605_v2 }
 0x838   : > { %v2700_v62 = vmul.f32 %v2699_v60, %v5353_v33  ;;  %v2689_v18 = vmul.f32 %v2688_v58, %v5353_v33  ;;  %v2729_v21 = vmul.f32 %v2728_v11, %v5355_v35  ;;  %v2646_v22 = vadd.f32 0.00028619796, %v2645_v15 }
 0x839   : > { %v2740_v3 = vmul.f32 %v2739_v45, %v5355_v35  ;;  %v2618_v4 = vmul.f32 %v2617_v26, %v5373_v51  ;;  %v2656_v52 = vmul.f32 3.8918573e-05, %v5385_v29  ;;  %v2607_v31 = vmul.f32 %v2606_v38, %v5373_v51 }
 0x83a   : > { %v2701_v6 = vadd.f32 0.112945676, %v2700_v62  ;;  %v2690_v42 = vadd.f32 0.05243302, %v2689_v18  ;;  %v2730_v43 = vadd.f32 0.05243302, %v2729_v21  ;;  %v2647_v48 = vmul.f32 %v2646_v22, %v5385_v29 }
 0x83b   : > { %v2741_v7 = vadd.f32 0.112945676, %v2740_v3  ;;  %v2619_v19 = vadd.f32 0.014752088, %v2618_v4  ;;  %v2657_v50 = vadd.f32 0.001143296, %v2656_v52 }
 0x83c   : > { %v2702_v9 = vmul.f32 %v2701_v6, %v5353_v33  ;;  %v2608_v56 = vadd.f32 0.0036580483, %v2607_v31  ;;  %v5414_v57 = vmin.f32 %v2843_v0, 16.0  ;;  %v2691_v59 = vmul.f32 %v2690_v42, %v5353_v33 }
 0x83d   : > { %v2742_v14 = vmul.f32 %v2741_v7, %v5355_v35  ;;  %v2620_v37 = vmul.f32 %v2619_v19, %v5373_v51  ;;  %v2731_v60 = vmul.f32 %v2730_v43, %v5355_v35  ;;  %v2648_v45 = vadd.f32 0.0036580483, %v2647_v48 }
 0x83e   : > { %v2703_v13 = vadd.f32 0.4994258, %v2702_v9  ;;  %v2658_v26 = vmul.f32 %v2657_v50, %v5385_v29  ;;  %v2845_v62 = vmul.f32 2.1237322e-06, %v5414_v57  ;;  %v2856_v3 = vmul.f32 3.8918573e-05, %v5414_v57 }
 0x83f   : > { %v2743_v46 = vadd.f32 0.4994258, %v2742_v14  ;;  %v2621_v30 = vadd.f32 0.112945676, %v2620_v37  ;;  %v5424_v12 = vmul.f32 0.70710677, %v5412_v55  ;;  %v2609_v4 = vmul.f32 %v2608_v56, %v5373_v51 }
 0x840   : > { %v2704_v16 = vmul.f32 %v2703_v13, %v5353_v33  ;;  %v2692_v6 = vadd.f32 0.18741608, %v2691_v59  ;;  %v5431_v7 = vadd.f32 %v2542_v63, %v2363_v24  ;;  %v2732_v19 = vadd.f32 0.18741608, %v2731_v60 }
 0x841   : > { %v2744_v44 = vmul.f32 %v2743_v46, %v5355_v35  ;;  %v2622_v53 = vmul.f32 %v2621_v30, %v5373_v51  ;;  %v2649_v9 = vmul.f32 %v2648_v45, %v5385_v29  ;;  %v2659_v2 = vadd.f32 0.014752088, %v2658_v26 }
 0x842   : > { %v5401_v47 = vadd.f32 1.0, %v2704_v16  ;;  %v2846_v58 = vadd.f32 0.00028619796, %v2845_v62  ;;  %v2857_v13 = vadd.f32 0.001143296, %v2856_v3  ;;  %v2883_v14 = vmul.f32 %v5424_v12, %v5424_v12 }
 0x843   : > { %v5418_v61 = vadd.f32 1.0, %v2744_v44  ;;  %v2623_v1 = vadd.f32 0.4994258, %v2622_v53  ;;  %v2610_v37 = vadd.f32 0.05243302, %v2609_v4  ;;  %v2693_v24 = vmul.f32 %v2692_v6, %v5353_v33 }
 0x844   : > { %4457 = vrcp.f32 %v5401_v47  ;;  %v2847_v16 = vmul.f32 %v2846_v58, %v5414_v57  ;;  %v2733_v38 = vmul.f32 %v2732_v19, %v5355_v35  ;;  %v2650_v18 = vadd.f32 0.05243302, %v2649_v9  ;;  %v4306_v9 = vld [vmem:[%s4813_s4 + $0xb8] sm:$0xff] }
 0x845   : > { %4459 = vrcp.f32 %v5418_v61  ;;  %v2624_v11 = vmul.f32 %v2623_v1, %v5373_v51  ;;  %v2858_v21 = vmul.f32 %v2857_v13, %v5414_v57  ;;  %v2660_v22 = vmul.f32 %v2659_v2, %v5385_v29  ;;  %v4314_v2 = vld [vmem:[%s4813_s4 + $0xf8] sm:$0xff]  ;;  %3227 = vmatpush.bf16.msra.mxu0 %v4306_v9 }
 0x846   : > { %v5447_v52 = vmin.f32 %v2883_v14, 16.0  ;;  %v5450_v30 = vmul.f32 0.70710677, %v5431_v7  ;;  %v5453_v31 = vmul.f32 0.5, %v5331_v23  ;;  %v2611_v0 = vmul.f32 %v2610_v37, %v5373_v51  ;;  %3241 = vmatpush.bf16.msrb.mxu1 %v4314_v2  ;;  %v2556_v2 = vpop.f32.mrf.mxu3 }
 0x847   : > { %v5444_v46 = vadd.f32 1.0, %v2624_v11  ;;  %v2694_v35 = vadd.f32 1.1283791, %v2693_v24  ;;  %v5459_v42 = vmul.f32 0.5, %v5335_v41  ;;  %v5462_v43 = vmul.f32 0.5, %v5389_v10 }
 0x848   : > { %v2848_v44 = vadd.f32 0.0036580483, %v2847_v16  ;;  %v2715_v48 = vand.u32 2147483647, %v5401_v47  ;;  %v2734_v50 = vadd.f32 1.1283791, %v2733_v38  ;;  %v5466_v53 = vmul.f32 %v2650_v18, %v5385_v29 }
 0x849   : > { %v2859_v23 = vadd.f32 0.014752088, %v2858_v21  ;;  %4461 = vrcp.f32 %v5444_v46  ;;  %v2661_v56 = vadd.f32 0.112945676, %v2660_v22  ;;  %v2885_v59 = vmul.f32 2.1237322e-06, %v5447_v52 }
 0x84a   : > { %v5427_v5 = vpop.eup %4457  ;;  %v2763_v41 = vmul.f32 %v5450_v30, %v5450_v30  ;;  %v2612_v45 = vadd.f32 0.18741608, %v2611_v0  ;;  %v5477_v62 = vmul.f32 %v2694_v35, %v5339_v25  ;;  %v2849_v63 = vmul.f32 %v2848_v44, %v5414_v57  ;;  %v4305_v35 = vld [vmem:[%s4813_s4 + $0xb0] sm:$0xff] }
 0x84b   : > { %v2707_v15 = vmul.f32 %v5427_v5, %v5401_v47  ;;  %v5456_v40 = vpop.eup %4459  ;;  %v2860_v26 = vmul.f32 %v2859_v23, %v5414_v57  ;;  %v2896_v1 = vmul.f32 3.8918573e-05, %v5447_v52  ;;  %vm2711_vm6 = vweird.f32 %v5401_v47  ;;  %3228 = vmatpush.bf16.msra.mxu0 %v4305_v35  ;;  %v4297_v35 = vld [vmem:[%s4813_s4 + $0x70] sm:$0xff] }
 0x84c   : > { %v2747_v60 = vmul.f32 %v5456_v40, %v5418_v61  ;;  %v5481_v3 = vmin.f32 %v2763_v41, 16.0  ;;  %v2717_v4 = vand.u32 2147483648, %v5401_v47  ;;  %v5486_v6 = vmul.f32 %v2734_v50, %v5342_v27  ;;  %v4313_v47 = vld [vmem:[%s4813_s4 + $0xf0] sm:$0xff] }
 0x84d   : > { %v2708_v33 = vsub.f32 1.0, %v2707_v15  ;;  %v2886_v19 = vadd.f32 0.00028619796, %v2885_v59  ;;  %vm5490_vm9 = vcmp.eq.f32.partialorder %v2715_v48, 8.507059e+37  ;;  %v2755_v25 = vand.u32 2147483647, %v5418_v61  ;;  %3242 = vmatpush.bf16.msrb.mxu1 %v4313_v47 }
 0x84e   : > { %v2662_v11 = vmul.f32 %v2661_v56, %v5385_v29  ;;  %v2861_v13 = vadd.f32 0.112945676, %v2860_v26  ;;  %vm2712_vm11 = vweird.f32 %v5427_v5  ;;  %v2748_v15 = vsub.f32 1.0, %v2747_v60  ;;  %v4290_v60 = vld [vmem:[%s4813_s4 + $0x38] sm:$0xff] }
 0x84f   : > { %v2709_v10 = vmul.f32 %v5427_v5, %v2708_v33  ;;  %v2757_v27 = vand.u32 2147483648, %v5418_v61  ;;  %v5499_v37 = vpop.eup %4461  ;;  %v2850_v24 = vadd.f32 0.05243302, %v2849_v63  ;;  %v2897_v38 = vadd.f32 0.001143296, %v2896_v1  ;;  %vm5512_vm8 = vmor %vm2711_vm6, %vm2712_vm11  ;;  %3199 = vmatpush.bf16.msra.mxu2 %v4290_v60 }
 0x850   : > { %v2862_v16 = vmul.f32 %v2861_v13, %v5414_v57  ;;  %v2765_v18 = vmul.f32 2.1237322e-06, %v5481_v3  ;;  %v2718_v21 = vor.u32 1.1754944e-38, %v2717_v4  ;;  %vm2751_vm12 = vweird.f32 %v5418_v61  ;;  %v4312_v13 = vld [vmem:[%s4813_s4 + $0xe8] sm:$0xff] }
 0x851   : > { %v2710_v14 = vadd.f32 %v5427_v5, %v2709_v10  ;;  %v2613_v22 = vmul.f32 %v2612_v45, %v5373_v51  ;;  %v2887_v33 = vmul.f32 %v2886_v19, %v5447_v52  ;;  %v2776_v0 = vmul.f32 3.8918573e-05, %v5481_v3  ;;  %v4298_v45 = vld [vmem:[%s4813_s4 + $0x78] sm:$0xff]  ;;  %3243 = vmatpush.bf16.msrb.mxu1 %v4312_v13 }
 0x852   : > { %v2663_v48 = vadd.f32 0.4994258, %v2662_v11  ;;  %v2863_v50 = vadd.f32 0.4994258, %v2862_v16  ;;  %v2898_v23 = vmul.f32 %v2897_v38, %v5447_v52  ;;  %v2766_v56 = vadd.f32 0.00028619796, %v2765_v18  ;;  %3213 = vmatpush.bf16.msrb.mxu3 %v4298_v45 }
 0x853   : > { %v2714_v51 = vsel %vm5512_vm8, %v5427_v5, %v2710_v14  ;;  %v2749_v59 = vmul.f32 %v5456_v40, %v2748_v15  ;;  %v2627_v41 = vmul.f32 %v5499_v37, %v5444_v46  ;;  %v2777_v10 = vadd.f32 0.001143296, %v2776_v0  ;;  %v4304_v11 = vld [vmem:[%s4813_s4 + $0xa8] sm:$0xff]  ;;  %v4289_v0 = vld [vmem:[%s4813_s4 + $0x30] sm:$0xff] }
 0x854   : > { %v2851_v26 = vmul.f32 %v2850_v24, %v5414_v57  ;;  %v2864_v63 = vmul.f32 %v2863_v50, %v5414_v57  ;;  %v2899_v1 = vadd.f32 0.014752088, %v2898_v23  ;;  %v2767_v4 = vmul.f32 %v2766_v56, %v5481_v3  ;;  %3229 = vmatpush.bf16.msra.mxu0 %v4304_v11  ;;  %3200 = vmatpush.bf16.msra.mxu2 %v4289_v0  ;;  %v4288_v45 = vld [vmem:[%s4813_s4 + $0x28] sm:$0xff] }
 0x855   : > { %vm2752_vm13 = vweird.f32 %v5456_v40  ;;  %vm5530_vm14 = vcmp.eq.f32.partialorder %v2755_v25, 8.507059e+37  ;;  %v2888_v19 = vadd.f32 0.0036580483, %v2887_v33  ;;  %v2778_v9 = vmul.f32 %v2777_v10, %v5481_v3 }
 0x856   : > { %v2637_v14 = vand.u32 2147483648, %v5444_v46  ;;  %v2664_v15 = vmul.f32 %v2663_v48, %v5385_v29  ;;  %v5539_v24 = vadd.f32 1.0, %v2864_v63  ;;  %v2900_v25 = vmul.f32 %v2899_v1, %v5447_v52  ;;  %vm5560_vm15 = vmor %vm2751_vm12, %vm2752_vm13  ;;  %3214 = vmatpush.bf16.msrb.mxu3 %v4297_v35 }
 0x857   : > { %v2719_v16 = vsel %vm5490_vm9, %v2718_v21, %v2714_v51  ;;  %v2750_v38 = vadd.f32 %v5456_v40, %v2749_v59  ;;  %v2768_v18 = vadd.f32 0.0036580483, %v2767_v4  ;;  %v2779_v33 = vadd.f32 0.014752088, %v2778_v9  ;;  %v4303_v51 = vld [vmem:[%s4813_s4 + $0xa0] sm:$0xff]  ;;  %v4302_v9 = vld [vmem:[%s4813_s4 + $0x98] sm:$0xff] }
 0x858   : > { %v2628_v44 = vsub.f32 1.0, %v2627_v41  ;;  %v2852_v50 = vadd.f32 0.18741608, %v2851_v26  ;;  %4463 = vrcp.f32 %v5539_v24  ;;  %v5550_v48 = vadd.f32 %v2556_v2, %v2364_v28  ;;  %v4311_v41 = vld [vmem:[%s4813_s4 + $0xe0] sm:$0xff]  ;;  %3230 = vmatpush.bf16.msra.mxu0 %v4303_v51  ;;  %v4296_v26 = vld [vmem:[%s4813_s4 + $0x68] sm:$0xff]  ;;  %3201 = vmatpush.bf16.msra.mxu2 %v4288_v45  ;;  %v4310_v2 = vld [vmem:[%s4813_s4 + $0xd8] sm:$0xff] }
 0x859   : > { %v2758_v23 = vor.u32 1.1754944e-38, %v2757_v27  ;;  %v5552_v58 = vadd.f32 1.1283791, %v2613_v22  ;;  %v2889_v21 = vmul.f32 %v2888_v19, %v5447_v52  ;;  %v2901_v56 = vadd.f32 0.112945676, %v2900_v25  ;;  %3244 = vmatpush.bf16.msrb.mxu1 %v4311_v41  ;;  %v4301_v59 = vld [vmem:[%s4813_s4 + $0x90] sm:$0xff] }
 0x85a   : > { %v2635_v20 = vand.u32 2147483647, %v5444_v46  ;;  %v5565_v28 = vor.u32 1.1754944e-38, %v2637_v14  ;;  %v5567_v27 = vadd.f32 1.0, %v2664_v15  ;;  %v2780_v22 = vmul.f32 %v2779_v33, %v5481_v3  ;;  %3215 = vmatpush.bf16.msrb.mxu3 %v4296_v26  ;;  %v4295_v33 = vld [vmem:[%s4813_s4 + $0x60] sm:$0xff]  ;;  %v4286_v26 = vld [vmem:[%s4813_s4 + $0x18] sm:$0xff] }
 0x85b   : > { %v5572_v10 = vmul.f32 %v2719_v16, %v5477_v62  ;;  %v2754_v61 = vsel %vm5560_vm15, %v5456_v40, %v2750_v38  ;;  %v2902_v47 = vmul.f32 %v2901_v56, %v5447_v52  ;;  %v2769_v60 = vmul.f32 %v2768_v18, %v5481_v3  ;;  %v4287_v18 = vld [vmem:[%s4813_s4 + $0x20] sm:$0xff] }
 0x85c   : > { %v2629_v63 = vmul.f32 %v5499_v37, %v2628_v44  ;;  %v2853_v1 = vmul.f32 %v2852_v50, %v5414_v57  ;;  %v2781_v4 = vadd.f32 0.112945676, %v2780_v22  ;;  %v5584_v62 = vmul.f32 0.70710677, %v5550_v48  ;;  %3231 = vmatpush.bf16.msra.mxu0 %v4302_v9  ;;  %3202 = vmatpush.bf16.msra.mxu2 %v4287_v18  ;;  %v4285_v18 = vld [vmem:[%s4813_s4 + $0x10] sm:$0xff]  ;;  %v4307_v25 = vld [vmem:[%s4813_s4 + $0xc0] sm:$0xff] }
 0x85d   : > { %vm2631_vm10 = vweird.f32 %v5444_v46  ;;  %vm2632_vm0 = vweird.f32 %v5499_v37  ;;  %v2890_v40 = vadd.f32 0.05243302, %v2889_v21  ;;  %v2903_v19 = vadd.f32 0.4994258, %v2902_v47  ;;  %3245 = vmatpush.bf16.msrb.mxu1 %v4310_v2 }
 0x85e   : > { %v5590_v11 = vpop.eup %4463  ;;  %v2759_v57 = vsel %vm5530_vm14, %v2758_v23, %v2754_v61  ;;  %4465 = vrcp.f32 %v5567_v27  ;;  %v2782_v13 = vmul.f32 %v2781_v4, %v5481_v3  ;;  %v2803_v14 = vmul.f32 %v5584_v62, %v5584_v62  ;;  %3216 = vmatpush.bf16.msrb.mxu3 %v4295_v33  ;;  %vm5625_vm1 = vmor %vm2631_vm10, %vm2632_vm0 }
 0x85f   : > { %v4027_v15 = vclamps-f32 %v5572_v10, 1.0  ;;  %vm5599_vm7 = vcmp.eq.f32.partialorder %v2635_v20, 8.507059e+37  ;;  %v2867_v16 = vmul.f32 %v5590_v11, %v5539_v24  ;;  %v2904_v5 = vmul.f32 %v2903_v19, %v5447_v52  ;;  %v4309_v20 = vld [vmem:[%s4813_s4 + $0xd0] sm:$0xff] }
 0x860   : > { %v2770_v38 = vadd.f32 0.05243302, %v2769_v60  ;;  %v2630_v0 = vadd.f32 %v5499_v37, %v2629_v63  ;;  %v2854_v35 = vadd.f32 1.1283791, %v2853_v1  ;;  %v2783_v44 = vadd.f32 0.4994258, %v2782_v13  ;;  %3232 = vmatpush.bf16.msra.mxu0 %v4301_v59  ;;  %3203 = vmatpush.bf16.msra.mxu2 %v4286_v26 }
 0x861   : > { %v5609_v50 = vmin.f32 %v2803_v14, 16.0  ;;  %v2868_v23 = vsub.f32 1.0, %v2867_v16  ;;  %v2875_v21 = vand.u32 2147483647, %v5539_v24  ;;  %v2891_v56 = vmul.f32 %v2890_v40, %v5447_v52  ;;  %v4294_v63 = vld [vmem:[%s4813_s4 + $0x58] sm:$0xff]  ;;  %3246 = vmatpush.bf16.msrb.mxu1 %v4309_v20  ;;  %v4300_v14 = vld [vmem:[%s4813_s4 + $0x88] sm:$0xff] }
 0x862   : > { %v5613_v51 = vadd.f32 1.0, %v2904_v5  ;;  %v2877_v22 = vand.u32 2147483648, %v5539_v24  ;;  %v2784_v41 = vmul.f32 %v2783_v44, %v5481_v3  ;;  %vm2872_vm2 = vweird.f32 %v5590_v11  ;;  %3217 = vmatpush.bf16.msrb.mxu3 %v4294_v63 }
 0x863   : > { %v2805_v10 = vmul.f32 2.1237322e-06, %v5609_v50  ;;  %v2816_v61 = vmul.f32 3.8918573e-05, %v5609_v50  ;;  %v2869_v60 = vmul.f32 %v5590_v11, %v2868_v23  ;;  %v2771_v45 = vmul.f32 %v2770_v38, %v5481_v3 }
 0x864   : > { %4467 = vrcp.f32 %v5613_v51  ;;  %v5635_v1 = vpop.eup %4465  ;;  %v5638_v46 = vmul.f32 %v2759_v57, %v5486_v6  ;;  %v2634_v4 = vsel %vm5625_vm1, %v5499_v37, %v2630_v0  ;;  %v5643_v40 = vadd.f32 1.0, %v2784_v41  ;;  %v4308_v6 = vld [vmem:[%s4813_s4 + $0xc8] sm:$0xff]  ;;  %3233 = vmatpush.bf16.msra.mxu0 %v4300_v14  ;;  %3204 = vmatpush.bf16.msra.mxu2 %v4285_v18 }
 0x865   : > { %v2806_v19 = vadd.f32 0.00028619796, %v2805_v10  ;;  %v2870_v9 = vadd.f32 %v5590_v11, %v2869_v60  ;;  %vm2871_vm3 = vweird.f32 %v5539_v24  ;;  %v2892_v2 = vadd.f32 0.18741608, %v2891_v56  ;;  %3247 = vmatpush.bf16.msrb.mxu1 %v4308_v6 }
 0x866   : > { %v2817_v13 = vadd.f32 0.001143296, %v2816_v61  ;;  %v2925_v57 = vadd.f32 1.0, %v4027_v15  ;;  %v2855_v16 = vmul.f32 %v2854_v35, %v5396_v17  ;;  %vm2873_vm4 = vmor %vm2871_vm3, %vm2872_vm2  ;;  %v2878_v37 = vor.u32 1.1754944e-38, %v2877_v22  ;;  %v4293_v15 = vld [vmem:[%s4813_s4 + $0x50] sm:$0xff]  ;;  %v4292_v61 = vld [vmem:[%s4813_s4 + $0x48] sm:$0xff] }
 0x867   : > { %4469 = vrcp.f32 %v5643_v40  ;;  %v2874_v24 = vsel %vm2873_vm4, %v5590_v11, %v2870_v9  ;;  %vm2876_vm5 = vcmp.eq.f32.partialorder %v2875_v21, 8.507059e+37  ;;  %v2772_v5 = vadd.f32 0.18741608, %v2771_v45  ;;  %3218 = vmatpush.bf16.msrb.mxu3 %v4293_v15 }
 0x868   : > { %v2807_v38 = vmul.f32 %v2806_v19, %v5609_v50  ;;  %v2639_v17 = vsel %vm5599_vm7, %v5565_v28, %v2634_v4  ;;  %v5662_v33 = vmul.f32 %v5635_v1, %v5567_v27  ;;  %v2879_v0 = vsel %vm2876_vm5, %v2878_v37, %v2874_v24  ;;  %v4299_v28 = vld [vmem:[%s4813_s4 + $0x80] sm:$0xff] }
 0x869   : > { %v2818_v11 = vmul.f32 %v2817_v13, %v5609_v50  ;;  %v2615_v44 = vmul.f32 %v5552_v58, %v5362_v39  ;;  %v5668_v23 = vadd.f32 0.18741608, %v5466_v53  ;;  %v2880_v21 = vmul.f32 %v2879_v0, %v2855_v16  ;;  %3234 = vmatpush.bf16.msra.mxu0 %v4299_v28  ;;  %3248 = vmatpush.bf16.msrb.mxu1 %v4307_v25  ;;  %v4291_v16 = vld [vmem:[%s4813_s4 + $0x40] sm:$0xff] }
 0x86a   : > { %v4468_v35 = vpop.eup %4467  ;;  %v2893_v56 = vmul.f32 %v2892_v2, %v5447_v52  ;;  %v2933_v59 = vmul.f32 %v2925_v57, %v5453_v31  ;;  %v4028_v20 = vclamps-f32 %v5638_v46, 1.0  ;;  %v2773_v58 = vmul.f32 %v2772_v5, %v5481_v3  ;;  %v4284_v52 = vld [vmem:[%s4813_s4 + $0x8] sm:$0xff]  ;;  %v4283_v57 = vld [vmem:[%s4813_s4] sm:$0xff] }
 0x86b   : > { %v2907_v22 = vmul.f32 %v4468_v35, %v5613_v51  ;;  %v2819_v41 = vadd.f32 0.014752088, %v2818_v11  ;;  %v5676_v39 = vmul.f32 %v2639_v17, %v2615_v44  ;;  %v4031_v53 = vclamps-f32 %v2880_v21, 1.0  ;;  %3205 = vmatpush.bf16.msra.mxu2 %v4284_v52  ;;  %3219 = vmatpush.bf16.msrb.mxu3 %v4292_v61 }
 0x86c   : > { %v2808_v10 = vadd.f32 0.0036580483, %v2807_v38  ;;  %v2668_v60 = vsub.f32 1.0, %v5662_v33  ;;  %v2917_v31 = vand.u32 2147483648, %v5613_v51  ;;  %v2894_v46 = vadd.f32 1.1283791, %v2893_v56 }
 0x86d   : > { %v4470_v47 = vpop.eup %4469  ;;  %v2908_v45 = vsub.f32 1.0, %v2907_v22  ;;  %v2820_v26 = vmul.f32 %v2819_v41, %v5609_v50  ;;  %v2929_v63 = vadd.f32 1.0, %v4031_v53  ;;  %vm2911_vm6 = vweird.f32 %v5613_v51 }
 0x86e   : > { %v2787_v3 = vmul.f32 %v4470_v47, %v5643_v40  ;;  %vm2912_vm9 = vweird.f32 %v4468_v35  ;;  %v2915_v19 = vand.u32 2147483647, %v5613_v51  ;;  %v2774_v13 = vadd.f32 1.1283791, %v2773_v58 }
 0x86f   : > { %v2909_v4 = vmul.f32 %v4468_v35, %v2908_v45  ;;  %v2821_v9 = vadd.f32 0.112945676, %v2820_v26  ;;  %v2937_v2 = vmul.f32 %v2929_v63, %v5462_v43  ;;  %v2809_v6 = vmul.f32 %v2808_v10, %v5609_v50  ;;  %vm2913_vm11 = vmor %vm2911_vm6, %vm2912_vm9  ;;  %3206 = vmatpush.bf16.msra.mxu2 %v4283_v57  ;;  %3220 = vmatpush.bf16.msrb.mxu3 %v4291_v16 }
 0x870   : > { %v2788_v14 = vsub.f32 1.0, %v2787_v3  ;;  %v2918_v24 = vor.u32 1.1754944e-38, %v2917_v31  ;;  %v2797_v5 = vand.u32 2147483648, %v5643_v40  ;;  %vm2792_vm12 = vweird.f32 %v4470_v47 }
 0x871   : > { %v2910_v37 = vadd.f32 %v4468_v35, %v2909_v4  ;;  %v2822_v38 = vmul.f32 %v2821_v9, %v5609_v50  ;;  %v2941_v18 = vpack.c.bf16 %v2937_v2, %v2933_v59  ;;  %v2795_v43 = vand.u32 2147483647, %v5643_v40 }
 0x872   : > { %v2789_v15 = vmul.f32 %v4470_v47, %v2788_v14  ;;  %v2895_v17 = vmul.f32 %v2894_v46, %v5424_v12  ;;  %vm2916_vm8 = vcmp.eq.f32.partialorder %v2915_v19, 8.507059e+37  ;;  %vm2791_vm13 = vweird.f32 %v5643_v40 }
 0x873   : > { %v2914_v33 = vsel %vm2913_vm11, %v4468_v35, %v2910_v37  ;;  %v2823_v0 = vadd.f32 0.4994258, %v2822_v38  ;;  %v2810_v21 = vadd.f32 0.05243302, %v2809_v6  ;;  %3235 = vmatmul.bf16.vlgmr.msra.gmra.mxu0 %v2941_v18  ;;  %v2669_v51 = vmul.f32 %v5635_v1, %v2668_v60  ;;  %vm2793_vm14 = vmor %vm2791_vm13, %vm2792_vm12 }
 0x874   : > { %v2919_v11 = vsel %vm2916_vm8, %v2918_v24, %v2914_v33  ;;  %v2790_v44 = vadd.f32 %v4470_v47, %v2789_v15  ;;  %v2798_v28 = vor.u32 1.1754944e-38, %v2797_v5  ;;  %v4025_v12 = vclamps-f32 %v5676_v39, 1.0 }
 0x875   : > { %v2920_v56 = vmul.f32 %v2919_v11, %v2895_v17  ;;  %v2824_v25 = vmul.f32 %v2823_v0, %v5609_v50  ;;  %v2775_v35 = vmul.f32 %v2774_v13, %v5450_v30  ;;  %vm2796_vm15 = vcmp.eq.f32.partialorder %v2795_v43, 8.507059e+37 }
 0x876   : > { %v2794_v59 = vsel %vm2793_vm14, %v4470_v47, %v2790_v44  ;;  %v2926_v22 = vadd.f32 1.0, %v4028_v20  ;;  %v2653_v58 = vmul.f32 %v5668_v23, %v5385_v29  ;;  %v2594_v10 = vmul.f32 0.5, %v5412_v55 }
 0x877   : > { %v4032_v41 = vclamps-f32 %v2920_v56, 1.0  ;;  %v2799_v53 = vsel %vm2796_vm15, %v2798_v28, %v2794_v59  ;;  %v2825_v40 = vadd.f32 1.0, %v2824_v25  ;;  %v2811_v61 = vmul.f32 %v2810_v21, %v5609_v50 }
 0x878   : > { %v2800_v52 = vmul.f32 %v2799_v53, %v2775_v35  ;;  %v2670_v60 = vadd.f32 %v5635_v1, %v2669_v51  ;;  %vm2672_vm10 = vweird.f32 %v5635_v1  ;;  %v2923_v30 = vadd.f32 1.0, %v4025_v12 }
 0x879   : > { %v2930_v39 = vadd.f32 1.0, %v4032_v41  ;;  %4471 = vrcp.f32 %v2825_v40  ;;  %v2677_v20 = vand.u32 2147483648, %v5567_v27  ;;  %v2934_v45 = vmul.f32 %v2926_v22, %v5459_v42  ;;  %v4414_v41 = vld [vmem:[%s5880_s24] ss:$0 sm:$0xff] }
 0x87a   : > { %v4029_v47 = vclamps-f32 %v2800_v52, 1.0  ;;  %vm2671_vm0 = vweird.f32 %v5567_v27  ;;  %v2675_v29 = vand.u32 2147483647, %v5567_v27  ;;  %v2587_v23 = vmul.f32 0.5, %v5351_v32 }
 0x87b   : > { %v2938_v55 = vmul.f32 %v2930_v39, %v2594_v10  ;;  %vm2673_vm7 = vmor %vm2671_vm0, %vm2672_vm10  ;;  %v2591_v31 = vmul.f32 0.5, %v5431_v7  ;;  %v2812_v63 = vadd.f32 0.18741608, %v2811_v61  ;;  %v2654_v46 = vadd.f32 1.1283791, %v2653_v58 }
 0x87c   : > { %v2927_v26 = vadd.f32 1.0, %v4029_v47  ;;  %v2674_v3 = vsel %vm2673_vm7, %v5635_v1, %v2670_v60  ;;  %v2931_v19 = vmul.f32 %v2923_v30, %v2587_v23  ;;  %v2678_v9 = vor.u32 1.1754944e-38, %v2677_v20 }
 0x87d   : > { %v2942_v4 = vpack.c.bf16 %v2938_v55, %v2934_v45  ;;  %vm2676_vm1 = vcmp.eq.f32.partialorder %v2675_v29, 8.507059e+37  ;;  %v2813_v14 = vmul.f32 %v2812_v63, %v5609_v50  ;;  %v2655_v6 = vmul.f32 %v2654_v46, %v5371_v49 }
 0x87e   : > { %v2935_v2 = vmul.f32 %v2927_v26, %v2591_v31  ;;  %v2679_v13 = vsel %vm2676_vm1, %v2678_v9, %v2674_v3  ;;  %v2837_v16 = vand.u32 2147483648, %v2825_v40  ;;  %v2835_v24 = vand.u32 2147483647, %v2825_v40 }
 0x87f   : > { %v4472_v42 = vpop.eup %4471  ;;  %3249 = vmatmul.bf16.vlgmr.msrb.gmra.mxu1 %v2942_v4  ;;  %v2680_v57 = vmul.f32 %v2679_v13, %v2655_v6  ;;  %v2814_v37 = vadd.f32 1.1283791, %v2813_v14  ;;  %vm2831_vm3 = vweird.f32 %v2825_v40  ;;  %v2588_v0 = vmul.f32 0.5, %v5359_v36 }
 0x880   : > { %v2939_v27 = vpack.c.bf16 %v2935_v2, %v2931_v19  ;;  %v2827_v32 = vmul.f32 %v4472_v42, %v2825_v40  ;;  %vm2832_vm2 = vweird.f32 %v4472_v42  ;;  %v2838_v38 = vor.u32 1.1754944e-38, %v2837_v16 }
 0x881   : > { %vm2833_vm4 = vmor %vm2831_vm3, %vm2832_vm2  ;;  %v4026_v18 = vclamps-f32 %v2680_v57, 1.0  ;;  %v2815_v15 = vmul.f32 %v2814_v37, %v5584_v62  ;;  %vm2836_vm5 = vcmp.eq.f32.partialorder %v2835_v24, 8.507059e+37  ;;  %v2592_v11 = vmul.f32 0.5, %v5550_v48 }
 0x882   : > { %v2828_v7 = vsub.f32 1.0, %v2827_v32  ;;  %3207 = vmatmul.bf16.vlgmr.msra.gmra.mxu2 %v2939_v27 }
 0x883   : > { %v2924_v49 = vadd.f32 1.0, %v4026_v18 }
 0x884   : > { %v2829_v1 = vmul.f32 %v4472_v42, %v2828_v7 }
 0x885   : > { %v2932_v21 = vmul.f32 %v2924_v49, %v2588_v0 }
 0x886   : > { %v2830_v5 = vadd.f32 %v4472_v42, %v2829_v1 }
 0x888   : > { %v2834_v43 = vsel %vm2833_vm4, %v4472_v42, %v2830_v5 }
 0x889   : > { %v2839_v50 = vsel %vm2836_vm5, %v2838_v38, %v2834_v43 }
 0x88a   : > { %v2840_v17 = vmul.f32 %v2839_v50, %v2815_v15 }
 0x88c   : > { %v4030_v33 = vclamps-f32 %v2840_v17, 1.0 }
 0x88e   : > { %v2928_v44 = vadd.f32 1.0, %v4030_v33 }
 0x890   : > { %v2936_v51 = vmul.f32 %v2928_v44, %v2592_v11 }
 0x892   : > { %v2940_v56 = vpack.c.bf16 %v2936_v51, %v2932_v21 }
 0x894   : > { %3221 = vmatmul.bf16.vlgmr.msrb.gmra.mxu3 %v2940_v56 }
 0x8f0   : > { %v3236_v25 = vpop.f32.mrf.mxu0 }
 0x8f8   : > { %v3238_v10 = vpop.f32.mrf.mxu0 }
 0x8fc   : > { %v3250_v35 = vpop.f32.mrf.mxu1 }
 0x904   : > { %v3252_v61 = vpop.f32.mrf.mxu1 }
 0x905   : > { %v3208_v28 = vpop.f32.mrf.mxu2 }
 0x90d   : > { %v3210_v36 = vpop.f32.mrf.mxu2 }
 0x917   : > { %v3222_v12 = vpop.f32.mrf.mxu3 }
 0x918   : > { %v3223_v62 = vadd.f32 %v3222_v12, %v3208_v28 }
 0x91a   : > { %v3237_v59 = vadd.f32 %v3236_v25, %v3223_v62 }
 0x91c   : > { %v3251_v22 = vadd.f32 %v3250_v35, %v3237_v59 }
 0x91e   : > { %v3255_v48 = vadd.f32 %v3251_v22, %v5230_v54 }
 0x91f   : > { %v3224_v53 = vpop.f32.mrf.mxu3 }
 0x920   : > { %v3261_v40 = vadd.f32 %v4414_v41, %v3255_v48  ;;  %v3225_v58 = vadd.f32 %v3224_v53, %v3210_v36 }
 0x922   : > { %3263 = vst [vmem:[#allocation2] sm:$0xff] %v3261_v40  ;;  %v3239_v52 = vadd.f32 %v3238_v10, %v3225_v58 }
 0x924   : > { %v3253_v60 = vadd.f32 %v3252_v61, %v3239_v52 }
 0x926   : > { %v3256_v39 = vadd.f32 %v3253_v60, %v5233_v8  ;;  %3268 = sbr.rel (%p4161_p0) target bundleno = 2629 (0xa45), region = 119 }
 0x928   : > { %v3262_v30 = vadd.f32 %v4414_v41, %v3256_v39 }
 0x92a   : > { %3264 = vst [vmem:[#allocation2 + $0x8] sm:$0xff] %v3262_v30 }
 0x92b   : > { %v3273_v20 = vrot.slane %v3262_v30, 7  ;;  %vm3274_vm6 = vcmask 1041409   ;;  %vm3277_vm9 = vcmask 1041408   ;;  %v4475_v16 = vld [vmem:[%s5881_s5] ss:$0 sm:$0xff] }
 0x92c   : > { %v4476_v24 = vld [vmem:[%s5882_s6] ss:$0 sm:$0xff] }
 0x92d   : > { %v3275_v54 = vsel %vm3274_vm6, %v3273_v20, %v3261_v40 }
 0x92e   : > { %v3278_v47 = vsel %vm3277_vm9, %v3275_v54, 0.0 }
 0x92f   : > { %3279 = vadd.xlane.f32.xlu0 %v3278_v47 }
 0x9a2   : > { %v3280_v45 = vpop.xlane.xlu0 %3279 }
 0x9a3   : > { %v3281_v29 = vmul.f32 %v3280_v45, %v4993_v34 }
 0x9a5   : > { %v3283_v55 = vrot.slane %v3281_v29, 1  ;;  %v3286_v23 = vsub.f32 %v3261_v40, %v3281_v29 }
 0x9a7   : > { %v3287_v31 = vsub.f32 %v3262_v30, %v3283_v55  ;;  %v3288_v8 = vmul.f32 %v3286_v23, %v3286_v23 }
 0x9a9   : > { %v3289_v26 = vmul.f32 %v3287_v31, %v3287_v31 }
 0x9ab   : > { %v3292_v63 = vrot.slane %v3289_v26, 7 }
 0x9ad   : > { %v3293_v46 = vsel %vm3274_vm6, %v3292_v63, %v3288_v8 }
 0x9ae   : > { %v3295_v3 = vsel %vm3277_vm9, %v3293_v46, 0.0 }
 0x9af   : > { %3296 = vadd.xlane.f32.xlu0 %v3295_v3 }
 0xa22   : > { %v3297_v4 = vpop.xlane.xlu0 %3296 }
 0xa23   : > { %v3298_v19 = vmul.f32 %v3297_v4, %v4993_v34 }
 0xa25   : > { %v3299_v9 = vadd.f32 1e-12, %v3298_v19 }
 0xa27   : > { %4477 = vrsqrt.f32 %v3299_v9  ;;  %vm3306_vm12 = vweird.f32 %v3299_v9 }
 0xa2d   : > { %v4478_v2 = vpop.eup %4477 }
 0xa2e   : > { %v3301_v42 = vmul.f32 %v4478_v2, %v3299_v9  ;;  %vm3307_vm11 = vweird.f32 %v4478_v2 }
 0xa2f   : > { %vm3308_vm8 = vmor %vm3306_vm12, %vm3307_vm11 }
 0xa30   : > { %v3302_v13 = vmul.f32 %v4478_v2, %v3301_v42 }
 0xa32   : > { %v3303_v27 = vmul.f32 0.5, %v3302_v13 }
 0xa34   : > { %v3304_v14 = vsub.f32 1.5, %v3303_v27 }
 0xa36   : > { %v3305_v32 = vmul.f32 %v4478_v2, %v3304_v14 }
 0xa38   : > { %v3309_v6 = vsel %vm3308_vm8, %v4478_v2, %v3305_v32 }
 0xa39   : > { %v3311_v7 = vrot.slane %v3309_v6, 1  ;;  %v3314_v57 = vmul.f32 %v3309_v6, %v3286_v23 }
 0xa3b   : > { %v3315_v34 = vmul.f32 %v3311_v7, %v3287_v31  ;;  %v3319_v37 = vmul.f32 %v4475_v16, %v3314_v57 }
 0xa3d   : > { %v3320_v1 = vmul.f32 %v4475_v16, %v3315_v34  ;;  %v3324_v38 = vadd.f32 %v4476_v24, %v3319_v37 }
 0xa3f   : > { %v3325_v5 = vadd.f32 %v4476_v24, %v3320_v1 }
 0xa41   : > { %v3328_v18 = vrot.slane %v3325_v5, 7 }
 0xa43   : > { %v3329_v15 = vsel %vm3274_vm6, %v3328_v18, %v3324_v38 }
 0xa44   : > { %3331 = vst [vmem:[%s5883_s23] sm:$0x3] %v3329_v15 }
 0xa45 PF: > { %s5884_s26 = sld [smem:[#allocation11_spill]]  ;;  %s4163_s9 = sshll.u32 %s4563_s1, 1 }
 0xa46   : > { %s5886_s8 = sld [smem:[#allocation33_spill]]  ;;  %s5887_s29 = scalar_lea.vmem [#allocation5], %s4755_s22 }
 0xa47   : > { %s3345_s30 = sshll.u32 %s5887_s29, 4  ;;  %s3346_s30 = int_to_ptr.vmem [resolvable:$true] %s3345_s30 }
 0xa4b   : > { %s5888_s20 = sand.u32 1, %s5884_s26  }
 0xa4c   : > { %s3343_s18 = scalar_lea.hbm %s5886_s8, %s4163_s9  ;;  %s3333_s4 = scalar_lea.sflag [#allocation6], %s5888_s20 }
 0xa4d   : > { %s3347_s25 = sshll.u32 %s3343_s18, 4  ;;  %s4499_s5 = scalar_lea.hbm %s5886_s8, 4  ;;  %s3348_s25 = int_to_ptr.hbm [resolvable:$true] %s3347_s25 }
 0xa4e   : > { %s4493_s24 = sshra.s32 %s3348_s25, 4  ;;  %s4494_s24 = int_to_ptr.hbm [resolvable:$true] %s4493_s24 }
 0xa4f   : > { %s4495_s0 = scalar_lea.hbm %s4494_s24, 2  ;;  %p4500_p5 = scmp.lt.s32.totalorder %s4494_s24, %s5886_s8 }
 0xa50   : > { %p4496_p1 = scmp.ne.s32.totalorder %s4494_s24, %s4495_s0  ;;  %p4501_p6 = scmp.lt.s32.totalorder %s4499_s5, %s4495_s0 }
 0xa52   : > { %p4497_p2 = pnand %p4496_p1, %p4731_p3  ;;  %p4502_p7 = por %p4501_p6, %p4500_p5 }
 0xa54   : > { %p4498_p4 = pneg %p4497_p2 }
 0xa56   : > { %p4503_p8 = pnand %p4502_p7, %p4498_p4 }
 0xa58   : > { %4506 = shalt.err (!%p4503_p8)
}
 0xa59   : > { %4317 = dma.vmem_to_hbm [thread:$0]  (%p4731_p3), %s3346_s30, 32, %s3348_s25, %s3333_s4  }
 0xa5a PF: > { %s5889_s22 = sld [smem:[#allocation15_spill]] }
 0xa5b   : > { %s5890_s6 = sld [smem:[#allocation10_spill]] }
 0xa60   : > { %p4323_p10 = scmp.ge.s32.totalorder %s5889_s22, 2 }
 0xa61   : > { %s3359_s26 = sand.u32 1, %s5890_s6  }
 0xa62   : > { %p4320_p11 = pnand %p4323_p10, %p4741_p9  ;;  %s3360_s9 = scalar_lea.sflag [#allocation6], %s3359_s26 }
 0xa64   : > { %p4321_p12 = pneg %p4320_p11 }
 0xa66   : > { %4542 = dma.done.wait (%p4321_p12), %s3360_s9, 32  }
 0xa67   : > { %4544 = vsyncadd (%p4321_p12), %s3360_s9, 4294967264  ;;  %s32_s23 = sadd.s32 1, %s5889_s22   ;;  %s5892_s0 = sld [smem:[#allocation11_spill]] }
 0xa68   : > { %p29_p13 = scmp.ge.s32.totalorder %s32_s23, 6   ;;  %s5893_s30 = sld [smem:[#allocation12_spill]] }
 0xa69   : > { %s5894_s20 = sld [smem:[#allocation20_spill]] }
 0xa6a   : > { %s5895_s21 = sld [smem:[#allocation13_spill]]  ;;  %31 = sbr.rel (!%p29_p13) target bundleno = 19 (0x13), region = 192 }
 0xa6b   : > { %s5896_s1 = sld [smem:[#allocation14_spill]] }
 0xa6c   : > { %s5897_s22 = sld [smem:[#allocation16_spill]] }
 0xa6d   : > { %s5898_s2 = sld [smem:[#allocation18_spill]] }
 0xa6f   :  { %3366 = vsyncpa [#allocation6], 1 }
 0xa70   :  { %3368 = vsyncpa [#allocation6 + $0x1], 1 }
 0xa71   :  { %3369 = vsyncmov [#allocation4] }
 0xa74   :  { %s3370_s19 = vpop.sfrf %3369 }
 0xa75   :  { %p4166_p3 = scmp.ne.s32.totalorder %s3370_s19, 0 }
 0xa77   :  { %3374 = shalt.err (%p4166_p3)  }

</bundles_post_ra>
